<compile_context>
chip_gen: v7x
topology: tpu7x:2x2x1
jax: 0.10.0
libtpu: 0.0.40
codegen_flags: <defaults>
</compile_context>

<pallas_src>
import math
from functools import partial

import jax
import jax.numpy as jnp
from jax import lax
from jax.experimental import pallas as pl
from jax.experimental.pallas import tpu as pltpu

# ----------------------------- config ---------------------------------------
D_MODEL = 32
N_HEADS = 2
D_FF = 64
N_BLOCKS = 1
SEQ_LEN = 32
BATCH = 2

LANES = 128


# ----------------------------- weight-slab layout ----------------------------
# Per-layer slab (ROWS, 128), f32, ROWS = round_up(D + max(D, DF) + 3, 8):
#   rows [0, D)        cols [0,D) Wk | [D,2D) Wv | [2D,2D+DF) W1
#   rows [D, 2D)       cols [0,D) Wo
#   rows [D, D+DF)     cols [D,2D) W2
#   row  VEC+0         cols [0,D) bk | [D,2D) bv | [2D,2D+DF) b1
#   row  VEC+1         cols [0,D) bo | [D,2D) ln1_g | [2D,3D) ln1_b | [3D,4D) b2
#   row  VEC+2         cols [0,D) ln2_g | [D,2D) ln2_b
# with VEC = D + max(D, DF).
def _slab_layout(d_model, d_ff):
    vec = d_model + max(d_model, d_ff)
    rows = ((vec + 3 + 7) // 8) * 8
    assert max(2 * d_model + d_ff, 4 * d_model) <= LANES, "slab layout needs <=128 lanes"
    return vec, rows


def pack_layer_params(p, d_model=D_MODEL, d_ff=D_FF):
    D, DF = d_model, d_ff
    VEC, ROWS = _slab_layout(D, DF)
    f32 = jnp.float32
    slab = jnp.zeros((ROWS, LANES), f32)
    slab = slab.at[0:D, 0:D].set(p['wk'].astype(f32))
    slab = slab.at[0:D, D:2 * D].set(p['wv'].astype(f32))
    slab = slab.at[0:D, 2 * D:2 * D + DF].set(p['w1'].astype(f32))
    slab = slab.at[D:2 * D, 0:D].set(p['wo'].astype(f32))
    slab = slab.at[D:D + DF, D:2 * D].set(p['w2'].astype(f32))
    slab = slab.at[VEC, 0:D].set(p['bk'].astype(f32))
    slab = slab.at[VEC, D:2 * D].set(p['bv'].astype(f32))
    slab = slab.at[VEC, 2 * D:2 * D + DF].set(p['b1'].astype(f32))
    slab = slab.at[VEC + 1, 0:D].set(p['bo'].astype(f32))
    slab = slab.at[VEC + 1, D:2 * D].set(p['ln1_g'].astype(f32))
    slab = slab.at[VEC + 1, 2 * D:3 * D].set(p['ln1_b'].astype(f32))
    slab = slab.at[VEC + 1, 3 * D:4 * D].set(p['b2'].astype(f32))
    slab = slab.at[VEC + 2, 0:D].set(p['ln2_g'].astype(f32))
    slab = slab.at[VEC + 2, D:2 * D].set(p['ln2_b'].astype(f32))
    return slab


def pack_architecture_params(params, d_model=D_MODEL, d_ff=D_FF):
    layers = list(params['blocks_1']) + list(params['blocks_2'])
    return jnp.stack([pack_layer_params(p, d_model, d_ff) for p in layers])


# ----------------------------- fused whole-architecture kernel ---------------
def _stable_softplus(x):
    # overflow-safe softplus: max(x, 0) + log(1 + exp(-|x|))
    return jnp.maximum(x, 0.0) + jnp.log(1.0 + jnp.exp(-jnp.abs(x)))


def _arch_kernel(q_ref, qa_ref, sim_ref, diff_ref, w_ref, o_ref,
                 *, n_heads, d_ff, n_blocks):
    # q_ref / qa_ref : (L, D) one batch element of q_embed / qa_embed
    # sim_ref        : (L, L) state similarity
    # diff_ref       : (L, 1) decay / difficulty
    # w_ref          : (n_layers, ROWS, 128) packed weight slab
    L, D = q_ref.shape
    DF = d_ff
    d_k = D // n_heads
    VEC = D + max(D, DF)
    scale = jnp.float32(1.0 / math.sqrt(d_k))
    neg = jnp.float32(-1e32)
    eps = jnp.float32(1e-5)

    # --- iota-derived constants: built once, shared by all layers & heads ----
    r = lax.broadcasted_iota(jnp.int32, (L, L), 0)   # query index
    c = lax.broadcasted_iota(jnp.int32, (L, L), 1)   # key index
    allow_incl = c <= r                      # mask==1: np.triu(k=1)==0 (causal incl diag)
    allow_strict = c < r                     # mask==0: np.triu(k=0)==0 (strictly causal)
    allow_incl_f = allow_incl.astype(jnp.float32)
    allow_strict_f = allow_strict.astype(jnp.float32)
    cum_mat = (r <= c).astype(jnp.float32)   # key-axis cumsum as an MXU matmul
    row0 = r == 0                            # zero_pad mask (first query row)

    sim = sim_ref[...]                                   # (L, L)
    gamma = -_stable_softplus(diff_ref[...])              # (L, 1)

    def layer_norm(x, g, b):
        mu = jnp.mean(x, axis=-1, keepdims=True)
        xc = x - mu
        var = jnp.mean(xc * xc, axis=-1, keepdims=True)
        return xc * lax.rsqrt(var + eps) * g + b

    def layer(li, x_q, x_v, mask_val, apply_pos, same_qv):
        # ---- K/Q/V projections (kq_same=True and query == key => q == k) ----
        if same_qv:
            # fused [Wk | Wv] projection: one (L,D)@(D,2D) MXU call
            kv = jnp.dot(x_q, w_ref[li, 0:D, 0:2 * D],
                         preferred_element_type=jnp.float32)
            kv = kv + w_ref[li, VEC:VEC + 1, 0:2 * D]
            qk = kv[:, 0:D]
            vv = kv[:, D:2 * D]
        else:
            qk = jnp.dot(x_q, w_ref[li, 0:D, 0:D],
                         preferred_element_type=jnp.float32)
            qk = qk + w_ref[li, VEC:VEC + 1, 0:D]
            vv = jnp.dot(x_v, w_ref[li, 0:D, D:2 * D],
                         preferred_element_type=jnp.float32)
            vv = vv + w_ref[li, VEC:VEC + 1, D:2 * D]

        allow = allow_incl if mask_val == 1 else allow_strict
        allow_f = allow_incl_f if mask_val == 1 else allow_strict_f

        attn = jnp.zeros((L, D), jnp.float32)
        for h in range(n_heads):
            qh = qk[:, h * d_k:(h + 1) * d_k]            # == kh (q == k)
            vh = vv[:, h * d_k:(h + 1) * d_k]

            scores = lax.dot_general(qh, qh, (((1,), (1,)), ((), ())),
                                     preferred_element_type=jnp.float32) * scale
            # first (forgetting-statistics) softmax, masked then re-masked
            sm = jnp.where(allow, scores, neg)
            e1 = jnp.exp(sm - jnp.max(sm, axis=-1, keepdims=True))
            p1 = (e1 * allow_f) * pl.reciprocal(
                jnp.sum(e1, axis=-1, keepdims=True), approx=True)

            distcum = jnp.dot(p1, cum_mat, preferred_element_type=jnp.float32)
            disttotal = jnp.sum(p1, axis=-1, keepdims=True)
            dist_sc = jnp.sqrt(jnp.maximum((disttotal - distcum) * sim, 0.0))
            total_effect = jnp.clip(jnp.exp(dist_sc * gamma), 1e-5, 1e5)

            # second (value-weighting) softmax
            s2 = jnp.where(allow, scores * total_effect, neg)
            e2 = jnp.exp(s2 - jnp.max(s2, axis=-1, keepdims=True))
            p2 = e2 * pl.reciprocal(jnp.sum(e2, axis=-1, keepdims=True),
                                    approx=True)
            if mask_val == 0:                             # zero_pad=True
                p2 = jnp.where(row0, 0.0, p2)

            o_h = jnp.dot(p2, vh, preferred_element_type=jnp.float32)  # (L, d_k)
            # out_proj accumulated per head: concat_h(o_h) @ Wo == sum_h o_h @ Wo_h
            attn = attn + jnp.dot(
                o_h, w_ref[li, D + h * d_k:D + (h + 1) * d_k, 0:D],
                preferred_element_type=jnp.float32)
        attn = attn + w_ref[li, VEC + 1:VEC + 2, 0:D]     # out_proj bias

        # residual + LayerNorm 1
        x = layer_norm(x_q + attn,
                       w_ref[li, VEC + 1:VEC + 2, D:2 * D],
                       w_ref[li, VEC + 1:VEC + 2, 2 * D:3 * D])
        if apply_pos:
            h1 = jnp.maximum(
                jnp.dot(x, w_ref[li, 0:D, 2 * D:2 * D + DF],
                        preferred_element_type=jnp.float32)
                + w_ref[li, VEC:VEC + 1, 2 * D:2 * D + DF], 0.0)
            y = jnp.dot(h1, w_ref[li, D:D + DF, D:2 * D],
                        preferred_element_type=jnp.float32)
            y = y + w_ref[li, VEC + 1:VEC + 2, 3 * D:4 * D]
            x = layer_norm(x + y,
                           w_ref[li, VEC + 2:VEC + 3, 0:D],
                           w_ref[li, VEC + 2:VEC + 3, D:2 * D])
        return x

    # --------------------- whole Architecture, statically unrolled -----------
    y = qa_ref[...]
    for i in range(n_blocks):                             # blocks_1
        y = layer(i, y, y, mask_val=1, apply_pos=True, same_qv=True)
    x = q_ref[...]
    flag_first = True
    for j in range(2 * n_blocks):                         # blocks_2
        li = n_blocks + j
        if flag_first:
            x = layer(li, x, x, mask_val=1, apply_pos=False, same_qv=True)
            flag_first = False
        else:
            x = layer(li, x, y, mask_val=0, apply_pos=True, same_qv=False)
            flag_first = True
    o_ref[...] = x


def architecture_forward(w_slab, q_embed_data, qa_embed_data, satate_sim, decay,
                         n_heads=N_HEADS, d_ff=D_FF):
    """Whole ClusterKT Architecture in a single pallas_call."""
    B, L, D = q_embed_data.shape
    n_layers = w_slab.shape[0]
    n_blocks = n_layers // 3
    f32 = jnp.float32

    kernel = partial(_arch_kernel, n_heads=n_heads, d_ff=d_ff, n_blocks=n_blocks)
    return pl.pallas_call(
        kernel,
        out_shape=jax.ShapeDtypeStruct((B, L, D), f32),
        grid=(B,),
        in_specs=[
            pl.BlockSpec((None, L, D), lambda b: (b, 0, 0)),   # q_embed_data
            pl.BlockSpec((None, L, D), lambda b: (b, 0, 0)),   # qa_embed_data
            pl.BlockSpec((None, L, L), lambda b: (b, 0, 0)),   # state similarity
            pl.BlockSpec((None, L, 1), lambda b: (b, 0, 0)),   # decay / difficulty
            pl.BlockSpec(w_slab.shape, lambda b: (0, 0, 0)),   # grid-invariant weight slab
        ],
        out_specs=pl.BlockSpec((None, L, D), lambda b: (b, 0, 0)),
        compiler_params=pltpu.CompilerParams(
            dimension_semantics=("parallel",)),
    )(q_embed_data.astype(f32), qa_embed_data.astype(f32),
      satate_sim.astype(f32), decay.astype(f32), w_slab.astype(f32))


# ----------------------------- pure-JAX reference (for validation) -----------
def _layer_norm_ref(x, g, b, eps=1e-5):
    mu = jnp.mean(x, axis=-1, keepdims=True)
    var = jnp.mean((x - mu) ** 2, axis=-1, keepdims=True)
    return (x - mu) / jnp.sqrt(var + eps) * g + b


def _ref_layer(p, mask_val, query, key_in, values, sim, diff, n_heads, apply_pos):
    B, L, D = query.shape
    d_k = D // n_heads

    def proj(x, w, b):
        return (x @ w + b).reshape(B, L, n_heads, d_k).transpose(0, 2, 1, 3)

    k = proj(key_in, p['wk'], p['bk'])
    q = proj(query, p['wk'], p['bk'])                # kq_same=True
    v = proj(values, p['wv'], p['bv'])

    r = jnp.arange(L)[:, None]
    c = jnp.arange(L)[None, :]
    allow = (c <= r) if mask_val == 1 else (c < r)
    zero_pad = mask_val != 1

    scores = jnp.einsum('bhqd,bhkd->bhqk', q, k) / math.sqrt(d_k)
    p1 = jax.nn.softmax(jnp.where(allow[None, None], scores, -1e32), -1)
    p1 = p1 * allow[None, None].astype(jnp.float32)
    distcum = jnp.cumsum(p1, -1)
    disttotal = jnp.sum(p1, -1, keepdims=True)
    dist_sc = jnp.sqrt(jnp.maximum((disttotal - distcum) * sim[:, None], 0.0))
    gamma = -jax.nn.softplus(diff)[:, None]          # (B, 1, L, 1)
    te = jnp.clip(jnp.exp(dist_sc * gamma), 1e-5, 1e5)
    s2 = jnp.where(allow[None, None], scores * te, -1e32)
    p2 = jax.nn.softmax(s2, -1)
    if zero_pad:
        p2 = p2.at[:, :, 0, :].set(0.0)
    attn = jnp.einsum('bhqk,bhkd->bhqd', p2, v)
    concat = attn.transpose(0, 2, 1, 3).reshape(B, L, D)
    out = concat @ p['wo'] + p['bo']

    x = _layer_norm_ref(query + out, p['ln1_g'], p['ln1_b'])
    if apply_pos:
        y = jnp.maximum(x @ p['w1'] + p['b1'], 0.0) @ p['w2'] + p['b2']
        x = _layer_norm_ref(x + y, p['ln2_g'], p['ln2_b'])
    return x


def _ref_architecture(params, q_embed_data, qa_embed_data, satate_sim, decay,
                      n_heads):
    y = qa_embed_data
    x = q_embed_data
    for bp in params['blocks_1']:
        y = _ref_layer(bp, 1, y, y, y, satate_sim, decay, n_heads, True)
    flag_first = True
    for bp in params['blocks_2']:
        if flag_first:
            x = _ref_layer(bp, 1, x, x, x, satate_sim, decay, n_heads, False)
            flag_first = False
        else:
            x = _ref_layer(bp, 0, x, x, y, satate_sim, decay, n_heads, True)
            flag_first = True
    return x


# ----------------------------- parameters ------------------------------------
def init_params(key, d_model=D_MODEL, d_ff=D_FF, n_blocks=N_BLOCKS):
    def xavier(k, shape):
        limit = math.sqrt(6.0 / (shape[0] + shape[1]))
        return jax.random.uniform(k, shape, jnp.float32, -limit, limit)

    def make_layer(k):
        ks = jax.random.split(k, 5)
        d = d_model
        return {
            'wk': xavier(ks[0], (d, d)), 'bk': jnp.zeros((d,), jnp.float32),
            'wv': xavier(ks[1], (d, d)), 'bv': jnp.zeros((d,), jnp.float32),
            'wo': xavier(ks[2], (d, d)), 'bo': jnp.zeros((d,), jnp.float32),
            'ln1_g': jnp.ones((d,), jnp.float32),
            'ln1_b': jnp.zeros((d,), jnp.float32),
            'w1': xavier(ks[3], (d, d_ff)), 'b1': jnp.zeros((d_ff,), jnp.float32),
            'w2': xavier(ks[4], (d_ff, d)), 'b2': jnp.zeros((d,), jnp.float32),
            'ln2_g': jnp.ones((d,), jnp.float32),
            'ln2_b': jnp.zeros((d,), jnp.float32),
        }

    keys = jax.random.split(key, 3 * n_blocks)
    return {
        'blocks_1': [make_layer(keys[i]) for i in range(n_blocks)],
        'blocks_2': [make_layer(keys[n_blocks + i]) for i in range(2 * n_blocks)],
    }


# ----------------------------- demo -------------------------------------------
if __name__ == "__main__":
    key = jax.random.PRNGKey(0)
    kp, k1, k2, k3, k4 = jax.random.split(key, 5)
    params = init_params(kp)
    w_slab = pack_architecture_params(params)            # (3, 104, 128)

    q_embed = 0.5 * jax.random.normal(k1, (BATCH, SEQ_LEN, D_MODEL), jnp.float32)
    qa_embed = 0.5 * jax.random.normal(k2, (BATCH, SEQ_LEN, D_MODEL), jnp.float32)
    s = jax.random.normal(k3, (BATCH, SEQ_LEN, D_MODEL), jnp.float32)
    sn = s / jnp.sqrt(jnp.sum(s * s, axis=-1, keepdims=True))
    satate_sim = jnp.einsum('bld,bmd->blm', sn, sn)       # cosine-sim-like
    decay = jax.nn.sigmoid(
        jax.random.normal(k4, (BATCH, SEQ_LEN, 1), jnp.float32))

    fwd = jax.jit(architecture_forward)
    out = jax.block_until_ready(fwd(w_slab, q_embed, qa_embed, satate_sim, decay))

    ref = jax.block_until_ready(
        _ref_architecture(params, q_embed, qa_embed, satate_sim, decay, N_HEADS))

    assert out.shape == (BATCH, SEQ_LEN, D_MODEL)
    assert bool(jnp.all(jnp.isfinite(out)))
    max_err = float(jnp.max(jnp.abs(out - ref)))
    # Tolerance accounts for the approx EUP reciprocal used for the softmax
    # denominators (per-use relative error ~1e-4, compounded over 3 layers).
    assert max_err < 1e-2, f"Pallas output mismatch vs pure-JAX reference: {max_err}"
    print("KERNEL_OK")
</pallas_src>

<mosaic_0001>
module attributes {stable_mosaic.version = 11 : i64} {
  func.func @_arch_kernel(%arg0: i32, %arg1: memref<1x32x32xf32, #tpu.memory_space<vmem>>, %arg2: memref<1x32x32xf32, #tpu.memory_space<vmem>>, %arg3: memref<1x32x32xf32, #tpu.memory_space<vmem>>, %arg4: memref<1x32x1xf32, #tpu.memory_space<vmem>>, %arg5: memref<3x104x128xf32, #tpu.memory_space<vmem>>, %arg6: memref<1x32x32xf32, #tpu.memory_space<vmem>>) attributes {dimension_semantics = [#tpu.dimension_semantics<parallel>], iteration_bounds = array<i64: 2>, scalar_prefetch = 0 : i64, scratch_operands = 0 : i64, tpu.core_type = #tpu.core_type<tc>, window_params = [{transform_indices = @transform_0, window_bounds = array<i64: 1, 32, 32>}, {transform_indices = @transform_1, window_bounds = array<i64: 1, 32, 32>}, {transform_indices = @transform_2, window_bounds = array<i64: 1, 32, 32>}, {transform_indices = @transform_3, window_bounds = array<i64: 1, 32, 1>}, {pipeline_mode = #tpu.pipeline_mode<synchronous>, transform_indices = @transform_4, window_bounds = array<i64: 3, 104, 128>}, {transform_indices = @transform_5, window_bounds = array<i64: 1, 32, 32>}]} {
    %0 = tpu.iota {dimensions = array<i32: 0>} : vector<32x32xi32>
    %1 = tpu.iota {dimensions = array<i32: 1>} : vector<32x32xi32>
    %2 = arith.cmpi sle, %1, %0 : vector<32x32xi32>
    %3 = arith.cmpi slt, %1, %0 : vector<32x32xi32>
    %4 = arith.extui %2 : vector<32x32xi1> to vector<32x32xi32>
    %5 = arith.sitofp %4 : vector<32x32xi32> to vector<32x32xf32>
    %6 = arith.extui %3 : vector<32x32xi1> to vector<32x32xi32>
    %7 = arith.sitofp %6 : vector<32x32xi32> to vector<32x32xf32>
    %8 = arith.cmpi sle, %0, %1 : vector<32x32xi32>
    %9 = arith.extui %8 : vector<32x32xi1> to vector<32x32xi32>
    %10 = arith.sitofp %9 : vector<32x32xi32> to vector<32x32xf32>
    %c0_i32 = arith.constant 0 : i32
    %11 = vector.broadcast %c0_i32 : i32 to vector<32x32xi32>
    %12 = arith.cmpi eq, %0, %11 : vector<32x32xi32>
    %c0 = arith.constant 0 : index
    %c0_0 = arith.constant 0 : index
    %c0_1 = arith.constant 0 : index
    %13 = vector.load %arg3[%c0, %c0_0, %c0_1] : memref<1x32x32xf32, #tpu.memory_space<vmem>>, vector<1x32x32xf32>
    %14 = vector.shape_cast %13 : vector<1x32x32xf32> to vector<32x32xf32>
    %c0_2 = arith.constant 0 : index
    %c0_3 = arith.constant 0 : index
    %c0_4 = arith.constant 0 : index
    %15 = vector.load %arg4[%c0_2, %c0_3, %c0_4] : memref<1x32x1xf32, #tpu.memory_space<vmem>>, vector<1x32x1xf32>
    %16 = vector.shape_cast %15 : vector<1x32x1xf32> to vector<32x1xf32>
    %cst = arith.constant 0.000000e+00 : f32
    %17 = vector.broadcast %cst : f32 to vector<32x1xf32>
    %18 = arith.maximumf %16, %17 : vector<32x1xf32>
    %19 = math.absf %16 : vector<32x1xf32>
    %cst_5 = arith.constant 0.000000e+00 : f32
    %20 = vector.broadcast %cst_5 : f32 to vector<32x1xf32>
    %21 = arith.subf %20, %19 : vector<32x1xf32>
    %22 = math.exp %21 : vector<32x1xf32>
    %cst_6 = arith.constant 1.000000e+00 : f32
    %23 = vector.broadcast %cst_6 : f32 to vector<32x1xf32>
    %24 = arith.addf %23, %22 : vector<32x1xf32>
    %25 = math.log %24 : vector<32x1xf32>
    %26 = arith.addf %18, %25 : vector<32x1xf32>
    %cst_7 = arith.constant 0.000000e+00 : f32
    %27 = vector.broadcast %cst_7 : f32 to vector<32x1xf32>
    %28 = arith.subf %27, %26 : vector<32x1xf32>
    %c0_8 = arith.constant 0 : index
    %c0_9 = arith.constant 0 : index
    %c0_10 = arith.constant 0 : index
    %29 = vector.load %arg2[%c0_8, %c0_9, %c0_10] : memref<1x32x32xf32, #tpu.memory_space<vmem>>, vector<1x32x32xf32>
    %30 = vector.shape_cast %29 : vector<1x32x32xf32> to vector<32x32xf32>
    %c0_11 = arith.constant 0 : index
    %c0_12 = arith.constant 0 : index
    %c0_13 = arith.constant 0 : index
    %31 = vector.load %arg5[%c0_11, %c0_12, %c0_13] : memref<3x104x128xf32, #tpu.memory_space<vmem>>, vector<1x32x64xf32>
    %32 = vector.shape_cast %31 : vector<1x32x64xf32> to vector<32x64xf32>
    %cst_14 = arith.constant dense<0.000000e+00> : vector<32x64xf32>
    %33 = tpu.matmul %30, %32, %cst_14 {dimension_numbers = #tpu.dot_dimension_numbers<[1], [0], [0], [1], [0, 0, 1, 1], [], []>} : vector<32x32xf32>, vector<32x64xf32>, vector<32x64xf32> -> vector<32x64xf32>
    %c0_15 = arith.constant 0 : index
    %c96 = arith.constant 96 : index
    %c0_16 = arith.constant 0 : index
    %34 = vector.load %arg5[%c0_15, %c96, %c0_16] : memref<3x104x128xf32, #tpu.memory_space<vmem>>, vector<1x1x64xf32>
    %35 = vector.shape_cast %34 : vector<1x1x64xf32> to vector<1x64xf32>
    %36 = vector.broadcast %35 : vector<1x64xf32> to vector<32x64xf32>
    %37 = arith.addf %33, %36 : vector<32x64xf32>
    %38 = vector.extract_strided_slice %37 {offsets = [0, 0], sizes = [32, 32], strides = [1, 1]} : vector<32x64xf32> to vector<32x32xf32>
    %39 = vector.extract_strided_slice %37 {offsets = [0, 32], sizes = [32, 32], strides = [1, 1]} : vector<32x64xf32> to vector<32x32xf32>
    %cst_17 = arith.constant 0.000000e+00 : f32
    %40 = vector.broadcast %cst_17 : f32 to vector<32x32xf32>
    %41 = vector.extract_strided_slice %38 {offsets = [0, 0], sizes = [32, 16], strides = [1, 1]} : vector<32x32xf32> to vector<32x16xf32>
    %42 = vector.extract_strided_slice %39 {offsets = [0, 0], sizes = [32, 16], strides = [1, 1]} : vector<32x32xf32> to vector<32x16xf32>
    %cst_18 = arith.constant dense<0.000000e+00> : vector<32x32xf32>
    %43 = tpu.matmul %41, %41, %cst_18 {dimension_numbers = #tpu.dot_dimension_numbers<[1], [1], [0], [0], [0, 0, 1, 0], [], []>} : vector<32x16xf32>, vector<32x16xf32>, vector<32x32xf32> -> vector<32x32xf32>
    %cst_19 = arith.constant 2.500000e-01 : f32
    %44 = vector.broadcast %cst_19 : f32 to vector<32x32xf32>
    %45 = arith.mulf %43, %44 : vector<32x32xf32>
    %cst_20 = arith.constant -1.000000e+32 : f32
    %46 = vector.broadcast %cst_20 : f32 to vector<32x32xf32>
    %47 = arith.select %2, %45, %46 : vector<32x32xi1>, vector<32x32xf32>
    %cst_21 = arith.constant dense<0xFF800000> : vector<32xf32>
    %48 = vector.multi_reduction <maximumf>, %47, %cst_21 [1] : vector<32x32xf32> to vector<32xf32>
    %49 = vector.shape_cast %48 : vector<32xf32> to vector<32x1xf32>
    %50 = vector.broadcast %49 : vector<32x1xf32> to vector<32x32xf32>
    %51 = arith.subf %47, %50 : vector<32x32xf32>
    %52 = math.exp %51 : vector<32x32xf32>
    %53 = arith.mulf %52, %5 : vector<32x32xf32>
    %cst_22 = arith.constant dense<0.000000e+00> : vector<32xf32>
    %54 = vector.multi_reduction <add>, %52, %cst_22 [1] : vector<32x32xf32> to vector<32xf32>
    %55 = vector.shape_cast %54 : vector<32xf32> to vector<32x1xf32>
    %56 = tpu.reciprocal %55 {approx = true} : vector<32x1xf32> -> vector<32x1xf32>
    %57 = vector.broadcast %56 : vector<32x1xf32> to vector<32x32xf32>
    %58 = arith.mulf %53, %57 : vector<32x32xf32>
    %cst_23 = arith.constant dense<0.000000e+00> : vector<32x32xf32>
    %59 = tpu.matmul %58, %10, %cst_23 {dimension_numbers = #tpu.dot_dimension_numbers<[1], [0], [0], [1], [0, 0, 1, 1], [], []>} : vector<32x32xf32>, vector<32x32xf32>, vector<32x32xf32> -> vector<32x32xf32>
    %cst_24 = arith.constant dense<0.000000e+00> : vector<32xf32>
    %60 = vector.multi_reduction <add>, %58, %cst_24 [1] : vector<32x32xf32> to vector<32xf32>
    %61 = vector.shape_cast %60 : vector<32xf32> to vector<32x1xf32>
    %62 = vector.broadcast %61 : vector<32x1xf32> to vector<32x32xf32>
    %63 = arith.subf %62, %59 : vector<32x32xf32>
    %64 = arith.mulf %63, %14 : vector<32x32xf32>
    %cst_25 = arith.constant 0.000000e+00 : f32
    %65 = vector.broadcast %cst_25 : f32 to vector<32x32xf32>
    %66 = arith.maximumf %64, %65 : vector<32x32xf32>
    %67 = math.sqrt %66 : vector<32x32xf32>
    %68 = vector.broadcast %28 : vector<32x1xf32> to vector<32x32xf32>
    %69 = arith.mulf %67, %68 : vector<32x32xf32>
    %70 = math.exp %69 : vector<32x32xf32>
    %cst_26 = arith.constant 9.99999974E-6 : f32
    %cst_27 = arith.constant 1.000000e+05 : f32
    %71 = vector.broadcast %cst_26 : f32 to vector<32x32xf32>
    %72 = arith.maximumf %71, %70 : vector<32x32xf32>
    %73 = vector.broadcast %cst_27 : f32 to vector<32x32xf32>
    %74 = arith.minimumf %73, %72 : vector<32x32xf32>
    %75 = arith.mulf %45, %74 : vector<32x32xf32>
    %cst_28 = arith.constant -1.000000e+32 : f32
    %76 = vector.broadcast %cst_28 : f32 to vector<32x32xf32>
    %77 = arith.select %2, %75, %76 : vector<32x32xi1>, vector<32x32xf32>
    %cst_29 = arith.constant dense<0xFF800000> : vector<32xf32>
    %78 = vector.multi_reduction <maximumf>, %77, %cst_29 [1] : vector<32x32xf32> to vector<32xf32>
    %79 = vector.shape_cast %78 : vector<32xf32> to vector<32x1xf32>
    %80 = vector.broadcast %79 : vector<32x1xf32> to vector<32x32xf32>
    %81 = arith.subf %77, %80 : vector<32x32xf32>
    %82 = math.exp %81 : vector<32x32xf32>
    %cst_30 = arith.constant dense<0.000000e+00> : vector<32xf32>
    %83 = vector.multi_reduction <add>, %82, %cst_30 [1] : vector<32x32xf32> to vector<32xf32>
    %84 = vector.shape_cast %83 : vector<32xf32> to vector<32x1xf32>
    %85 = tpu.reciprocal %84 {approx = true} : vector<32x1xf32> -> vector<32x1xf32>
    %86 = vector.broadcast %85 : vector<32x1xf32> to vector<32x32xf32>
    %87 = arith.mulf %82, %86 : vector<32x32xf32>
    %cst_31 = arith.constant dense<0.000000e+00> : vector<32x16xf32>
    %88 = tpu.matmul %87, %42, %cst_31 {dimension_numbers = #tpu.dot_dimension_numbers<[1], [0], [0], [1], [0, 0, 1, 1], [], []>} : vector<32x32xf32>, vector<32x16xf32>, vector<32x16xf32> -> vector<32x16xf32>
    %c0_32 = arith.constant 0 : index
    %c32 = arith.constant 32 : index
    %c0_33 = arith.constant 0 : index
    %89 = vector.load %arg5[%c0_32, %c32, %c0_33] : memref<3x104x128xf32, #tpu.memory_space<vmem>>, vector<1x16x32xf32>
    %90 = vector.shape_cast %89 : vector<1x16x32xf32> to vector<16x32xf32>
    %cst_34 = arith.constant dense<0.000000e+00> : vector<32x32xf32>
    %91 = tpu.matmul %88, %90, %cst_34 {dimension_numbers = #tpu.dot_dimension_numbers<[1], [0], [0], [1], [0, 0, 1, 1], [], []>} : vector<32x16xf32>, vector<16x32xf32>, vector<32x32xf32> -> vector<32x32xf32>
    %92 = arith.addf %40, %91 : vector<32x32xf32>
    %93 = vector.extract_strided_slice %38 {offsets = [0, 16], sizes = [32, 16], strides = [1, 1]} : vector<32x32xf32> to vector<32x16xf32>
    %94 = vector.extract_strided_slice %39 {offsets = [0, 16], sizes = [32, 16], strides = [1, 1]} : vector<32x32xf32> to vector<32x16xf32>
    %cst_35 = arith.constant dense<0.000000e+00> : vector<32x32xf32>
    %95 = tpu.matmul %93, %93, %cst_35 {dimension_numbers = #tpu.dot_dimension_numbers<[1], [1], [0], [0], [0, 0, 1, 0], [], []>} : vector<32x16xf32>, vector<32x16xf32>, vector<32x32xf32> -> vector<32x32xf32>
    %cst_36 = arith.constant 2.500000e-01 : f32
    %96 = vector.broadcast %cst_36 : f32 to vector<32x32xf32>
    %97 = arith.mulf %95, %96 : vector<32x32xf32>
    %cst_37 = arith.constant -1.000000e+32 : f32
    %98 = vector.broadcast %cst_37 : f32 to vector<32x32xf32>
    %99 = arith.select %2, %97, %98 : vector<32x32xi1>, vector<32x32xf32>
    %cst_38 = arith.constant dense<0xFF800000> : vector<32xf32>
    %100 = vector.multi_reduction <maximumf>, %99, %cst_38 [1] : vector<32x32xf32> to vector<32xf32>
    %101 = vector.shape_cast %100 : vector<32xf32> to vector<32x1xf32>
    %102 = vector.broadcast %101 : vector<32x1xf32> to vector<32x32xf32>
    %103 = arith.subf %99, %102 : vector<32x32xf32>
    %104 = math.exp %103 : vector<32x32xf32>
    %105 = arith.mulf %104, %5 : vector<32x32xf32>
    %cst_39 = arith.constant dense<0.000000e+00> : vector<32xf32>
    %106 = vector.multi_reduction <add>, %104, %cst_39 [1] : vector<32x32xf32> to vector<32xf32>
    %107 = vector.shape_cast %106 : vector<32xf32> to vector<32x1xf32>
    %108 = tpu.reciprocal %107 {approx = true} : vector<32x1xf32> -> vector<32x1xf32>
    %109 = vector.broadcast %108 : vector<32x1xf32> to vector<32x32xf32>
    %110 = arith.mulf %105, %109 : vector<32x32xf32>
    %cst_40 = arith.constant dense<0.000000e+00> : vector<32x32xf32>
    %111 = tpu.matmul %110, %10, %cst_40 {dimension_numbers = #tpu.dot_dimension_numbers<[1], [0], [0], [1], [0, 0, 1, 1], [], []>} : vector<32x32xf32>, vector<32x32xf32>, vector<32x32xf32> -> vector<32x32xf32>
    %cst_41 = arith.constant dense<0.000000e+00> : vector<32xf32>
    %112 = vector.multi_reduction <add>, %110, %cst_41 [1] : vector<32x32xf32> to vector<32xf32>
    %113 = vector.shape_cast %112 : vector<32xf32> to vector<32x1xf32>
    %114 = vector.broadcast %113 : vector<32x1xf32> to vector<32x32xf32>
    %115 = arith.subf %114, %111 : vector<32x32xf32>
    %116 = arith.mulf %115, %14 : vector<32x32xf32>
    %cst_42 = arith.constant 0.000000e+00 : f32
    %117 = vector.broadcast %cst_42 : f32 to vector<32x32xf32>
    %118 = arith.maximumf %116, %117 : vector<32x32xf32>
    %119 = math.sqrt %118 : vector<32x32xf32>
    %120 = vector.broadcast %28 : vector<32x1xf32> to vector<32x32xf32>
    %121 = arith.mulf %119, %120 : vector<32x32xf32>
    %122 = math.exp %121 : vector<32x32xf32>
    %cst_43 = arith.constant 9.99999974E-6 : f32
    %cst_44 = arith.constant 1.000000e+05 : f32
    %123 = vector.broadcast %cst_43 : f32 to vector<32x32xf32>
    %124 = arith.maximumf %123, %122 : vector<32x32xf32>
    %125 = vector.broadcast %cst_44 : f32 to vector<32x32xf32>
    %126 = arith.minimumf %125, %124 : vector<32x32xf32>
    %127 = arith.mulf %97, %126 : vector<32x32xf32>
    %cst_45 = arith.constant -1.000000e+32 : f32
    %128 = vector.broadcast %cst_45 : f32 to vector<32x32xf32>
    %129 = arith.select %2, %127, %128 : vector<32x32xi1>, vector<32x32xf32>
    %cst_46 = arith.constant dense<0xFF800000> : vector<32xf32>
    %130 = vector.multi_reduction <maximumf>, %129, %cst_46 [1] : vector<32x32xf32> to vector<32xf32>
    %131 = vector.shape_cast %130 : vector<32xf32> to vector<32x1xf32>
    %132 = vector.broadcast %131 : vector<32x1xf32> to vector<32x32xf32>
    %133 = arith.subf %129, %132 : vector<32x32xf32>
    %134 = math.exp %133 : vector<32x32xf32>
    %cst_47 = arith.constant dense<0.000000e+00> : vector<32xf32>
    %135 = vector.multi_reduction <add>, %134, %cst_47 [1] : vector<32x32xf32> to vector<32xf32>
    %136 = vector.shape_cast %135 : vector<32xf32> to vector<32x1xf32>
    %137 = tpu.reciprocal %136 {approx = true} : vector<32x1xf32> -> vector<32x1xf32>
    %138 = vector.broadcast %137 : vector<32x1xf32> to vector<32x32xf32>
    %139 = arith.mulf %134, %138 : vector<32x32xf32>
    %cst_48 = arith.constant dense<0.000000e+00> : vector<32x16xf32>
    %140 = tpu.matmul %139, %94, %cst_48 {dimension_numbers = #tpu.dot_dimension_numbers<[1], [0], [0], [1], [0, 0, 1, 1], [], []>} : vector<32x32xf32>, vector<32x16xf32>, vector<32x16xf32> -> vector<32x16xf32>
    %c0_49 = arith.constant 0 : index
    %c48 = arith.constant 48 : index
    %c0_50 = arith.constant 0 : index
    %141 = vector.load %arg5[%c0_49, %c48, %c0_50] : memref<3x104x128xf32, #tpu.memory_space<vmem>>, vector<1x16x32xf32>
    %142 = vector.shape_cast %141 : vector<1x16x32xf32> to vector<16x32xf32>
    %cst_51 = arith.constant dense<0.000000e+00> : vector<32x32xf32>
    %143 = tpu.matmul %140, %142, %cst_51 {dimension_numbers = #tpu.dot_dimension_numbers<[1], [0], [0], [1], [0, 0, 1, 1], [], []>} : vector<32x16xf32>, vector<16x32xf32>, vector<32x32xf32> -> vector<32x32xf32>
    %144 = arith.addf %92, %143 : vector<32x32xf32>
    %c0_52 = arith.constant 0 : index
    %c97 = arith.constant 97 : index
    %c0_53 = arith.constant 0 : index
    %145 = vector.load %arg5[%c0_52, %c97, %c0_53] : memref<3x104x128xf32, #tpu.memory_space<vmem>>, vector<1x1x32xf32>
    %146 = vector.shape_cast %145 : vector<1x1x32xf32> to vector<1x32xf32>
    %147 = vector.broadcast %146 : vector<1x32xf32> to vector<32x32xf32>
    %148 = arith.addf %144, %147 : vector<32x32xf32>
    %149 = arith.addf %30, %148 : vector<32x32xf32>
    %c0_54 = arith.constant 0 : index
    %c97_55 = arith.constant 97 : index
    %c32_56 = arith.constant 32 : index
    %150 = vector.load %arg5[%c0_54, %c97_55, %c32_56] : memref<3x104x128xf32, #tpu.memory_space<vmem>>, vector<1x1x32xf32>
    %151 = vector.shape_cast %150 : vector<1x1x32xf32> to vector<1x32xf32>
    %c0_57 = arith.constant 0 : index
    %c97_58 = arith.constant 97 : index
    %c64 = arith.constant 64 : index
    %152 = vector.load %arg5[%c0_57, %c97_58, %c64] : memref<3x104x128xf32, #tpu.memory_space<vmem>>, vector<1x1x32xf32>
    %153 = vector.shape_cast %152 : vector<1x1x32xf32> to vector<1x32xf32>
    %cst_59 = arith.constant dense<0.000000e+00> : vector<32xf32>
    %154 = vector.multi_reduction <add>, %149, %cst_59 [1] : vector<32x32xf32> to vector<32xf32>
    %155 = vector.shape_cast %154 : vector<32xf32> to vector<32x1xf32>
    %cst_60 = arith.constant 3.200000e+01 : f32
    %156 = vector.broadcast %cst_60 : f32 to vector<32x1xf32>
    %157 = arith.divf %155, %156 : vector<32x1xf32>
    %158 = vector.broadcast %157 : vector<32x1xf32> to vector<32x32xf32>
    %159 = arith.subf %149, %158 : vector<32x32xf32>
    %160 = arith.mulf %159, %159 : vector<32x32xf32>
    %cst_61 = arith.constant dense<0.000000e+00> : vector<32xf32>
    %161 = vector.multi_reduction <add>, %160, %cst_61 [1] : vector<32x32xf32> to vector<32xf32>
    %162 = vector.shape_cast %161 : vector<32xf32> to vector<32x1xf32>
    %cst_62 = arith.constant 3.200000e+01 : f32
    %163 = vector.broadcast %cst_62 : f32 to vector<32x1xf32>
    %164 = arith.divf %162, %163 : vector<32x1xf32>
    %cst_63 = arith.constant 9.99999974E-6 : f32
    %165 = vector.broadcast %cst_63 : f32 to vector<32x1xf32>
    %166 = arith.addf %164, %165 : vector<32x1xf32>
    %167 = math.rsqrt %166 : vector<32x1xf32>
    %168 = vector.broadcast %167 : vector<32x1xf32> to vector<32x32xf32>
    %169 = arith.mulf %159, %168 : vector<32x32xf32>
    %170 = vector.broadcast %151 : vector<1x32xf32> to vector<32x32xf32>
    %171 = arith.mulf %169, %170 : vector<32x32xf32>
    %172 = vector.broadcast %153 : vector<1x32xf32> to vector<32x32xf32>
    %173 = arith.addf %171, %172 : vector<32x32xf32>
    %c0_64 = arith.constant 0 : index
    %c0_65 = arith.constant 0 : index
    %c64_66 = arith.constant 64 : index
    %174 = vector.load %arg5[%c0_64, %c0_65, %c64_66] : memref<3x104x128xf32, #tpu.memory_space<vmem>>, vector<1x32x64xf32>
    %175 = vector.shape_cast %174 : vector<1x32x64xf32> to vector<32x64xf32>
    %cst_67 = arith.constant dense<0.000000e+00> : vector<32x64xf32>
    %176 = tpu.matmul %173, %175, %cst_67 {dimension_numbers = #tpu.dot_dimension_numbers<[1], [0], [0], [1], [0, 0, 1, 1], [], []>} : vector<32x32xf32>, vector<32x64xf32>, vector<32x64xf32> -> vector<32x64xf32>
    %c0_68 = arith.constant 0 : index
    %c96_69 = arith.constant 96 : index
    %c64_70 = arith.constant 64 : index
    %177 = vector.load %arg5[%c0_68, %c96_69, %c64_70] : memref<3x104x128xf32, #tpu.memory_space<vmem>>, vector<1x1x64xf32>
    %178 = vector.shape_cast %177 : vector<1x1x64xf32> to vector<1x64xf32>
    %179 = vector.broadcast %178 : vector<1x64xf32> to vector<32x64xf32>
    %180 = arith.addf %176, %179 : vector<32x64xf32>
    %cst_71 = arith.constant 0.000000e+00 : f32
    %181 = vector.broadcast %cst_71 : f32 to vector<32x64xf32>
    %182 = arith.maximumf %180, %181 : vector<32x64xf32>
    %c0_72 = arith.constant 0 : index
    %c32_73 = arith.constant 32 : index
    %c32_74 = arith.constant 32 : index
    %183 = vector.load %arg5[%c0_72, %c32_73, %c32_74] : memref<3x104x128xf32, #tpu.memory_space<vmem>>, vector<1x64x32xf32>
    %184 = vector.shape_cast %183 : vector<1x64x32xf32> to vector<64x32xf32>
    %cst_75 = arith.constant dense<0.000000e+00> : vector<32x32xf32>
    %185 = tpu.matmul %182, %184, %cst_75 {dimension_numbers = #tpu.dot_dimension_numbers<[1], [0], [0], [1], [0, 0, 1, 1], [], []>} : vector<32x64xf32>, vector<64x32xf32>, vector<32x32xf32> -> vector<32x32xf32>
    %c0_76 = arith.constant 0 : index
    %c97_77 = arith.constant 97 : index
    %c96_78 = arith.constant 96 : index
    %186 = vector.load %arg5[%c0_76, %c97_77, %c96_78] : memref<3x104x128xf32, #tpu.memory_space<vmem>>, vector<1x1x32xf32>
    %187 = vector.shape_cast %186 : vector<1x1x32xf32> to vector<1x32xf32>
    %188 = vector.broadcast %187 : vector<1x32xf32> to vector<32x32xf32>
    %189 = arith.addf %185, %188 : vector<32x32xf32>
    %190 = arith.addf %173, %189 : vector<32x32xf32>
    %c0_79 = arith.constant 0 : index
    %c98 = arith.constant 98 : index
    %c0_80 = arith.constant 0 : index
    %191 = vector.load %arg5[%c0_79, %c98, %c0_80] : memref<3x104x128xf32, #tpu.memory_space<vmem>>, vector<1x1x32xf32>
    %192 = vector.shape_cast %191 : vector<1x1x32xf32> to vector<1x32xf32>
    %c0_81 = arith.constant 0 : index
    %c98_82 = arith.constant 98 : index
    %c32_83 = arith.constant 32 : index
    %193 = vector.load %arg5[%c0_81, %c98_82, %c32_83] : memref<3x104x128xf32, #tpu.memory_space<vmem>>, vector<1x1x32xf32>
    %194 = vector.shape_cast %193 : vector<1x1x32xf32> to vector<1x32xf32>
    %cst_84 = arith.constant dense<0.000000e+00> : vector<32xf32>
    %195 = vector.multi_reduction <add>, %190, %cst_84 [1] : vector<32x32xf32> to vector<32xf32>
    %196 = vector.shape_cast %195 : vector<32xf32> to vector<32x1xf32>
    %cst_85 = arith.constant 3.200000e+01 : f32
    %197 = vector.broadcast %cst_85 : f32 to vector<32x1xf32>
    %198 = arith.divf %196, %197 : vector<32x1xf32>
    %199 = vector.broadcast %198 : vector<32x1xf32> to vector<32x32xf32>
    %200 = arith.subf %190, %199 : vector<32x32xf32>
    %201 = arith.mulf %200, %200 : vector<32x32xf32>
    %cst_86 = arith.constant dense<0.000000e+00> : vector<32xf32>
    %202 = vector.multi_reduction <add>, %201, %cst_86 [1] : vector<32x32xf32> to vector<32xf32>
    %203 = vector.shape_cast %202 : vector<32xf32> to vector<32x1xf32>
    %cst_87 = arith.constant 3.200000e+01 : f32
    %204 = vector.broadcast %cst_87 : f32 to vector<32x1xf32>
    %205 = arith.divf %203, %204 : vector<32x1xf32>
    %cst_88 = arith.constant 9.99999974E-6 : f32
    %206 = vector.broadcast %cst_88 : f32 to vector<32x1xf32>
    %207 = arith.addf %205, %206 : vector<32x1xf32>
    %208 = math.rsqrt %207 : vector<32x1xf32>
    %209 = vector.broadcast %208 : vector<32x1xf32> to vector<32x32xf32>
    %210 = arith.mulf %200, %209 : vector<32x32xf32>
    %211 = vector.broadcast %192 : vector<1x32xf32> to vector<32x32xf32>
    %212 = arith.mulf %210, %211 : vector<32x32xf32>
    %213 = vector.broadcast %194 : vector<1x32xf32> to vector<32x32xf32>
    %214 = arith.addf %212, %213 : vector<32x32xf32>
    %c0_89 = arith.constant 0 : index
    %c0_90 = arith.constant 0 : index
    %c0_91 = arith.constant 0 : index
    %215 = vector.load %arg1[%c0_89, %c0_90, %c0_91] : memref<1x32x32xf32, #tpu.memory_space<vmem>>, vector<1x32x32xf32>
    %216 = vector.shape_cast %215 : vector<1x32x32xf32> to vector<32x32xf32>
    %c1 = arith.constant 1 : index
    %c0_92 = arith.constant 0 : index
    %c0_93 = arith.constant 0 : index
    %217 = vector.load %arg5[%c1, %c0_92, %c0_93] : memref<3x104x128xf32, #tpu.memory_space<vmem>>, vector<1x32x64xf32>
    %218 = vector.shape_cast %217 : vector<1x32x64xf32> to vector<32x64xf32>
    %cst_94 = arith.constant dense<0.000000e+00> : vector<32x64xf32>
    %219 = tpu.matmul %216, %218, %cst_94 {dimension_numbers = #tpu.dot_dimension_numbers<[1], [0], [0], [1], [0, 0, 1, 1], [], []>} : vector<32x32xf32>, vector<32x64xf32>, vector<32x64xf32> -> vector<32x64xf32>
    %c1_95 = arith.constant 1 : index
    %c96_96 = arith.constant 96 : index
    %c0_97 = arith.constant 0 : index
    %220 = vector.load %arg5[%c1_95, %c96_96, %c0_97] : memref<3x104x128xf32, #tpu.memory_space<vmem>>, vector<1x1x64xf32>
    %221 = vector.shape_cast %220 : vector<1x1x64xf32> to vector<1x64xf32>
    %222 = vector.broadcast %221 : vector<1x64xf32> to vector<32x64xf32>
    %223 = arith.addf %219, %222 : vector<32x64xf32>
    %224 = vector.extract_strided_slice %223 {offsets = [0, 0], sizes = [32, 32], strides = [1, 1]} : vector<32x64xf32> to vector<32x32xf32>
    %225 = vector.extract_strided_slice %223 {offsets = [0, 32], sizes = [32, 32], strides = [1, 1]} : vector<32x64xf32> to vector<32x32xf32>
    %cst_98 = arith.constant 0.000000e+00 : f32
    %226 = vector.broadcast %cst_98 : f32 to vector<32x32xf32>
    %227 = vector.extract_strided_slice %224 {offsets = [0, 0], sizes = [32, 16], strides = [1, 1]} : vector<32x32xf32> to vector<32x16xf32>
    %228 = vector.extract_strided_slice %225 {offsets = [0, 0], sizes = [32, 16], strides = [1, 1]} : vector<32x32xf32> to vector<32x16xf32>
    %cst_99 = arith.constant dense<0.000000e+00> : vector<32x32xf32>
    %229 = tpu.matmul %227, %227, %cst_99 {dimension_numbers = #tpu.dot_dimension_numbers<[1], [1], [0], [0], [0, 0, 1, 0], [], []>} : vector<32x16xf32>, vector<32x16xf32>, vector<32x32xf32> -> vector<32x32xf32>
    %cst_100 = arith.constant 2.500000e-01 : f32
    %230 = vector.broadcast %cst_100 : f32 to vector<32x32xf32>
    %231 = arith.mulf %229, %230 : vector<32x32xf32>
    %cst_101 = arith.constant -1.000000e+32 : f32
    %232 = vector.broadcast %cst_101 : f32 to vector<32x32xf32>
    %233 = arith.select %2, %231, %232 : vector<32x32xi1>, vector<32x32xf32>
    %cst_102 = arith.constant dense<0xFF800000> : vector<32xf32>
    %234 = vector.multi_reduction <maximumf>, %233, %cst_102 [1] : vector<32x32xf32> to vector<32xf32>
    %235 = vector.shape_cast %234 : vector<32xf32> to vector<32x1xf32>
    %236 = vector.broadcast %235 : vector<32x1xf32> to vector<32x32xf32>
    %237 = arith.subf %233, %236 : vector<32x32xf32>
    %238 = math.exp %237 : vector<32x32xf32>
    %239 = arith.mulf %238, %5 : vector<32x32xf32>
    %cst_103 = arith.constant dense<0.000000e+00> : vector<32xf32>
    %240 = vector.multi_reduction <add>, %238, %cst_103 [1] : vector<32x32xf32> to vector<32xf32>
    %241 = vector.shape_cast %240 : vector<32xf32> to vector<32x1xf32>
    %242 = tpu.reciprocal %241 {approx = true} : vector<32x1xf32> -> vector<32x1xf32>
    %243 = vector.broadcast %242 : vector<32x1xf32> to vector<32x32xf32>
    %244 = arith.mulf %239, %243 : vector<32x32xf32>
    %cst_104 = arith.constant dense<0.000000e+00> : vector<32x32xf32>
    %245 = tpu.matmul %244, %10, %cst_104 {dimension_numbers = #tpu.dot_dimension_numbers<[1], [0], [0], [1], [0, 0, 1, 1], [], []>} : vector<32x32xf32>, vector<32x32xf32>, vector<32x32xf32> -> vector<32x32xf32>
    %cst_105 = arith.constant dense<0.000000e+00> : vector<32xf32>
    %246 = vector.multi_reduction <add>, %244, %cst_105 [1] : vector<32x32xf32> to vector<32xf32>
    %247 = vector.shape_cast %246 : vector<32xf32> to vector<32x1xf32>
    %248 = vector.broadcast %247 : vector<32x1xf32> to vector<32x32xf32>
    %249 = arith.subf %248, %245 : vector<32x32xf32>
    %250 = arith.mulf %249, %14 : vector<32x32xf32>
    %cst_106 = arith.constant 0.000000e+00 : f32
    %251 = vector.broadcast %cst_106 : f32 to vector<32x32xf32>
    %252 = arith.maximumf %250, %251 : vector<32x32xf32>
    %253 = math.sqrt %252 : vector<32x32xf32>
    %254 = vector.broadcast %28 : vector<32x1xf32> to vector<32x32xf32>
    %255 = arith.mulf %253, %254 : vector<32x32xf32>
    %256 = math.exp %255 : vector<32x32xf32>
    %cst_107 = arith.constant 9.99999974E-6 : f32
    %cst_108 = arith.constant 1.000000e+05 : f32
    %257 = vector.broadcast %cst_107 : f32 to vector<32x32xf32>
    %258 = arith.maximumf %257, %256 : vector<32x32xf32>
    %259 = vector.broadcast %cst_108 : f32 to vector<32x32xf32>
    %260 = arith.minimumf %259, %258 : vector<32x32xf32>
    %261 = arith.mulf %231, %260 : vector<32x32xf32>
    %cst_109 = arith.constant -1.000000e+32 : f32
    %262 = vector.broadcast %cst_109 : f32 to vector<32x32xf32>
    %263 = arith.select %2, %261, %262 : vector<32x32xi1>, vector<32x32xf32>
    %cst_110 = arith.constant dense<0xFF800000> : vector<32xf32>
    %264 = vector.multi_reduction <maximumf>, %263, %cst_110 [1] : vector<32x32xf32> to vector<32xf32>
    %265 = vector.shape_cast %264 : vector<32xf32> to vector<32x1xf32>
    %266 = vector.broadcast %265 : vector<32x1xf32> to vector<32x32xf32>
    %267 = arith.subf %263, %266 : vector<32x32xf32>
    %268 = math.exp %267 : vector<32x32xf32>
    %cst_111 = arith.constant dense<0.000000e+00> : vector<32xf32>
    %269 = vector.multi_reduction <add>, %268, %cst_111 [1] : vector<32x32xf32> to vector<32xf32>
    %270 = vector.shape_cast %269 : vector<32xf32> to vector<32x1xf32>
    %271 = tpu.reciprocal %270 {approx = true} : vector<32x1xf32> -> vector<32x1xf32>
    %272 = vector.broadcast %271 : vector<32x1xf32> to vector<32x32xf32>
    %273 = arith.mulf %268, %272 : vector<32x32xf32>
    %cst_112 = arith.constant dense<0.000000e+00> : vector<32x16xf32>
    %274 = tpu.matmul %273, %228, %cst_112 {dimension_numbers = #tpu.dot_dimension_numbers<[1], [0], [0], [1], [0, 0, 1, 1], [], []>} : vector<32x32xf32>, vector<32x16xf32>, vector<32x16xf32> -> vector<32x16xf32>
    %c1_113 = arith.constant 1 : index
    %c32_114 = arith.constant 32 : index
    %c0_115 = arith.constant 0 : index
    %275 = vector.load %arg5[%c1_113, %c32_114, %c0_115] : memref<3x104x128xf32, #tpu.memory_space<vmem>>, vector<1x16x32xf32>
    %276 = vector.shape_cast %275 : vector<1x16x32xf32> to vector<16x32xf32>
    %cst_116 = arith.constant dense<0.000000e+00> : vector<32x32xf32>
    %277 = tpu.matmul %274, %276, %cst_116 {dimension_numbers = #tpu.dot_dimension_numbers<[1], [0], [0], [1], [0, 0, 1, 1], [], []>} : vector<32x16xf32>, vector<16x32xf32>, vector<32x32xf32> -> vector<32x32xf32>
    %278 = arith.addf %226, %277 : vector<32x32xf32>
    %279 = vector.extract_strided_slice %224 {offsets = [0, 16], sizes = [32, 16], strides = [1, 1]} : vector<32x32xf32> to vector<32x16xf32>
    %280 = vector.extract_strided_slice %225 {offsets = [0, 16], sizes = [32, 16], strides = [1, 1]} : vector<32x32xf32> to vector<32x16xf32>
    %cst_117 = arith.constant dense<0.000000e+00> : vector<32x32xf32>
    %281 = tpu.matmul %279, %279, %cst_117 {dimension_numbers = #tpu.dot_dimension_numbers<[1], [1], [0], [0], [0, 0, 1, 0], [], []>} : vector<32x16xf32>, vector<32x16xf32>, vector<32x32xf32> -> vector<32x32xf32>
    %cst_118 = arith.constant 2.500000e-01 : f32
    %282 = vector.broadcast %cst_118 : f32 to vector<32x32xf32>
    %283 = arith.mulf %281, %282 : vector<32x32xf32>
    %cst_119 = arith.constant -1.000000e+32 : f32
    %284 = vector.broadcast %cst_119 : f32 to vector<32x32xf32>
    %285 = arith.select %2, %283, %284 : vector<32x32xi1>, vector<32x32xf32>
    %cst_120 = arith.constant dense<0xFF800000> : vector<32xf32>
    %286 = vector.multi_reduction <maximumf>, %285, %cst_120 [1] : vector<32x32xf32> to vector<32xf32>
    %287 = vector.shape_cast %286 : vector<32xf32> to vector<32x1xf32>
    %288 = vector.broadcast %287 : vector<32x1xf32> to vector<32x32xf32>
    %289 = arith.subf %285, %288 : vector<32x32xf32>
    %290 = math.exp %289 : vector<32x32xf32>
    %291 = arith.mulf %290, %5 : vector<32x32xf32>
    %cst_121 = arith.constant dense<0.000000e+00> : vector<32xf32>
    %292 = vector.multi_reduction <add>, %290, %cst_121 [1] : vector<32x32xf32> to vector<32xf32>
    %293 = vector.shape_cast %292 : vector<32xf32> to vector<32x1xf32>
    %294 = tpu.reciprocal %293 {approx = true} : vector<32x1xf32> -> vector<32x1xf32>
    %295 = vector.broadcast %294 : vector<32x1xf32> to vector<32x32xf32>
    %296 = arith.mulf %291, %295 : vector<32x32xf32>
    %cst_122 = arith.constant dense<0.000000e+00> : vector<32x32xf32>
    %297 = tpu.matmul %296, %10, %cst_122 {dimension_numbers = #tpu.dot_dimension_numbers<[1], [0], [0], [1], [0, 0, 1, 1], [], []>} : vector<32x32xf32>, vector<32x32xf32>, vector<32x32xf32> -> vector<32x32xf32>
    %cst_123 = arith.constant dense<0.000000e+00> : vector<32xf32>
    %298 = vector.multi_reduction <add>, %296, %cst_123 [1] : vector<32x32xf32> to vector<32xf32>
    %299 = vector.shape_cast %298 : vector<32xf32> to vector<32x1xf32>
    %300 = vector.broadcast %299 : vector<32x1xf32> to vector<32x32xf32>
    %301 = arith.subf %300, %297 : vector<32x32xf32>
    %302 = arith.mulf %301, %14 : vector<32x32xf32>
    %cst_124 = arith.constant 0.000000e+00 : f32
    %303 = vector.broadcast %cst_124 : f32 to vector<32x32xf32>
    %304 = arith.maximumf %302, %303 : vector<32x32xf32>
    %305 = math.sqrt %304 : vector<32x32xf32>
    %306 = vector.broadcast %28 : vector<32x1xf32> to vector<32x32xf32>
    %307 = arith.mulf %305, %306 : vector<32x32xf32>
    %308 = math.exp %307 : vector<32x32xf32>
    %cst_125 = arith.constant 9.99999974E-6 : f32
    %cst_126 = arith.constant 1.000000e+05 : f32
    %309 = vector.broadcast %cst_125 : f32 to vector<32x32xf32>
    %310 = arith.maximumf %309, %308 : vector<32x32xf32>
    %311 = vector.broadcast %cst_126 : f32 to vector<32x32xf32>
    %312 = arith.minimumf %311, %310 : vector<32x32xf32>
    %313 = arith.mulf %283, %312 : vector<32x32xf32>
    %cst_127 = arith.constant -1.000000e+32 : f32
    %314 = vector.broadcast %cst_127 : f32 to vector<32x32xf32>
    %315 = arith.select %2, %313, %314 : vector<32x32xi1>, vector<32x32xf32>
    %cst_128 = arith.constant dense<0xFF800000> : vector<32xf32>
    %316 = vector.multi_reduction <maximumf>, %315, %cst_128 [1] : vector<32x32xf32> to vector<32xf32>
    %317 = vector.shape_cast %316 : vector<32xf32> to vector<32x1xf32>
    %318 = vector.broadcast %317 : vector<32x1xf32> to vector<32x32xf32>
    %319 = arith.subf %315, %318 : vector<32x32xf32>
    %320 = math.exp %319 : vector<32x32xf32>
    %cst_129 = arith.constant dense<0.000000e+00> : vector<32xf32>
    %321 = vector.multi_reduction <add>, %320, %cst_129 [1] : vector<32x32xf32> to vector<32xf32>
    %322 = vector.shape_cast %321 : vector<32xf32> to vector<32x1xf32>
    %323 = tpu.reciprocal %322 {approx = true} : vector<32x1xf32> -> vector<32x1xf32>
    %324 = vector.broadcast %323 : vector<32x1xf32> to vector<32x32xf32>
    %325 = arith.mulf %320, %324 : vector<32x32xf32>
    %cst_130 = arith.constant dense<0.000000e+00> : vector<32x16xf32>
    %326 = tpu.matmul %325, %280, %cst_130 {dimension_numbers = #tpu.dot_dimension_numbers<[1], [0], [0], [1], [0, 0, 1, 1], [], []>} : vector<32x32xf32>, vector<32x16xf32>, vector<32x16xf32> -> vector<32x16xf32>
    %c1_131 = arith.constant 1 : index
    %c48_132 = arith.constant 48 : index
    %c0_133 = arith.constant 0 : index
    %327 = vector.load %arg5[%c1_131, %c48_132, %c0_133] : memref<3x104x128xf32, #tpu.memory_space<vmem>>, vector<1x16x32xf32>
    %328 = vector.shape_cast %327 : vector<1x16x32xf32> to vector<16x32xf32>
    %cst_134 = arith.constant dense<0.000000e+00> : vector<32x32xf32>
    %329 = tpu.matmul %326, %328, %cst_134 {dimension_numbers = #tpu.dot_dimension_numbers<[1], [0], [0], [1], [0, 0, 1, 1], [], []>} : vector<32x16xf32>, vector<16x32xf32>, vector<32x32xf32> -> vector<32x32xf32>
    %330 = arith.addf %278, %329 : vector<32x32xf32>
    %c1_135 = arith.constant 1 : index
    %c97_136 = arith.constant 97 : index
    %c0_137 = arith.constant 0 : index
    %331 = vector.load %arg5[%c1_135, %c97_136, %c0_137] : memref<3x104x128xf32, #tpu.memory_space<vmem>>, vector<1x1x32xf32>
    %332 = vector.shape_cast %331 : vector<1x1x32xf32> to vector<1x32xf32>
    %333 = vector.broadcast %332 : vector<1x32xf32> to vector<32x32xf32>
    %334 = arith.addf %330, %333 : vector<32x32xf32>
    %335 = arith.addf %216, %334 : vector<32x32xf32>
    %c1_138 = arith.constant 1 : index
    %c97_139 = arith.constant 97 : index
    %c32_140 = arith.constant 32 : index
    %336 = vector.load %arg5[%c1_138, %c97_139, %c32_140] : memref<3x104x128xf32, #tpu.memory_space<vmem>>, vector<1x1x32xf32>
    %337 = vector.shape_cast %336 : vector<1x1x32xf32> to vector<1x32xf32>
    %c1_141 = arith.constant 1 : index
    %c97_142 = arith.constant 97 : index
    %c64_143 = arith.constant 64 : index
    %338 = vector.load %arg5[%c1_141, %c97_142, %c64_143] : memref<3x104x128xf32, #tpu.memory_space<vmem>>, vector<1x1x32xf32>
    %339 = vector.shape_cast %338 : vector<1x1x32xf32> to vector<1x32xf32>
    %cst_144 = arith.constant dense<0.000000e+00> : vector<32xf32>
    %340 = vector.multi_reduction <add>, %335, %cst_144 [1] : vector<32x32xf32> to vector<32xf32>
    %341 = vector.shape_cast %340 : vector<32xf32> to vector<32x1xf32>
    %cst_145 = arith.constant 3.200000e+01 : f32
    %342 = vector.broadcast %cst_145 : f32 to vector<32x1xf32>
    %343 = arith.divf %341, %342 : vector<32x1xf32>
    %344 = vector.broadcast %343 : vector<32x1xf32> to vector<32x32xf32>
    %345 = arith.subf %335, %344 : vector<32x32xf32>
    %346 = arith.mulf %345, %345 : vector<32x32xf32>
    %cst_146 = arith.constant dense<0.000000e+00> : vector<32xf32>
    %347 = vector.multi_reduction <add>, %346, %cst_146 [1] : vector<32x32xf32> to vector<32xf32>
    %348 = vector.shape_cast %347 : vector<32xf32> to vector<32x1xf32>
    %cst_147 = arith.constant 3.200000e+01 : f32
    %349 = vector.broadcast %cst_147 : f32 to vector<32x1xf32>
    %350 = arith.divf %348, %349 : vector<32x1xf32>
    %cst_148 = arith.constant 9.99999974E-6 : f32
    %351 = vector.broadcast %cst_148 : f32 to vector<32x1xf32>
    %352 = arith.addf %350, %351 : vector<32x1xf32>
    %353 = math.rsqrt %352 : vector<32x1xf32>
    %354 = vector.broadcast %353 : vector<32x1xf32> to vector<32x32xf32>
    %355 = arith.mulf %345, %354 : vector<32x32xf32>
    %356 = vector.broadcast %337 : vector<1x32xf32> to vector<32x32xf32>
    %357 = arith.mulf %355, %356 : vector<32x32xf32>
    %358 = vector.broadcast %339 : vector<1x32xf32> to vector<32x32xf32>
    %359 = arith.addf %357, %358 : vector<32x32xf32>
    %c2 = arith.constant 2 : index
    %c0_149 = arith.constant 0 : index
    %c0_150 = arith.constant 0 : index
    %360 = vector.load %arg5[%c2, %c0_149, %c0_150] : memref<3x104x128xf32, #tpu.memory_space<vmem>>, vector<1x32x32xf32>
    %361 = vector.shape_cast %360 : vector<1x32x32xf32> to vector<32x32xf32>
    %cst_151 = arith.constant dense<0.000000e+00> : vector<32x32xf32>
    %362 = tpu.matmul %359, %361, %cst_151 {dimension_numbers = #tpu.dot_dimension_numbers<[1], [0], [0], [1], [0, 0, 1, 1], [], []>} : vector<32x32xf32>, vector<32x32xf32>, vector<32x32xf32> -> vector<32x32xf32>
    %c2_152 = arith.constant 2 : index
    %c96_153 = arith.constant 96 : index
    %c0_154 = arith.constant 0 : index
    %363 = vector.load %arg5[%c2_152, %c96_153, %c0_154] : memref<3x104x128xf32, #tpu.memory_space<vmem>>, vector<1x1x32xf32>
    %364 = vector.shape_cast %363 : vector<1x1x32xf32> to vector<1x32xf32>
    %365 = vector.broadcast %364 : vector<1x32xf32> to vector<32x32xf32>
    %366 = arith.addf %362, %365 : vector<32x32xf32>
    %c2_155 = arith.constant 2 : index
    %c0_156 = arith.constant 0 : index
    %c32_157 = arith.constant 32 : index
    %367 = vector.load %arg5[%c2_155, %c0_156, %c32_157] : memref<3x104x128xf32, #tpu.memory_space<vmem>>, vector<1x32x32xf32>
    %368 = vector.shape_cast %367 : vector<1x32x32xf32> to vector<32x32xf32>
    %cst_158 = arith.constant dense<0.000000e+00> : vector<32x32xf32>
    %369 = tpu.matmul %214, %368, %cst_158 {dimension_numbers = #tpu.dot_dimension_numbers<[1], [0], [0], [1], [0, 0, 1, 1], [], []>} : vector<32x32xf32>, vector<32x32xf32>, vector<32x32xf32> -> vector<32x32xf32>
    %c2_159 = arith.constant 2 : index
    %c96_160 = arith.constant 96 : index
    %c32_161 = arith.constant 32 : index
    %370 = vector.load %arg5[%c2_159, %c96_160, %c32_161] : memref<3x104x128xf32, #tpu.memory_space<vmem>>, vector<1x1x32xf32>
    %371 = vector.shape_cast %370 : vector<1x1x32xf32> to vector<1x32xf32>
    %372 = vector.broadcast %371 : vector<1x32xf32> to vector<32x32xf32>
    %373 = arith.addf %369, %372 : vector<32x32xf32>
    %cst_162 = arith.constant 0.000000e+00 : f32
    %374 = vector.broadcast %cst_162 : f32 to vector<32x32xf32>
    %375 = vector.extract_strided_slice %366 {offsets = [0, 0], sizes = [32, 16], strides = [1, 1]} : vector<32x32xf32> to vector<32x16xf32>
    %376 = vector.extract_strided_slice %373 {offsets = [0, 0], sizes = [32, 16], strides = [1, 1]} : vector<32x32xf32> to vector<32x16xf32>
    %cst_163 = arith.constant dense<0.000000e+00> : vector<32x32xf32>
    %377 = tpu.matmul %375, %375, %cst_163 {dimension_numbers = #tpu.dot_dimension_numbers<[1], [1], [0], [0], [0, 0, 1, 0], [], []>} : vector<32x16xf32>, vector<32x16xf32>, vector<32x32xf32> -> vector<32x32xf32>
    %cst_164 = arith.constant 2.500000e-01 : f32
    %378 = vector.broadcast %cst_164 : f32 to vector<32x32xf32>
    %379 = arith.mulf %377, %378 : vector<32x32xf32>
    %cst_165 = arith.constant -1.000000e+32 : f32
    %380 = vector.broadcast %cst_165 : f32 to vector<32x32xf32>
    %381 = arith.select %3, %379, %380 : vector<32x32xi1>, vector<32x32xf32>
    %cst_166 = arith.constant dense<0xFF800000> : vector<32xf32>
    %382 = vector.multi_reduction <maximumf>, %381, %cst_166 [1] : vector<32x32xf32> to vector<32xf32>
    %383 = vector.shape_cast %382 : vector<32xf32> to vector<32x1xf32>
    %384 = vector.broadcast %383 : vector<32x1xf32> to vector<32x32xf32>
    %385 = arith.subf %381, %384 : vector<32x32xf32>
    %386 = math.exp %385 : vector<32x32xf32>
    %387 = arith.mulf %386, %7 : vector<32x32xf32>
    %cst_167 = arith.constant dense<0.000000e+00> : vector<32xf32>
    %388 = vector.multi_reduction <add>, %386, %cst_167 [1] : vector<32x32xf32> to vector<32xf32>
    %389 = vector.shape_cast %388 : vector<32xf32> to vector<32x1xf32>
    %390 = tpu.reciprocal %389 {approx = true} : vector<32x1xf32> -> vector<32x1xf32>
    %391 = vector.broadcast %390 : vector<32x1xf32> to vector<32x32xf32>
    %392 = arith.mulf %387, %391 : vector<32x32xf32>
    %cst_168 = arith.constant dense<0.000000e+00> : vector<32x32xf32>
    %393 = tpu.matmul %392, %10, %cst_168 {dimension_numbers = #tpu.dot_dimension_numbers<[1], [0], [0], [1], [0, 0, 1, 1], [], []>} : vector<32x32xf32>, vector<32x32xf32>, vector<32x32xf32> -> vector<32x32xf32>
    %cst_169 = arith.constant dense<0.000000e+00> : vector<32xf32>
    %394 = vector.multi_reduction <add>, %392, %cst_169 [1] : vector<32x32xf32> to vector<32xf32>
    %395 = vector.shape_cast %394 : vector<32xf32> to vector<32x1xf32>
    %396 = vector.broadcast %395 : vector<32x1xf32> to vector<32x32xf32>
    %397 = arith.subf %396, %393 : vector<32x32xf32>
    %398 = arith.mulf %397, %14 : vector<32x32xf32>
    %cst_170 = arith.constant 0.000000e+00 : f32
    %399 = vector.broadcast %cst_170 : f32 to vector<32x32xf32>
    %400 = arith.maximumf %398, %399 : vector<32x32xf32>
    %401 = math.sqrt %400 : vector<32x32xf32>
    %402 = vector.broadcast %28 : vector<32x1xf32> to vector<32x32xf32>
    %403 = arith.mulf %401, %402 : vector<32x32xf32>
    %404 = math.exp %403 : vector<32x32xf32>
    %cst_171 = arith.constant 9.99999974E-6 : f32
    %cst_172 = arith.constant 1.000000e+05 : f32
    %405 = vector.broadcast %cst_171 : f32 to vector<32x32xf32>
    %406 = arith.maximumf %405, %404 : vector<32x32xf32>
    %407 = vector.broadcast %cst_172 : f32 to vector<32x32xf32>
    %408 = arith.minimumf %407, %406 : vector<32x32xf32>
    %409 = arith.mulf %379, %408 : vector<32x32xf32>
    %cst_173 = arith.constant -1.000000e+32 : f32
    %410 = vector.broadcast %cst_173 : f32 to vector<32x32xf32>
    %411 = arith.select %3, %409, %410 : vector<32x32xi1>, vector<32x32xf32>
    %cst_174 = arith.constant dense<0xFF800000> : vector<32xf32>
    %412 = vector.multi_reduction <maximumf>, %411, %cst_174 [1] : vector<32x32xf32> to vector<32xf32>
    %413 = vector.shape_cast %412 : vector<32xf32> to vector<32x1xf32>
    %414 = vector.broadcast %413 : vector<32x1xf32> to vector<32x32xf32>
    %415 = arith.subf %411, %414 : vector<32x32xf32>
    %416 = math.exp %415 : vector<32x32xf32>
    %cst_175 = arith.constant dense<0.000000e+00> : vector<32xf32>
    %417 = vector.multi_reduction <add>, %416, %cst_175 [1] : vector<32x32xf32> to vector<32xf32>
    %418 = vector.shape_cast %417 : vector<32xf32> to vector<32x1xf32>
    %419 = tpu.reciprocal %418 {approx = true} : vector<32x1xf32> -> vector<32x1xf32>
    %420 = vector.broadcast %419 : vector<32x1xf32> to vector<32x32xf32>
    %421 = arith.mulf %416, %420 : vector<32x32xf32>
    %cst_176 = arith.constant 0.000000e+00 : f32
    %422 = vector.broadcast %cst_176 : f32 to vector<32x32xf32>
    %423 = arith.select %12, %422, %421 : vector<32x32xi1>, vector<32x32xf32>
    %cst_177 = arith.constant dense<0.000000e+00> : vector<32x16xf32>
    %424 = tpu.matmul %423, %376, %cst_177 {dimension_numbers = #tpu.dot_dimension_numbers<[1], [0], [0], [1], [0, 0, 1, 1], [], []>} : vector<32x32xf32>, vector<32x16xf32>, vector<32x16xf32> -> vector<32x16xf32>
    %c2_178 = arith.constant 2 : index
    %c32_179 = arith.constant 32 : index
    %c0_180 = arith.constant 0 : index
    %425 = vector.load %arg5[%c2_178, %c32_179, %c0_180] : memref<3x104x128xf32, #tpu.memory_space<vmem>>, vector<1x16x32xf32>
    %426 = vector.shape_cast %425 : vector<1x16x32xf32> to vector<16x32xf32>
    %cst_181 = arith.constant dense<0.000000e+00> : vector<32x32xf32>
    %427 = tpu.matmul %424, %426, %cst_181 {dimension_numbers = #tpu.dot_dimension_numbers<[1], [0], [0], [1], [0, 0, 1, 1], [], []>} : vector<32x16xf32>, vector<16x32xf32>, vector<32x32xf32> -> vector<32x32xf32>
    %428 = arith.addf %374, %427 : vector<32x32xf32>
    %429 = vector.extract_strided_slice %366 {offsets = [0, 16], sizes = [32, 16], strides = [1, 1]} : vector<32x32xf32> to vector<32x16xf32>
    %430 = vector.extract_strided_slice %373 {offsets = [0, 16], sizes = [32, 16], strides = [1, 1]} : vector<32x32xf32> to vector<32x16xf32>
    %cst_182 = arith.constant dense<0.000000e+00> : vector<32x32xf32>
    %431 = tpu.matmul %429, %429, %cst_182 {dimension_numbers = #tpu.dot_dimension_numbers<[1], [1], [0], [0], [0, 0, 1, 0], [], []>} : vector<32x16xf32>, vector<32x16xf32>, vector<32x32xf32> -> vector<32x32xf32>
    %cst_183 = arith.constant 2.500000e-01 : f32
    %432 = vector.broadcast %cst_183 : f32 to vector<32x32xf32>
    %433 = arith.mulf %431, %432 : vector<32x32xf32>
    %cst_184 = arith.constant -1.000000e+32 : f32
    %434 = vector.broadcast %cst_184 : f32 to vector<32x32xf32>
    %435 = arith.select %3, %433, %434 : vector<32x32xi1>, vector<32x32xf32>
    %cst_185 = arith.constant dense<0xFF800000> : vector<32xf32>
    %436 = vector.multi_reduction <maximumf>, %435, %cst_185 [1] : vector<32x32xf32> to vector<32xf32>
    %437 = vector.shape_cast %436 : vector<32xf32> to vector<32x1xf32>
    %438 = vector.broadcast %437 : vector<32x1xf32> to vector<32x32xf32>
    %439 = arith.subf %435, %438 : vector<32x32xf32>
    %440 = math.exp %439 : vector<32x32xf32>
    %441 = arith.mulf %440, %7 : vector<32x32xf32>
    %cst_186 = arith.constant dense<0.000000e+00> : vector<32xf32>
    %442 = vector.multi_reduction <add>, %440, %cst_186 [1] : vector<32x32xf32> to vector<32xf32>
    %443 = vector.shape_cast %442 : vector<32xf32> to vector<32x1xf32>
    %444 = tpu.reciprocal %443 {approx = true} : vector<32x1xf32> -> vector<32x1xf32>
    %445 = vector.broadcast %444 : vector<32x1xf32> to vector<32x32xf32>
    %446 = arith.mulf %441, %445 : vector<32x32xf32>
    %cst_187 = arith.constant dense<0.000000e+00> : vector<32x32xf32>
    %447 = tpu.matmul %446, %10, %cst_187 {dimension_numbers = #tpu.dot_dimension_numbers<[1], [0], [0], [1], [0, 0, 1, 1], [], []>} : vector<32x32xf32>, vector<32x32xf32>, vector<32x32xf32> -> vector<32x32xf32>
    %cst_188 = arith.constant dense<0.000000e+00> : vector<32xf32>
    %448 = vector.multi_reduction <add>, %446, %cst_188 [1] : vector<32x32xf32> to vector<32xf32>
    %449 = vector.shape_cast %448 : vector<32xf32> to vector<32x1xf32>
    %450 = vector.broadcast %449 : vector<32x1xf32> to vector<32x32xf32>
    %451 = arith.subf %450, %447 : vector<32x32xf32>
    %452 = arith.mulf %451, %14 : vector<32x32xf32>
    %cst_189 = arith.constant 0.000000e+00 : f32
    %453 = vector.broadcast %cst_189 : f32 to vector<32x32xf32>
    %454 = arith.maximumf %452, %453 : vector<32x32xf32>
    %455 = math.sqrt %454 : vector<32x32xf32>
    %456 = vector.broadcast %28 : vector<32x1xf32> to vector<32x32xf32>
    %457 = arith.mulf %455, %456 : vector<32x32xf32>
    %458 = math.exp %457 : vector<32x32xf32>
    %cst_190 = arith.constant 9.99999974E-6 : f32
    %cst_191 = arith.constant 1.000000e+05 : f32
    %459 = vector.broadcast %cst_190 : f32 to vector<32x32xf32>
    %460 = arith.maximumf %459, %458 : vector<32x32xf32>
    %461 = vector.broadcast %cst_191 : f32 to vector<32x32xf32>
    %462 = arith.minimumf %461, %460 : vector<32x32xf32>
    %463 = arith.mulf %433, %462 : vector<32x32xf32>
    %cst_192 = arith.constant -1.000000e+32 : f32
    %464 = vector.broadcast %cst_192 : f32 to vector<32x32xf32>
    %465 = arith.select %3, %463, %464 : vector<32x32xi1>, vector<32x32xf32>
    %cst_193 = arith.constant dense<0xFF800000> : vector<32xf32>
    %466 = vector.multi_reduction <maximumf>, %465, %cst_193 [1] : vector<32x32xf32> to vector<32xf32>
    %467 = vector.shape_cast %466 : vector<32xf32> to vector<32x1xf32>
    %468 = vector.broadcast %467 : vector<32x1xf32> to vector<32x32xf32>
    %469 = arith.subf %465, %468 : vector<32x32xf32>
    %470 = math.exp %469 : vector<32x32xf32>
    %cst_194 = arith.constant dense<0.000000e+00> : vector<32xf32>
    %471 = vector.multi_reduction <add>, %470, %cst_194 [1] : vector<32x32xf32> to vector<32xf32>
    %472 = vector.shape_cast %471 : vector<32xf32> to vector<32x1xf32>
    %473 = tpu.reciprocal %472 {approx = true} : vector<32x1xf32> -> vector<32x1xf32>
    %474 = vector.broadcast %473 : vector<32x1xf32> to vector<32x32xf32>
    %475 = arith.mulf %470, %474 : vector<32x32xf32>
    %cst_195 = arith.constant 0.000000e+00 : f32
    %476 = vector.broadcast %cst_195 : f32 to vector<32x32xf32>
    %477 = arith.select %12, %476, %475 : vector<32x32xi1>, vector<32x32xf32>
    %cst_196 = arith.constant dense<0.000000e+00> : vector<32x16xf32>
    %478 = tpu.matmul %477, %430, %cst_196 {dimension_numbers = #tpu.dot_dimension_numbers<[1], [0], [0], [1], [0, 0, 1, 1], [], []>} : vector<32x32xf32>, vector<32x16xf32>, vector<32x16xf32> -> vector<32x16xf32>
    %c2_197 = arith.constant 2 : index
    %c48_198 = arith.constant 48 : index
    %c0_199 = arith.constant 0 : index
    %479 = vector.load %arg5[%c2_197, %c48_198, %c0_199] : memref<3x104x128xf32, #tpu.memory_space<vmem>>, vector<1x16x32xf32>
    %480 = vector.shape_cast %479 : vector<1x16x32xf32> to vector<16x32xf32>
    %cst_200 = arith.constant dense<0.000000e+00> : vector<32x32xf32>
    %481 = tpu.matmul %478, %480, %cst_200 {dimension_numbers = #tpu.dot_dimension_numbers<[1], [0], [0], [1], [0, 0, 1, 1], [], []>} : vector<32x16xf32>, vector<16x32xf32>, vector<32x32xf32> -> vector<32x32xf32>
    %482 = arith.addf %428, %481 : vector<32x32xf32>
    %c2_201 = arith.constant 2 : index
    %c97_202 = arith.constant 97 : index
    %c0_203 = arith.constant 0 : index
    %483 = vector.load %arg5[%c2_201, %c97_202, %c0_203] : memref<3x104x128xf32, #tpu.memory_space<vmem>>, vector<1x1x32xf32>
    %484 = vector.shape_cast %483 : vector<1x1x32xf32> to vector<1x32xf32>
    %485 = vector.broadcast %484 : vector<1x32xf32> to vector<32x32xf32>
    %486 = arith.addf %482, %485 : vector<32x32xf32>
    %487 = arith.addf %359, %486 : vector<32x32xf32>
    %c2_204 = arith.constant 2 : index
    %c97_205 = arith.constant 97 : index
    %c32_206 = arith.constant 32 : index
    %488 = vector.load %arg5[%c2_204, %c97_205, %c32_206] : memref<3x104x128xf32, #tpu.memory_space<vmem>>, vector<1x1x32xf32>
    %489 = vector.shape_cast %488 : vector<1x1x32xf32> to vector<1x32xf32>
    %c2_207 = arith.constant 2 : index
    %c97_208 = arith.constant 97 : index
    %c64_209 = arith.constant 64 : index
    %490 = vector.load %arg5[%c2_207, %c97_208, %c64_209] : memref<3x104x128xf32, #tpu.memory_space<vmem>>, vector<1x1x32xf32>
    %491 = vector.shape_cast %490 : vector<1x1x32xf32> to vector<1x32xf32>
    %cst_210 = arith.constant dense<0.000000e+00> : vector<32xf32>
    %492 = vector.multi_reduction <add>, %487, %cst_210 [1] : vector<32x32xf32> to vector<32xf32>
    %493 = vector.shape_cast %492 : vector<32xf32> to vector<32x1xf32>
    %cst_211 = arith.constant 3.200000e+01 : f32
    %494 = vector.broadcast %cst_211 : f32 to vector<32x1xf32>
    %495 = arith.divf %493, %494 : vector<32x1xf32>
    %496 = vector.broadcast %495 : vector<32x1xf32> to vector<32x32xf32>
    %497 = arith.subf %487, %496 : vector<32x32xf32>
    %498 = arith.mulf %497, %497 : vector<32x32xf32>
    %cst_212 = arith.constant dense<0.000000e+00> : vector<32xf32>
    %499 = vector.multi_reduction <add>, %498, %cst_212 [1] : vector<32x32xf32> to vector<32xf32>
    %500 = vector.shape_cast %499 : vector<32xf32> to vector<32x1xf32>
    %cst_213 = arith.constant 3.200000e+01 : f32
    %501 = vector.broadcast %cst_213 : f32 to vector<32x1xf32>
    %502 = arith.divf %500, %501 : vector<32x1xf32>
    %cst_214 = arith.constant 9.99999974E-6 : f32
    %503 = vector.broadcast %cst_214 : f32 to vector<32x1xf32>
    %504 = arith.addf %502, %503 : vector<32x1xf32>
    %505 = math.rsqrt %504 : vector<32x1xf32>
    %506 = vector.broadcast %505 : vector<32x1xf32> to vector<32x32xf32>
    %507 = arith.mulf %497, %506 : vector<32x32xf32>
    %508 = vector.broadcast %489 : vector<1x32xf32> to vector<32x32xf32>
    %509 = arith.mulf %507, %508 : vector<32x32xf32>
    %510 = vector.broadcast %491 : vector<1x32xf32> to vector<32x32xf32>
    %511 = arith.addf %509, %510 : vector<32x32xf32>
    %c2_215 = arith.constant 2 : index
    %c0_216 = arith.constant 0 : index
    %c64_217 = arith.constant 64 : index
    %512 = vector.load %arg5[%c2_215, %c0_216, %c64_217] : memref<3x104x128xf32, #tpu.memory_space<vmem>>, vector<1x32x64xf32>
    %513 = vector.shape_cast %512 : vector<1x32x64xf32> to vector<32x64xf32>
    %cst_218 = arith.constant dense<0.000000e+00> : vector<32x64xf32>
    %514 = tpu.matmul %511, %513, %cst_218 {dimension_numbers = #tpu.dot_dimension_numbers<[1], [0], [0], [1], [0, 0, 1, 1], [], []>} : vector<32x32xf32>, vector<32x64xf32>, vector<32x64xf32> -> vector<32x64xf32>
    %c2_219 = arith.constant 2 : index
    %c96_220 = arith.constant 96 : index
    %c64_221 = arith.constant 64 : index
    %515 = vector.load %arg5[%c2_219, %c96_220, %c64_221] : memref<3x104x128xf32, #tpu.memory_space<vmem>>, vector<1x1x64xf32>
    %516 = vector.shape_cast %515 : vector<1x1x64xf32> to vector<1x64xf32>
    %517 = vector.broadcast %516 : vector<1x64xf32> to vector<32x64xf32>
    %518 = arith.addf %514, %517 : vector<32x64xf32>
    %cst_222 = arith.constant 0.000000e+00 : f32
    %519 = vector.broadcast %cst_222 : f32 to vector<32x64xf32>
    %520 = arith.maximumf %518, %519 : vector<32x64xf32>
    %c2_223 = arith.constant 2 : index
    %c32_224 = arith.constant 32 : index
    %c32_225 = arith.constant 32 : index
    %521 = vector.load %arg5[%c2_223, %c32_224, %c32_225] : memref<3x104x128xf32, #tpu.memory_space<vmem>>, vector<1x64x32xf32>
    %522 = vector.shape_cast %521 : vector<1x64x32xf32> to vector<64x32xf32>
    %cst_226 = arith.constant dense<0.000000e+00> : vector<32x32xf32>
    %523 = tpu.matmul %520, %522, %cst_226 {dimension_numbers = #tpu.dot_dimension_numbers<[1], [0], [0], [1], [0, 0, 1, 1], [], []>} : vector<32x64xf32>, vector<64x32xf32>, vector<32x32xf32> -> vector<32x32xf32>
    %c2_227 = arith.constant 2 : index
    %c97_228 = arith.constant 97 : index
    %c96_229 = arith.constant 96 : index
    %524 = vector.load %arg5[%c2_227, %c97_228, %c96_229] : memref<3x104x128xf32, #tpu.memory_space<vmem>>, vector<1x1x32xf32>
    %525 = vector.shape_cast %524 : vector<1x1x32xf32> to vector<1x32xf32>
    %526 = vector.broadcast %525 : vector<1x32xf32> to vector<32x32xf32>
    %527 = arith.addf %523, %526 : vector<32x32xf32>
    %528 = arith.addf %511, %527 : vector<32x32xf32>
    %c2_230 = arith.constant 2 : index
    %c98_231 = arith.constant 98 : index
    %c0_232 = arith.constant 0 : index
    %529 = vector.load %arg5[%c2_230, %c98_231, %c0_232] : memref<3x104x128xf32, #tpu.memory_space<vmem>>, vector<1x1x32xf32>
    %530 = vector.shape_cast %529 : vector<1x1x32xf32> to vector<1x32xf32>
    %c2_233 = arith.constant 2 : index
    %c98_234 = arith.constant 98 : index
    %c32_235 = arith.constant 32 : index
    %531 = vector.load %arg5[%c2_233, %c98_234, %c32_235] : memref<3x104x128xf32, #tpu.memory_space<vmem>>, vector<1x1x32xf32>
    %532 = vector.shape_cast %531 : vector<1x1x32xf32> to vector<1x32xf32>
    %cst_236 = arith.constant dense<0.000000e+00> : vector<32xf32>
    %533 = vector.multi_reduction <add>, %528, %cst_236 [1] : vector<32x32xf32> to vector<32xf32>
    %534 = vector.shape_cast %533 : vector<32xf32> to vector<32x1xf32>
    %cst_237 = arith.constant 3.200000e+01 : f32
    %535 = vector.broadcast %cst_237 : f32 to vector<32x1xf32>
    %536 = arith.divf %534, %535 : vector<32x1xf32>
    %537 = vector.broadcast %536 : vector<32x1xf32> to vector<32x32xf32>
    %538 = arith.subf %528, %537 : vector<32x32xf32>
    %539 = arith.mulf %538, %538 : vector<32x32xf32>
    %cst_238 = arith.constant dense<0.000000e+00> : vector<32xf32>
    %540 = vector.multi_reduction <add>, %539, %cst_238 [1] : vector<32x32xf32> to vector<32xf32>
    %541 = vector.shape_cast %540 : vector<32xf32> to vector<32x1xf32>
    %cst_239 = arith.constant 3.200000e+01 : f32
    %542 = vector.broadcast %cst_239 : f32 to vector<32x1xf32>
    %543 = arith.divf %541, %542 : vector<32x1xf32>
    %cst_240 = arith.constant 9.99999974E-6 : f32
    %544 = vector.broadcast %cst_240 : f32 to vector<32x1xf32>
    %545 = arith.addf %543, %544 : vector<32x1xf32>
    %546 = math.rsqrt %545 : vector<32x1xf32>
    %547 = vector.broadcast %546 : vector<32x1xf32> to vector<32x32xf32>
    %548 = arith.mulf %538, %547 : vector<32x32xf32>
    %549 = vector.broadcast %530 : vector<1x32xf32> to vector<32x32xf32>
    %550 = arith.mulf %548, %549 : vector<32x32xf32>
    %551 = vector.broadcast %532 : vector<1x32xf32> to vector<32x32xf32>
    %552 = arith.addf %550, %551 : vector<32x32xf32>
    %c0_241 = arith.constant 0 : index
    %c0_242 = arith.constant 0 : index
    %c0_243 = arith.constant 0 : index
    %553 = vector.load %arg6[%c0_241, %c0_242, %c0_243] : memref<1x32x32xf32, #tpu.memory_space<vmem>>, vector<1x32x32xf32>
    %554 = vector.shape_cast %553 : vector<1x32x32xf32> to vector<32x32xf32>
    %555 = vector.shape_cast %552 : vector<32x32xf32> to vector<1x32x32xf32>
    tpu.vector_store %arg6[%c0_241, %c0_242, %c0_243], %555 {strides = array<i32>} : memref<1x32x32xf32, #tpu.memory_space<vmem>>, vector<1x32x32xf32>,
    return
  }
  func.func @transform_0(%arg0: i32) -> (i32, i32, i32) {
    %c0_i32 = arith.constant 0 : i32
    %c0_i32_0 = arith.constant 0 : i32
    %c0_i32_1 = arith.constant 0 : i32
    return %arg0, %c0_i32, %c0_i32_0 : i32, i32, i32
  }
  func.func @transform_1(%arg0: i32) -> (i32, i32, i32) {
    %c0_i32 = arith.constant 0 : i32
    %c0_i32_0 = arith.constant 0 : i32
    %c0_i32_1 = arith.constant 0 : i32
    return %arg0, %c0_i32, %c0_i32_0 : i32, i32, i32
  }
  func.func @transform_2(%arg0: i32) -> (i32, i32, i32) {
    %c0_i32 = arith.constant 0 : i32
    %c0_i32_0 = arith.constant 0 : i32
    %c0_i32_1 = arith.constant 0 : i32
    return %arg0, %c0_i32, %c0_i32_0 : i32, i32, i32
  }
  func.func @transform_3(%arg0: i32) -> (i32, i32, i32) {
    %c0_i32 = arith.constant 0 : i32
    %c0_i32_0 = arith.constant 0 : i32
    %c0_i32_1 = arith.constant 0 : i32
    return %arg0, %c0_i32, %c0_i32_0 : i32, i32, i32
  }
  func.func @transform_4(%arg0: i32) -> (i32, i32, i32) {
    %c0_i32 = arith.constant 0 : i32
    %c0_i32_0 = arith.constant 0 : i32
    %c0_i32_1 = arith.constant 0 : i32
    %c0_i32_2 = arith.constant 0 : i32
    return %c0_i32, %c0_i32_0, %c0_i32_1 : i32, i32, i32
  }
  func.func @transform_5(%arg0: i32) -> (i32, i32, i32) {
    %c0_i32 = arith.constant 0 : i32
    %c0_i32_0 = arith.constant 0 : i32
    %c0_i32_1 = arith.constant 0 : i32
    return %arg0, %c0_i32, %c0_i32_0 : i32, i32, i32
  }
}

</mosaic_0001>

<bundles_post_ra>
// kernel: architecture_forward.1
= control target key start
LH: loop header
LB: loop body
LE: loop exit
PB: predicated region body
PF: predicated region fallthrough
CT: control target
= control target key end

     0   :  { %s9119_s0 = inlined_call_operand.vmem [shape: f32[2,32,32], index: 0, kind: input, shape index: {}]   ;;  %s9120_s1 = inlined_call_operand.hbm [shape: f32[2,32,32], index: 1, kind: input, shape index: {}]   ;;  %s9121_s2 = inlined_call_operand.hbm [shape: f32[2,32,32], index: 2, kind: input, shape index: {}]   ;;  %s9122_s3 = inlined_call_operand.vmem [shape: f32[2,32,1], index: 3, kind: input, shape index: {}]   ;;  %s9123_s4 = inlined_call_operand.hbm [shape: f32[3,104,128], index: 4, kind: input, shape index: {}]   ;;  %s9124_s5 = inlined_call_operand.hbm [shape: f32[2,32,32], index: 5, kind: output, shape index: {}]  }
   0x1   :  { %9146 = sst [smem:[#allocation21_spill]] %s9120_s1 }
   0x2   :  { %9147 = sst [smem:[#allocation22_spill]] %s9123_s4 }
   0x3   :  { %10 = vsyncpa [#allocation3], 0 }
   0x4   :  { %12 = vsyncpa [#allocation3 + $0x1], 0 }
   0x5   :  { %13 = vsyncpa [#allocation6], 0 }
   0x6   :  { %15 = vsyncpa [#allocation6 + $0x1], 0 }
   0x7   :  { %16 = vsyncpa [#allocation4], 0 }
   0x8   :  { %18 = vsyncpa [#allocation4 + $0x1], 0  ;;  %s7431_s18 = smov 0   ;;  %s7433_s19 = smov 0  }
   0x9   :  { %s7435_s20 = smov 0   ;;  %s7437_s21 = smov 0  }
   0xa LB: > { %9148 = sst [smem:[#allocation13_spill]] %s7379_s20  ;;  %s7452_s22 = sadd.s32 4294967295, %s7383_s21   ;;  %s7383_s21 = sphi %s7437_s21, %s9208_s21   ;;  %s7379_s20 = sphi %s7435_s20, %s9205_s20   ;;  %s7375_s19 = sphi %s7433_s19, %s9207_s19   ;;  %s7371_s18 = sphi %s7431_s18, %s9206_s18  }
   0xb   : > { %s5455_s23 = sadd.s32 4294967294, %s7383_s21   ;;  %p70_p0 = scmp.ne.s32.totalorder %s7375_s19, %s7371_s18 }
   0xc   : > { %p9125_p1 = scmp.eq.s32.totalorder %s7452_s22, 0  ;;  %p173_p3 = scmp.eq.s32.totalorder %s5455_s23, 1 }
   0xd   : > { %p5456_p5 = scmp.ge.s32.totalorder %s7383_s21, 1  ;;  %p180_p7 = scmp.lt.s32.totalorder %s7383_s21, 3 }
   0xe   : > { %p7461_p4 = por %p9125_p1, %p70_p0  ;;  %p7466_p6 = por %p173_p3, %p70_p0 }
   0xf   : > { %p7471_p8 = pnand %p5456_p5, %p180_p7  ;;  %s7385_s27 = smov [#allocation7]  }
  0x10   : > { %s9149_s24 = scalar_select %p7461_p4, 1, 0 }
  0x11   : > { %s9150_s25 = scalar_select %p7466_p6, 1, 0 }
  0x12   : > { %s9151_s26 = scalar_select %p7471_p8, 1, 0 }
  0x13   : > { %s192_s28 = sshll.u32 %s7385_s27, 4  ;;  %p6666_p9 = pneg %p7471_p8  ;;  %s7475_s28 = int_to_ptr.vmem [resolvable:$true] %s192_s28 }
  0x14   : > { %s7487_s30 = sadd.s32 1, %s7383_s21   ;;  %s57_s6 = sadd.s32 1, %s7379_s20 }
  0x15   : > { %p7482_p11 = pnand %p6666_p9, %p9125_p1  ;;  %s54_s7 = ssub.s32 %s7383_s21, %s7487_s30 }
  0x16   : > { %s9153_s4 = sld [smem:[#allocation22_spill]] }
  0x17   : > { %p7223_p13 = pneg %p7482_p11 }
  0x1c   : > { %s7221_s10 = scalar_lea.hbm %s9153_s4, 4992 }
  0x1d   : > { %p7222_p12 = scmp.ne.s32.totalorder %s9153_s4, %s7221_s10  ;;  %p7228_p5 = scmp.lt.u32.totalorder %s7221_s10, %s9153_s4 }
  0x1f   : > { %p7224_p0 = pnand %p7223_p13, %p7222_p12 }
  0x21   : > { %p7225_p3 = pneg %p7224_p0 }
  0x23   : > { %p7230_p7 = pnand %p7228_p5, %p7225_p3 }
  0x25   : > { %7233 = shalt.err (!%p7230_p7)
}
  0x26   : > { %s7234_s15 = scalar_lea.vmem %s7475_s28, 4992  ;;  %p7242_p2 = scmp.lt.s32.totalorder %s7475_s28, %s7475_s28 }
  0x27   : > { %p7235_p9 = scmp.ne.s32.totalorder %s7475_s28, %s7234_s15  ;;  %p7243_p6 = scmp.lt.s32.totalorder %s7234_s15, %s7234_s15 }
  0x29   : > { %p7237_p10 = pnand %p7235_p9, %p7223_p13  ;;  %p7244_p4 = por %p7243_p6, %p7242_p2 }
  0x2b   : > { %p7238_p1 = pneg %p7237_p10 }
  0x2d   : > { %p7245_p8 = pnand %p7244_p4, %p7238_p1 }
  0x2f   : > { %7248 = shalt.err (!%p7245_p8)
}
  0x30   : > { %s9128_s16 = smov 128   ;;  %s9130_s17 = smov 8  }
  0x31   : > { %6669 = dma.hbm_to_vmem [thread:$0]  (!%p7482_p11), %s9153_s4, 4992, %s7475_s28, [#allocation6], %s9128_s16, %s9128_s16, %s9130_s17  }
  0x32   : > { %p55_p1 = scmp.eq.s32.totalorder %s54_s7, 0  ;;  %p64_p2 = scmp.ne.s32.totalorder %s7379_s20, %s7375_s19 }
  0x33   : > { %p65_p4 = scmp.eq.s32.totalorder %s7383_s21, 0  ;;  %p6682_p6 = scmp.lt.s32.totalorder %s7383_s21, 2 }
  0x34   : > { %s7521_s8 = scalar_select %p55_p1, %s7379_s20, %s57_s6  }
  0x35   : > { %p66_p8 = por %p65_p4, %p64_p2  ;;  %p9155_p10 = scmp.eq.s32.totalorder %s7452_s22, 1 }
  0x36   : > { %9154 = sst [smem:[#allocation14_spill]] %s7521_s8  ;;  %s214_s29 = sand.u32 1, %s7379_s20  }
  0x37   : > { %p7525_p12 = por %p9155_p10, %p64_p2  ;;  %s5675_s10 = sshll.u32 %s7383_s21, 9 }
  0x38   : > { %s7531_s11 = sshll.u32 %s214_s29, 5  ;;  %s9157_s1 = sld [smem:[#allocation21_spill]] }
  0x39   : > { %s218_s6 = scalar_lea.vmem [#allocation2], %s7531_s11  ;;  %p7539_p11 = pnand %p6682_p6, %p66_p8 }
  0x3a   : > { %s225_s7 = sshll.u32 %s218_s6, 4  ;;  %s7548_s27 = scalar_lea.hbm %s9121_s2, %s5675_s10  ;;  %s7543_s7 = int_to_ptr.vmem [resolvable:$true] %s225_s7 }
  0x3b   : > { %s7550_s12 = scalar_lea.sflag [#allocation3], %s214_s29  ;;  %p7251_p0 = pneg %p7539_p11 }
  0x3e   : > { %s7536_s28 = scalar_lea.hbm %s9157_s1, %s5675_s10  ;;  %s7254_s17 = scalar_lea.hbm %s9157_s1, 1024 }
  0x3f   : > { %s7249_s13 = scalar_lea.hbm %s7536_s28, 512  ;;  %p7255_p7 = scmp.lt.u32.totalorder %s7536_s28, %s9157_s1 }
  0x40   : > { %p7250_p13 = scmp.ne.s32.totalorder %s7536_s28, %s7249_s13  ;;  %p7256_p9 = scmp.lt.u32.totalorder %s7254_s17, %s7249_s13 }
  0x41   : > { %p7258_p2 = scmp.lt.u32.totalorder %s7249_s13, %s7536_s28 }
  0x42   : > { %p7252_p3 = pnand %p7251_p0, %p7250_p13  ;;  %p7257_p1 = por %p7256_p9, %p7255_p7 }
  0x44   : > { %p7253_p5 = pneg %p7252_p3  ;;  %p7259_p4 = por %p7258_p2, %p7257_p1 }
  0x46   : > { %p7260_p6 = pnand %p7259_p4, %p7253_p5 }
  0x48   : > { %7263 = shalt.err (!%p7260_p6)
}
  0x49   : > { %s7264_s29 = scalar_lea.vmem %s7543_s7, 512  ;;  %s7388_s16 = smov [#allocation2]  }
  0x4a   : > { %p7265_p8 = scmp.ne.s32.totalorder %s7543_s7, %s7264_s29  ;;  %s7269_s10 = sshll.u32 %s7388_s16, 4  ;;  %s7270_s10 = int_to_ptr.vmem [resolvable:$false] %s7269_s10 }
  0x4b   : > { %s7271_s4 = scalar_lea.vmem %s7270_s10, 1024  ;;  %p7272_p3 = scmp.lt.s32.totalorder %s7543_s7, %s7270_s10 }
  0x4c   : > { %p7267_p10 = pnand %p7265_p8, %p7251_p0  ;;  %p7273_p7 = scmp.lt.s32.totalorder %s7271_s4, %s7264_s29 }
  0x4e   : > { %p7268_p13 = pneg %p7267_p10  ;;  %p7274_p9 = por %p7273_p7, %p7272_p3 }
  0x50   : > { %p7275_p1 = pnand %p7274_p9, %p7268_p13 }
  0x52   : > { %7278 = shalt.err (!%p7275_p1)
}
  0x53   : > { %s9159_s17 = smov 8   ;;  %s9160_s8 = smov 128  }
  0x54   : > { %6673 = dma.hbm_to_vmem [thread:$0]  (!%p7539_p11), %s7536_s28, 512, %s7543_s7, %s7550_s12, %s9160_s8, %s9160_s8, %s9159_s17  }
  0x55   : > { %s239_s15 = scalar_lea.vmem [#allocation5], %s7531_s11  ;;  %s235_s13 = sand.u32 1, %s7383_s21  }
  0x56   : > { %s246_s23 = sshll.u32 %s239_s15, 4  ;;  %s7585_s6 = scalar_lea.sflag [#allocation6], %s235_s13  ;;  %s7583_s23 = int_to_ptr.vmem [resolvable:$true] %s246_s23 }
  0x57   : > { %s7279_s29 = scalar_lea.hbm %s7548_s27, 512  ;;  %s7284_s4 = scalar_lea.hbm %s9121_s2, 1024 }
  0x58   : > { %p7280_p5 = scmp.ne.s32.totalorder %s7548_s27, %s7279_s29  ;;  %p7285_p6 = scmp.lt.u32.totalorder %s7548_s27, %s9121_s2 }
  0x59   : > { %p7286_p8 = scmp.lt.u32.totalorder %s7284_s4, %s7279_s29  ;;  %p7288_p13 = scmp.lt.u32.totalorder %s7279_s29, %s7548_s27 }
  0x5a   : > { %p7282_p2 = pnand %p7280_p5, %p7251_p0 }
  0x5b   : > { %p7287_p10 = por %p7286_p8, %p7285_p6 }
  0x5c   : > { %p7283_p4 = pneg %p7282_p2 }
  0x5d   : > { %p7289_p3 = por %p7288_p13, %p7287_p10 }
  0x5f   : > { %p7290_p7 = pnand %p7289_p3, %p7283_p4 }
  0x61   : > { %7293 = shalt.err (!%p7290_p7)
}
  0x62   : > { %s7294_s11 = scalar_lea.vmem %s7583_s23, 512  ;;  %s7389_s28 = smov [#allocation5]  }
  0x63   : > { %p7295_p9 = scmp.ne.s32.totalorder %s7583_s23, %s7294_s11  ;;  %s7299_s7 = sshll.u32 %s7389_s28, 4  ;;  %s7300_s7 = int_to_ptr.vmem [resolvable:$false] %s7299_s7 }
  0x64   : > { %s7301_s1 = scalar_lea.vmem %s7300_s7, 1024  ;;  %p7302_p2 = scmp.lt.s32.totalorder %s7583_s23, %s7300_s7 }
  0x65   : > { %p7297_p1 = pnand %p7295_p9, %p7251_p0  ;;  %p7303_p6 = scmp.lt.s32.totalorder %s7301_s1, %s7294_s11 }
  0x67   : > { %p7298_p5 = pneg %p7297_p1  ;;  %p7304_p8 = por %p7303_p6, %p7302_p2 }
  0x69   : > { %p7305_p10 = pnand %p7304_p8, %p7298_p5 }
  0x6b   : > { %7308 = shalt.err (!%p7305_p10)
}
  0x6c   : > { %6676 = dma.hbm_to_vmem [thread:$0]  (!%p7539_p11), %s7548_s27, 512, %s7583_s23, %s7585_s6, %s9160_s8, %s9160_s8, %s9159_s17  }
  0x6d   : > { %p9161_p0 = scmp.ne.s32.totalorder %s9151_s26, 0 }
  0x6f   : > { %266 = sbr.rel (%p9161_p0) target bundleno = 8562 (0x2172), region = 40 }
  0x76   : > { %s7617_s20 = sand.u32 1, %s7375_s19   ;;  %p9162_p4 = scmp.ne.s32.totalorder %s9149_s24, 0 }
  0x77   : > { %s7620_s12 = sshll.u32 %s7617_s20, 5  ;;  %s269_s14 = scalar_lea.sflag [#allocation3], %s7617_s20 }
  0x78   : > { %s7624_s15 = scalar_lea.vmem [#allocation2], %s7620_s12 }
  0x79   : > { %7354 = dma.done.wait (%p9162_p4), %s269_s14, 512  }
  0x7a   : > { %7356 = vsyncadd (%p9162_p4), %s269_s14, 4294966784  ;;  %s277_s26 = sand.u32 1, %s7452_s22   ;;  %s7632_s17 = scalar_lea.vmem [#allocation5], %s7620_s12 }
  0x7b   : > { %s278_s27 = scalar_lea.sflag [#allocation6], %s277_s26 }
  0x7c   : > { %7358 = dma.done.wait (%p9162_p4), %s278_s27, 512  }
  0x7d   : > { %7360 = vsyncadd (%p9162_p4), %s278_s27, 4294966784  ;;  %p9163_p11 = scmp.eq.s32.totalorder %s7452_s22, 0 }
  0x7f   : > { %7362 = dma.done.wait (%p9163_p11), [#allocation6], 4992   ;;  %p9164_p13 = pmov %p9163_p11 }
  0x80   : > { %vm445_vm0 = vcmask 261120   ;;  %v7642_v0 = vld [vmem:[#allocation7] sm:$0xff]  ;;  %v7644_v1 = vld [vmem:[#allocation7 + $0x8] sm:$0xff]  ;;  %v438_v2 = vld [vmem:[#allocation7 + $0x10] sm:$0xff]  ;;  %vm543_vm1 = vcmask 130048   ;;  %v9165_v16 = vmov 0  ;;  %v337_v23 = vlaneseq }
  0x81   : > { %7364 = vsyncadd (%p9164_p13), [#allocation6], 4294962304  ;;  %v6372_v4 = vpack.c.bf16 %v7644_v1, %v7642_v0  ;;  %v439_v5 = vld [vmem:[#allocation7 + $0x18] sm:$0xff]  ;;  %v432_v6 = vld [vmem:[%s7624_s15] sm:$0xff]  ;;  %s7391_s24 = smov 112   ;;  %p327_p3 = scmp.lt.s32.totalorder %s7452_s22, 1 }
  0x82   : > { %v6376_v7 = vpack.c.bf16 %v439_v5, %v438_v2  ;;  %5940 = vmatprep.mubr.msk.f32.mxu1 %vm445_vm0, %v432_v6  ;;  %v433_v8 = vld [vmem:[%s7624_s15 + $0x8] sm:$0xff]  ;;  %v434_v9 = vld [vmem:[%s7624_s15 + $0x10] sm:$0xff]  ;;  %v435_v10 = vld [vmem:[%s7624_s15 + $0x18] sm:$0xff]  ;;  %v7692_v24 = vshrl.u32 %v337_v23, 7  ;;  %v7694_v25 = vand.u32 127, %v337_v23  ;;  %s7394_s16 = smov 96  }
  0x83   : > { %6373 = vmatprep.subr.bf16.mxu1 %v6372_v4  ;;  %v5486_v11 = vld [vmem:[#allocation7 + $0x60] ss:$0 sm:$0xff]  ;;  %vm7664_vm2 = vmpackc.low %vm543_vm1, %vm543_vm1  ;;  %s7807_s8 = scalar_select %p327_p3, %s7452_s22, 1 }
  0x84   : > { %6375 = vmatpush3.bf16.msra.mxu1 %v6372_v4  ;;  %v9166_v16 = vsel %vm7664_vm2, 4294967295, %v9165_v16  ;;  %9168 = vst [vmem:[#allocation16_spill] sm:$0xff] %v7692_v24  ;;  %9169 = vst [vmem:[#allocation17_spill] sm:$0xff] %v7694_v25  ;;  %v7697_v26 = vadd.s32 8, %v7692_v24  ;;  %vm7701_vm3 = vcmp.le.s32.totalorder %v7694_v25, %v7692_v24  ;;  %v7706_v30 = vadd.s32 16, %v7692_v24  ;;  %s7395_s10 = smov 80  }
  0x85   : > { %6377 = vmatprep.subr.bf16.mxu1 %v6376_v7  ;;  %9167 = vst [vmem:[#allocation15_spill] sm:$0xff] %v9166_v16  ;;  %v7719_v34 = vadd.s32 24, %v7692_v24  ;;  %vm368_vm7 = vcmp.le.s32.totalorder %v7692_v24, %v7694_v25  ;;  %s5677_s23 = sshll.u32 %s7807_s8, 5  ;;  %s7396_s7 = smov 64  }
  0x86   : > { %9170 = vst [vmem:[#allocation18_spill] sm:$0xff] %v7697_v26  ;;  %9173 = vst [vmem:[#allocation19_spill] sm:$0xff] %v7706_v30  ;;  %vm7714_vm4 = vcmp.le.s32.totalorder %v7694_v25, %v7697_v26  ;;  %vm7727_vm5 = vcmp.le.s32.totalorder %v7694_v25, %v7706_v30  ;;  %vm369_vm8 = vcmp.le.s32.totalorder %v7697_v26, %v7694_v25  ;;  %s336_s29 = scalar_lea.vmem %s9122_s3, %s5677_s23  ;;  %s8083_s28 = scalar_lea.vmem %s9119_s0, %s5677_s23 }
  0x87   : > { %9176 = vst [vmem:[#allocation20_spill] sm:$0xff] %v7719_v34  ;;  %vm7740_vm6 = vcmp.le.s32.totalorder %v7694_v25, %v7719_v34  ;;  %vm370_vm9 = vcmp.le.s32.totalorder %v7706_v30, %v7694_v25  ;;  %vm371_vm10 = vcmp.le.s32.totalorder %v7719_v34, %v7694_v25  ;;  %vm7777_vm11 = vmpackc.low %vm369_vm8, %vm368_vm7  ;;  %s7397_s1 = smov 32   ;;  %s326_s14 = scalar_lea.vmem [#allocation8], %s7620_s12 }
  0x88   : > { %6379 = vmatpush3.bf16.msra.mxu1 %v6376_v7  ;;  %vm7781_vm12 = vmpackc.low %vm371_vm10, %vm370_vm9  ;;  %s5679_s26 = sshll.u32 %s7452_s22, 9  ;;  %s7398_s22 = smov [#allocation8]  }
  0x89   : > { %s7313_s23 = sshll.u32 %s7398_s22, 4  ;;  %s7314_s23 = int_to_ptr.vmem [resolvable:$false] %s7313_s23 }
  0x8a   : > { %s7315_s13 = scalar_lea.vmem %s7314_s23, 1024 }
  0x8b   : > { %5941 = vmatmul.mubr.msk.f32.vlgmr.msra.gmra.mrb[0].mxu1 %vm445_vm0, %v433_v8 }
  0x8c   : > { %5943 = vmatprep.mubr.msk.f32.mxu1 %vm445_vm0, %v434_v9 }
  0x8f   : > { %5944 = vmatmul.mubr.msk.f32.gmra.mrb[2].mxu1 %vm445_vm0, %v435_v10  ;;  %v9135_v10 = vmov 1.0|1.0  }
  0x90   : > { %6393 = vmatprep.subr.msk.bf16.mxu0 %vm7777_vm11, %v9135_v10 }
  0x91   : > { %6395 = vmatpush3.bf16.msk.msra.mxu0 %vm7777_vm11, %v9135_v10 }
  0x92   : > { %6397 = vmatprep.subr.msk.bf16.mxu0 %vm7781_vm12, %v9135_v10 }
  0x95   : > { %6399 = vmatpush3.bf16.msk.msra.mxu0 %vm7781_vm12, %v9135_v10 }
 0x15e   : > { %v5942_v12 = vpop.f32.mrb[0].mxu1 }
 0x15f   : > { %v7658_v13 = vadd.f32 %v5942_v12, %v5486_v11  ;;  %v524_v14 = vpop.f32.mrb[1].mxu1  ;;  %v7815_v12 = vld [vmem:[%s336_s29 + $0x8] sm:$0xff] }
 0x160   : > { %v7660_v15 = vadd.f32 %v5486_v11, %v524_v14  ;;  %v397_v14 = vand.u32 2147483647, %v7815_v12 }
 0x162   : > { %5954 = vmatprep.mubr.msk.f32.mxu1 %vm543_vm1, %v7660_v15  ;;  %v6380_v17 = vpack.c.bf16 %v7658_v13, %v7660_v15  ;;  %v5945_v18 = vpop.f32.mrb[2].mxu1 }
 0x163   : > { %v7672_v19 = vadd.f32 %v5945_v18, %v5486_v11  ;;  %v534_v20 = vpop.f32.mrb[3].mxu1  ;;  %v401_v18 = vsub.f32 0.0, %v397_v14 }
 0x164   : > { %6382 = vmatprep.subr.msk.bf16.mxu1 %vm7664_vm2, %v6380_v17  ;;  %v7676_v21 = vadd.f32 %v5486_v11, %v534_v20  ;;  %v7392_v11 = vmov 0  }
 0x165   : > { %6385 = vmatpush3.bf16.xpose.msk.msra.mxu1 %vm7664_vm2, %v6380_v17  ;;  %6731 = vset.pattern.permute.xlu1 %v7392_v11  ;;  %v7818_v17 = vld [vmem:[%s336_s29 + $0x10] sm:$0xff]  ;;  %v406_v23 = vmul.f32 1.442695, %v401_v18 }
 0x166   : > { %v6386_v22 = vpack.c.bf16 %v7672_v19, %v7676_v21  ;;  %6730 = vset.pattern.permute.xlu0 %v7392_v11  ;;  %v398_v20 = vand.u32 2147483647, %v7818_v17 }
 0x168   : > { %6388 = vmatprep.subr.msk.bf16.mxu1 %vm7664_vm2, %v6386_v22 }
 0x16d   : > { %6391 = vmatpush3.bf16.xpose.msk.msra.mxu1 %vm7664_vm2, %v6386_v22  ;;  %v7821_v22 = vld [vmem:[%s336_s29 + $0x18] sm:$0xff] }
 0x174   : > { %5955 = vmatmul.mubr.msk.f32.vlgmr.msra.gmra.mrb[4].mxu1 %vm543_vm1, %v7658_v13 }
 0x175   : > { %5957 = vmatprep.mubr.msk.f32.mxu1 %vm543_vm1, %v7676_v21 }
 0x178   : > { %5958 = vmatmul.mubr.msk.f32.gmra.mrb[6].mxu1 %vm543_vm1, %v7672_v19 }
 0x247   : > { %v5956_v27 = vpop.f32.mrb[4].mxu1 }
 0x248   : > { %v622_v28 = vpop.f32.mrb[5].mxu1  ;;  %v7708_v31 = vmul.f32 0.25, %v5956_v27  ;;  %v402_v27 = vsub.f32 0.0, %v398_v20 }
 0x249   : > { %v7710_v32 = vmul.f32 0.25, %v622_v28  ;;  %v399_v28 = vand.u32 2147483647, %v7821_v22 }
 0x24a   : > { %v646_v42 = vsel %vm7714_vm4, %v7708_v31, -1e+32 }
 0x24b   : > { %v5959_v35 = vpop.f32.mrb[6].mxu1  ;;  %v645_v36 = vsel %vm7701_vm3, %v7710_v32, -1e+32  ;;  %v652_v45 = vsel %vm445_vm0, %v646_v42, -inf }
 0x24c   : > { %v632_v37 = vpop.f32.mrb[7].mxu1  ;;  %v649_v38 = vsel %vm445_vm0, %v645_v36, -inf  ;;  %v7731_v40 = vmul.f32 0.25, %v5959_v35  ;;  %v7824_v35 = vld [vmem:[%s336_s29] sm:$0xff] }
 0x24d   : > { %v7733_v41 = vmul.f32 0.25, %v632_v37  ;;  %650 = vmax.xlane.f32.xlu0 %v649_v38  ;;  %v403_v37 = vsub.f32 0.0, %v399_v28  ;;  %v396_v38 = vand.u32 2147483647, %v7824_v35 }
 0x24e   : > { %v648_v47 = vsel %vm7740_vm6, %v7731_v40, -1e+32 }
 0x24f   : > { %v647_v44 = vsel %vm7727_vm5, %v7733_v41, -1e+32  ;;  %v658_v48 = vsel %vm445_vm0, %v648_v47, -inf }
 0x250   : > { %v655_v46 = vsel %vm445_vm0, %v647_v44, -inf }
 0x251   : > { %653 = vmax.xlane.f32.xlu0 %v652_v45  ;;  %656 = vmax.xlane.f32.xlu1 %v655_v46 }
 0x255   : > { %659 = vmax.xlane.f32.xlu1 %v658_v48 }
 0x2da   : > { %v651_v49 = vpop.xlane.xlu0 %650 }
 0x2db   : > { %v661_v50 = vsub.f32 %v645_v36, %v651_v49  ;;  %v408_v36 = vmul.f32 1.442695, %v402_v27 }
 0x2dd   : > { %v665_v51 = vmul.f32 1.442695, %v661_v50  ;;  %v9133_v50 = vmov 0.0  }
 0x2de   : > { %v654_v52 = vpop.xlane.xlu0 %653  ;;  %v657_v53 = vpop.xlane.xlu1 %656  ;;  %v7856_v20 = vsel %vm7740_vm6, 1.0, %v9133_v50 }
 0x2df   : > { %6852 = vpow2.f32 %v665_v51  ;;  %v662_v54 = vsub.f32 %v646_v42, %v654_v52  ;;  %v663_v55 = vsub.f32 %v647_v44, %v657_v53  ;;  %v410_v42 = vmul.f32 1.442695, %v403_v37 }
 0x2e0   : > { %v400_v44 = vsub.f32 0.0, %v396_v38  ;;  %v7830_v51 = vsel %vm7701_vm3, 1.0, %v9133_v50 }
 0x2e1   : > { %v667_v56 = vmul.f32 1.442695, %v662_v54  ;;  %v669_v57 = vmul.f32 1.442695, %v663_v55 }
 0x2e2   : > { %v660_v58 = vpop.xlane.xlu1 %659  ;;  %v404_v46 = vmul.f32 1.442695, %v400_v44 }
 0x2e3   : > { %6854 = vpow2.f32 %v667_v56  ;;  %v664_v59 = vsub.f32 %v648_v47, %v660_v58  ;;  %v7838_v58 = vsel %vm7714_vm4, 1.0, %v9133_v50 }
 0x2e4   : > { %6856 = vpow2.f32 %v669_v57 }
 0x2e5   : > { %v671_v60 = vmul.f32 1.442695, %v664_v59 }
 0x2e7   : > { %6858 = vpow2.f32 %v671_v60 }
 0x2e8   : > { %6860 = vpow2.f32 %v406_v23 }
 0x2e9   : > { %v7753_v61 = vpop.eup %6852  ;;  %6862 = vpow2.f32 %v408_v36 }
 0x2ea   : > { %v677_v62 = vsel %vm445_vm0, %v7753_v61, 0.0  ;;  %v673_v56 = vmul.f32 %v7753_v61, %v7830_v51 }
 0x2eb   : > { %678 = vadd.xlane.f32.xlu0 %v677_v62 }
 0x2ed   : > { %v7757_v63 = vpop.eup %6854 }
 0x2ee   : > { %v7759_v2 = vpop.eup %6856  ;;  %v680_v4 = vsel %vm445_vm0, %v7757_v63, 0.0  ;;  %v674_v11 = vmul.f32 %v7757_v63, %v7838_v58 }
 0x2ef   : > { %681 = vadd.xlane.f32.xlu1 %v680_v4  ;;  %v683_v5 = vsel %vm445_vm0, %v7759_v2, 0.0 }
 0x2f0   : > { %684 = vadd.xlane.f32.xlu0 %v683_v5  ;;  %v7843_v5 = vsel %vm7727_vm5, 1.0, %v9133_v50 }
 0x2f1   : > { %v7765_v6 = vpop.eup %6858  ;;  %v675_v18 = vmul.f32 %v7759_v2, %v7843_v5 }
 0x2f2   : > { %v686_v7 = vsel %vm445_vm0, %v7765_v6, 0.0  ;;  %v6861_v47 = vpop.eup %6860  ;;  %v676_v2 = vmul.f32 %v7765_v6, %v7856_v20  ;;  %v393_v6 = vmax.f32 %v7815_v12, 0.0 }
 0x2f3   : > { %687 = vadd.xlane.f32.xlu1 %v686_v7  ;;  %v413_v52 = vadd.f32 1.0, %v6861_v47  ;;  %v6863_v53 = vpop.eup %6862 }
 0x2f4   : > { %v414_v59 = vadd.f32 1.0, %v6863_v53 }
 0x304   : > { %1051 = vrot.lane.b32.xlu1 %v7658_v13, %s7391_s24 }
 0x306   : > { %1049 = vrot.lane.b32.xlu0 %v7660_v15, %s7391_s24 }
 0x308   : > { %1053 = vrot.lane.b32.xlu1 %v7676_v21, %s7391_s24 }
 0x30c   : > { %1055 = vrot.lane.b32.xlu1 %v7672_v19, %s7391_s24 }
 0x378   : > { %v679_v45 = vpop.xlane.xlu0 %678 }
 0x379   : > { %6864 = vrcp.f32 %v679_v45 }
 0x37a   : > { %6866 = vpow2.f32 %v410_v42 }
 0x37c   : > { %v682_v48 = vpop.xlane.xlu1 %681 }
 0x37d   : > { %v685_v49 = vpop.xlane.xlu0 %684  ;;  %6868 = vrcp.f32 %v682_v48 }
 0x37e   : > { %6870 = vrcp.f32 %v685_v49 }
 0x37f   : > { %6872 = vpow2.f32 %v404_v46 }
 0x380   : > { %v688_v54 = vpop.xlane.xlu1 %687 }
 0x381   : > { %v1050_v55 = vpop.permute.xlu0 %1049  ;;  %6874 = vrcp.f32 %v688_v54 }
 0x382   : > { %5996 = vmatprep.mubr.msk.f32.mxu1 %vm543_vm1, %v1050_v55  ;;  %6876 = vlog2.f32 %v413_v52 }
 0x383   : > { %v6865_v57 = vpop.eup %6864  ;;  %6878 = vlog2.f32 %v414_v59 }
 0x384   : > { %v6867_v60 = vpop.eup %6866  ;;  %v1052_v62 = vpop.permute.xlu1 %1051  ;;  %v693_v4 = vmul.f32 %v6865_v57, %v673_v56  ;;  %v394_v56 = vmax.f32 %v7818_v17, 0.0  ;;  %v392_v17 = vmax.f32 %v7824_v35, 0.0 }
 0x385   : > { %v6408_v7 = vpack.c.bf16 %v1052_v62, %v1050_v55  ;;  %v415_v23 = vadd.f32 1.0, %v6867_v60 }
 0x386   : > { %5968 = vmatprep.mubr.msk.f32.mxu0 %vm445_vm0, %v693_v4  ;;  %v794_v61 = vsel %vm445_vm0, %v693_v4, 0.0 }
 0x387   : > { %v6869_v14 = vpop.eup %6868  ;;  %795 = vadd.xlane.f32.xlu0 %v794_v61  ;;  %6410 = vmatprep.subr.msk.bf16.mxu1 %vm7664_vm2, %v6408_v7  ;;  %6880 = vlog2.f32 %v415_v23 }
 0x388   : > { %v6871_v27 = vpop.eup %6870  ;;  %6413 = vmatpush3.bf16.xpose.msk.msra.mxu1 %vm7664_vm2, %v6408_v7  ;;  %v1054_v63 = vpop.permute.xlu1 %1053  ;;  %v694_v28 = vmul.f32 %v6869_v14, %v674_v11  ;;  %v395_v7 = vmax.f32 %v7821_v22, 0.0 }
 0x389   : > { %v6873_v36 = vpop.eup %6872  ;;  %v695_v37 = vmul.f32 %v6871_v27, %v675_v18 }
 0x38a   : > { %5969 = vmatmul.mubr.msk.f32.vlgmr.msra.gmra.mrb[0].mxu0 %vm445_vm0, %v694_v28  ;;  %v797_v38 = vsel %vm445_vm0, %v694_v28, 0.0  ;;  %v412_v46 = vadd.f32 1.0, %v6873_v36  ;;  %v7880_v36 = vld [vmem:[%s7632_s17 + $0x8] sm:$0xff] }
 0x38b   : > { %v6875_v42 = vpop.eup %6874  ;;  %798 = vadd.xlane.f32.xlu1 %v797_v38  ;;  %5971 = vmatprep.mubr.msk.f32.mxu0 %vm445_vm0, %v695_v37  ;;  %v800_v54 = vsel %vm445_vm0, %v695_v37, 0.0 }
 0x38c   : > { %v1056_v44 = vpop.permute.xlu1 %1055  ;;  %v696_v45 = vmul.f32 %v6875_v42, %v676_v2  ;;  %v6877_v47 = vpop.eup %6876  ;;  %6882 = vlog2.f32 %v412_v46  ;;  %v7883_v2 = vld [vmem:[%s7632_s17] sm:$0xff]  ;;  %v7888_v46 = vld [vmem:[%s7632_s17 + $0x18] sm:$0xff] }
 0x38d   : > { %v6414_v48 = vpack.c.bf16 %v1056_v44, %v1054_v63  ;;  %v419_v52 = vmul.f32 0.6931472, %v6877_v47  ;;  %v6879_v53 = vpop.eup %6878 }
 0x38e   : > { %5972 = vmatmul.mubr.msk.f32.gmra.mrb[2].mxu0 %vm445_vm0, %v696_v45  ;;  %v803_v49 = vsel %vm445_vm0, %v696_v45, 0.0  ;;  %v421_v57 = vmul.f32 0.6931472, %v6879_v53 }
 0x38f   : > { %804 = vadd.xlane.f32.xlu0 %v803_v49  ;;  %6416 = vmatprep.subr.msk.bf16.mxu1 %vm7664_vm2, %v6414_v48  ;;  %v425_v55 = vadd.f32 %v419_v52, %v393_v6  ;;  %v7891_v52 = vld [vmem:[%s7632_s17 + $0x10] sm:$0xff] }
 0x390   : > { %6419 = vmatpush3.bf16.xpose.msk.msra.mxu1 %vm7664_vm2, %v6414_v48  ;;  %v426_v4 = vadd.f32 %v421_v57, %v394_v56 }
 0x391   : > { %v6881_v59 = vpop.eup %6880  ;;  %v429_v60 = vsub.f32 0.0, %v425_v55 }
 0x392   : > { %v423_v12 = vmul.f32 0.6931472, %v6881_v59  ;;  %v430_v11 = vsub.f32 0.0, %v426_v4 }
 0x393   : > { %801 = vadd.xlane.f32.xlu0 %v800_v54 }
 0x394   : > { %v427_v14 = vadd.f32 %v423_v12, %v395_v7 }
 0x396   : > { %v6883_v61 = vpop.eup %6882 }
 0x397   : > { %5997 = vmatmul.mubr.msk.f32.vlgmr.msra.gmra.mrb[8].mxu1 %vm543_vm1, %v1052_v62  ;;  %v417_v18 = vmul.f32 0.6931472, %v6883_v61  ;;  %v431_v62 = vsub.f32 0.0, %v427_v14 }
 0x398   : > { %5999 = vmatprep.mubr.msk.f32.mxu1 %vm543_vm1, %v1054_v63 }
 0x399   : > { %v424_v23 = vadd.f32 %v417_v18, %v392_v17 }
 0x39b   : > { %6000 = vmatmul.mubr.msk.f32.gmra.mrb[10].mxu1 %vm543_vm1, %v1056_v44  ;;  %v428_v27 = vsub.f32 0.0, %v424_v23 }
 0x39c   : > { %853 = vperm.xlu1 %6731, %v429_v60  }
 0x3a0   : > { %858 = vperm.xlu1 %6731, %v430_v11  }
 0x3a4   : > { %863 = vperm.xlu1 %6731, %v431_v62  }
 0x3a9   : > { %848 = vperm.xlu0 %6730, %v428_v27  }
 0x414   : > { %v796_v22 = vpop.xlane.xlu0 %795 }
 0x418   : > { %v799_v28 = vpop.xlane.xlu1 %798 }
 0x41c   : > { %v805_v63 = vpop.xlane.xlu0 %804  ;;  %v7895_v4 = vpop.permute.xlu1 %853 }
 0x420   : > { %v802_v48 = vpop.xlane.xlu0 %801  ;;  %v7903_v62 = vpop.permute.xlu1 %858 }
 0x45d   : > { %v5970_v37 = vpop.f32.mrb[0].mxu0 }
 0x45e   : > { %v807_v38 = vsub.f32 %v799_v28, %v5970_v37  ;;  %v775_v42 = vpop.f32.mrb[1].mxu0 }
 0x45f   : > { %v806_v35 = vsub.f32 %v796_v22, %v775_v42  ;;  %v7905_v22 = vpop.permute.xlu0 %848 }
 0x460   : > { %v811_v44 = vmul.f32 %v807_v38, %v7880_v36 }
 0x461   : > { %v810_v45 = vmul.f32 %v806_v35, %v7883_v2  ;;  %v5973_v47 = vpop.f32.mrb[2].mxu0 }
 0x462   : > { %v815_v49 = vmax.f32 %v811_v44, 0.0  ;;  %v809_v6 = vsub.f32 %v805_v63, %v5973_v47  ;;  %v785_v53 = vpop.f32.mrb[3].mxu0 }
 0x463   : > { %v814_v54 = vmax.f32 %v810_v45, 0.0  ;;  %v808_v55 = vsub.f32 %v802_v48, %v785_v53 }
 0x464   : > { %6884 = vrsqrt.f32 %v815_v49  ;;  %v813_v56 = vmul.f32 %v809_v6, %v7888_v46  ;;  %vm827_vm13 = vcmp.eq.f32.partialorder %v815_v49, inf  ;;  %v830_v23 = vand.u32 2147483648, %v815_v49 }
 0x465   : > { %6886 = vrsqrt.f32 %v814_v54  ;;  %v812_v57 = vmul.f32 %v808_v55, %v7891_v52  ;;  %vm829_vm14 = vcmp.eq.f32.partialorder %v815_v49, 0.0  ;;  %vm820_vm15 = vcmp.eq.f32.partialorder %v814_v54, inf }
 0x466   : > { %v817_v59 = vmax.f32 %v813_v56, 0.0  ;;  %v823_v28 = vand.u32 2147483648, %v814_v54  ;;  %vm822_vm7 = vcmp.eq.f32.partialorder %v814_v54, 0.0 }
 0x467   : > { %v816_v60 = vmax.f32 %v812_v57, 0.0  ;;  %v7909_v57 = vpop.permute.xlu1 %863 }
 0x468   : > { %6888 = vrsqrt.f32 %v817_v59  ;;  %vm841_vm8 = vcmp.eq.f32.partialorder %v817_v59, inf  ;;  %vm843_vm9 = vcmp.eq.f32.partialorder %v817_v59, 0.0  ;;  %v844_v6 = vand.u32 2147483648, %v817_v59 }
 0x469   : > { %6890 = vrsqrt.f32 %v816_v60  ;;  %vm834_vm10 = vcmp.eq.f32.partialorder %v816_v60, inf }
 0x46a   : > { %v7897_v7 = vpop.f32.mrb[8].mxu1 }
 0x46b   : > { %v7899_v12 = vpop.f32.mrb[9].mxu1 }
 0x46e   : > { %v6885_v61 = vpop.eup %6884  ;;  %v7901_v11 = vpop.f32.mrb[10].mxu1 }
 0x46f   : > { %v6887_v14 = vpop.eup %6886  ;;  %v1141_v17 = vpop.f32.mrb[11].mxu1  ;;  %v826_v18 = vmul.f32 %v6885_v61, %v815_v49 }
 0x470   : > { %v819_v27 = vmul.f32 %v6887_v14, %v814_v54 }
 0x471   : > { %v828_v63 = vsel %vm827_vm13, %v815_v49, %v826_v18  ;;  %v837_v49 = vand.u32 2147483648, %v816_v60  ;;  %vm836_vm13 = vcmp.eq.f32.partialorder %v816_v60, 0.0 }
 0x472   : > { %v6889_v37 = vpop.eup %6888  ;;  %v831_v38 = vsel %vm829_vm14, %v830_v23, %v828_v63  ;;  %v821_v42 = vsel %vm820_vm15, %v814_v54, %v819_v27 }
 0x473   : > { %v6891_v35 = vpop.eup %6890  ;;  %v867_v44 = vmul.f32 %v7895_v4, %v831_v38  ;;  %v824_v45 = vsel %vm822_vm7, %v823_v28, %v821_v42  ;;  %v840_v47 = vmul.f32 %v6889_v37, %v817_v59 }
 0x474   : > { %v866_v48 = vmul.f32 %v7905_v22, %v824_v45  ;;  %v833_v53 = vmul.f32 %v6891_v35, %v816_v60 }
 0x475   : > { %v872_v55 = vmul.f32 1.442695, %v867_v44  ;;  %v842_v56 = vsel %vm841_vm8, %v817_v59, %v840_v47 }
 0x476   : > { %v870_v61 = vmul.f32 1.442695, %v866_v48  ;;  %v845_v14 = vsel %vm843_vm9, %v844_v6, %v842_v56  ;;  %v835_v54 = vsel %vm834_vm10, %v816_v60, %v833_v53  ;;  %v7913_v60 = vmul.f32 0.25, %v1141_v17 }
 0x477   : > { %6892 = vpow2.f32 %v872_v55  ;;  %v869_v18 = vmul.f32 %v7909_v57, %v845_v14  ;;  %v838_v23 = vsel %vm836_vm13, %v837_v49, %v835_v54 }
 0x478   : > { %6894 = vpow2.f32 %v870_v61  ;;  %v868_v27 = vmul.f32 %v7903_v62, %v838_v23 }
 0x479   : > { %v876_v63 = vmul.f32 1.442695, %v869_v18 }
 0x47a   : > { %v874_v28 = vmul.f32 1.442695, %v868_v27 }
 0x47b   : > { %6896 = vpow2.f32 %v876_v63 }
 0x47c   : > { %6898 = vpow2.f32 %v874_v28  ;;  %v7933_v28 = vmul.f32 0.25, %v7899_v12 }
 0x481   : > { %v6893_v59 = vpop.eup %6892 }
 0x482   : > { %v6895_v37 = vpop.eup %6894  ;;  %v879_v38 = vmax.f32 %v6893_v59, 1e-05 }
 0x483   : > { %v878_v42 = vmax.f32 %v6895_v37, 1e-05  ;;  %v7939_v37 = vmul.f32 0.25, %v7897_v7 }
 0x484   : > { %v883_v35 = vmin.f32 %v879_v38, 100000.0 }
 0x485   : > { %v6897_v44 = vpop.eup %6896  ;;  %v882_v45 = vmin.f32 %v878_v42, 100000.0  ;;  %v7946_v42 = vmul.f32 0.25, %v7901_v11  ;;  %v1155_v12 = vsel %vm7714_vm4, %v7939_v37, -1e+32 }
 0x486   : > { %v6899_v47 = vpop.eup %6898  ;;  %v887_v48 = vmul.f32 %v883_v35, %v7708_v31  ;;  %v881_v6 = vmax.f32 %v6897_v44, 1e-05  ;;  %v1156_v31 = vsel %vm7727_vm5, %v7913_v60, -1e+32  ;;  %v1161_v35 = vsel %vm445_vm0, %v1155_v12, -inf }
 0x487   : > { %v886_v53 = vmul.f32 %v882_v45, %v7710_v32  ;;  %v880_v55 = vmax.f32 %v6899_v47, 1e-05  ;;  %v1164_v27 = vsel %vm445_vm0, %v1156_v31, -inf  ;;  %v1157_v7 = vsel %vm7740_vm6, %v7946_v42, -1e+32 }
 0x488   : > { %v891_v56 = vsel %vm7714_vm4, %v887_v48, -1e+32  ;;  %v885_v49 = vmin.f32 %v881_v6, 100000.0  ;;  %v1167_v44 = vsel %vm445_vm0, %v1157_v7, -inf }
 0x489   : > { %v897_v61 = vsel %vm445_vm0, %v891_v56, -inf  ;;  %v890_v14 = vsel %vm7701_vm3, %v886_v53, -1e+32  ;;  %v884_v54 = vmin.f32 %v880_v55, 100000.0 }
 0x48a   : > { %898 = vmax.xlane.f32.xlu0 %v897_v61  ;;  %v894_v17 = vsel %vm445_vm0, %v890_v14, -inf  ;;  %v889_v32 = vmul.f32 %v885_v49, %v7731_v40 }
 0x48b   : > { %895 = vmax.xlane.f32.xlu1 %v894_v17  ;;  %v888_v18 = vmul.f32 %v884_v54, %v7733_v41  ;;  %v1154_v41 = vsel %vm7701_vm3, %v7933_v28, -1e+32 }
 0x48c   : > { %v893_v23 = vsel %vm7740_vm6, %v889_v32, -1e+32  ;;  %v1158_v38 = vsel %vm445_vm0, %v1154_v41, -inf }
 0x48d   : > { %v903_v63 = vsel %vm445_vm0, %v893_v23, -inf  ;;  %v892_v59 = vsel %vm7727_vm5, %v888_v18, -1e+32 }
 0x48e   : > { %1165 = vmax.xlane.f32.xlu0 %v1164_v27  ;;  %v900_v40 = vsel %vm445_vm0, %v892_v59, -inf }
 0x48f   : > { %904 = vmax.xlane.f32.xlu1 %v903_v63 }
 0x493   : > { %901 = vmax.xlane.f32.xlu1 %v900_v40 }
 0x497   : > { %1159 = vmax.xlane.f32.xlu1 %v1158_v38 }
 0x49b   : > { %1162 = vmax.xlane.f32.xlu1 %v1161_v35 }
 0x49f   : > { %1168 = vmax.xlane.f32.xlu1 %v1167_v44 }
 0x517   : > { %v899_v47 = vpop.xlane.xlu0 %898 }
 0x518   : > { %v896_v45 = vpop.xlane.xlu1 %895  ;;  %v907_v27 = vsub.f32 %v891_v56, %v899_v47 }
 0x519   : > { %v906_v61 = vsub.f32 %v890_v14, %v896_v45 }
 0x51a   : > { %v912_v50 = vmul.f32 1.442695, %v907_v27 }
 0x51b   : > { %v1166_v11 = vpop.xlane.xlu0 %1165  ;;  %v910_v63 = vmul.f32 1.442695, %v906_v61 }
 0x51c   : > { %v905_v48 = vpop.xlane.xlu1 %904  ;;  %v1172_v53 = vsub.f32 %v1156_v31, %v1166_v11 }
 0x51d   : > { %v909_v3 = vsub.f32 %v893_v23, %v905_v48 }
 0x51e   : > { %v1178_v54 = vmul.f32 1.442695, %v1172_v53 }
 0x520   : > { %v902_v6 = vpop.xlane.xlu1 %901 }
 0x521   : > { %v908_v40 = vsub.f32 %v892_v59, %v902_v6 }
 0x523   : > { %v914_v31 = vmul.f32 1.442695, %v908_v40 }
 0x524   : > { %v1160_v55 = vpop.xlane.xlu1 %1159 }
 0x525   : > { %v1170_v49 = vsub.f32 %v1154_v41, %v1160_v55  ;;  %v916_v41 = vmul.f32 1.442695, %v909_v3 }
 0x527   : > { %v1174_v17 = vmul.f32 1.442695, %v1170_v49 }
 0x528   : > { %v1163_v32 = vpop.xlane.xlu1 %1162 }
 0x529   : > { %6900 = vpow2.f32 %v1174_v17  ;;  %v1171_v18 = vsub.f32 %v1155_v12, %v1163_v32  ;;  %v7979_v17 = vpack.i.bf16 %v7658_v13, %v7660_v15 }
 0x52a   : > { %6902 = vpow2.f32 %v1178_v54  ;;  %v7975_v54 = vpack.i.bf16 %v7672_v19, %v7676_v21 }
 0x52b   : > { %v1176_v38 = vmul.f32 1.442695, %v1171_v18 }
 0x52c   : > { %v1169_v35 = vpop.xlane.xlu1 %1168 }
 0x52d   : > { %6904 = vpow2.f32 %v1176_v38  ;;  %v1173_v44 = vsub.f32 %v1157_v7, %v1169_v35 }
 0x52e   : > { %6906 = vpow2.f32 %v910_v63 }
 0x52f   : > { %v1180_v11 = vmul.f32 1.442695, %v1173_v44 }
 0x531   : > { %6908 = vpow2.f32 %v1180_v11 }
 0x532   : > { %6910 = vpow2.f32 %v912_v50 }
 0x533   : > { %v6901_v14 = vpop.eup %6900  ;;  %6912 = vpow2.f32 %v914_v31 }
 0x534   : > { %v1186_v12 = vsel %vm445_vm0, %v6901_v14, 0.0  ;;  %v6903_v56 = vpop.eup %6902  ;;  %6914 = vpow2.f32 %v916_v41  ;;  %v1182_v13 = vmul.f32 %v6901_v14, %v7830_v51 }
 0x535   : > { %1187 = vadd.xlane.f32.xlu0 %v1186_v12  ;;  %v1192_v59 = vsel %vm445_vm0, %v6903_v56, 0.0  ;;  %v1184_v14 = vmul.f32 %v6903_v56, %v7843_v5 }
 0x537   : > { %v6905_v45 = vpop.eup %6904 }
 0x538   : > { %v1189_v7 = vsel %vm445_vm0, %v6905_v45, 0.0  ;;  %v6907_v47 = vpop.eup %6906  ;;  %v1183_v31 = vmul.f32 %v6905_v45, %v7838_v58 }
 0x539   : > { %1193 = vadd.xlane.f32.xlu0 %v1192_v59  ;;  %1190 = vadd.xlane.f32.xlu1 %v1189_v7  ;;  %v918_v50 = vsel %vm445_vm0, %v6907_v47, 0.0 }
 0x53b   : > { %v6909_v23 = vpop.eup %6908 }
 0x53c   : > { %v7959_v48 = vpop.eup %6910  ;;  %v1195_v3 = vsel %vm445_vm0, %v6909_v23, 0.0 }
 0x53d   : > { %v7963_v6 = vpop.eup %6912  ;;  %919 = vadd.xlane.f32.xlu0 %v918_v50  ;;  %1196 = vadd.xlane.f32.xlu1 %v1195_v3  ;;  %v921_v55 = vsel %vm445_vm0, %v7959_v48, 0.0 }
 0x53e   : > { %v924_v53 = vsel %vm445_vm0, %v7963_v6, 0.0  ;;  %v7969_v49 = vpop.eup %6914 }
 0x53f   : > { %v927_v61 = vsel %vm445_vm0, %v7969_v49, 0.0 }
 0x541   : > { %925 = vadd.xlane.f32.xlu0 %v924_v53  ;;  %922 = vadd.xlane.f32.xlu1 %v921_v55 }
 0x545   : > { %928 = vadd.xlane.f32.xlu1 %v927_v61 }
 0x556   : > { %6738 = vrot.lane.b32.xlu1 %v7975_v54, %s7394_s16 }
 0x557   : > { %6733 = vrot.lane.b32.xlu0 %v7979_v17, %s7394_s16 }
 0x5c2   : > { %v1188_v32 = vpop.xlane.xlu0 %1187 }
 0x5c3   : > { %6916 = vrcp.f32 %v1188_v32  ;;  %v1185_v32 = vmul.f32 %v6909_v23, %v7856_v20 }
 0x5c6   : > { %v1194_v18 = vpop.xlane.xlu0 %1193  ;;  %v1191_v27 = vpop.xlane.xlu1 %1190 }
 0x5c7   : > { %6918 = vrcp.f32 %v1194_v18 }
 0x5c8   : > { %6920 = vrcp.f32 %v1191_v27 }
 0x5ca   : > { %v920_v63 = vpop.xlane.xlu0 %919  ;;  %v1197_v19 = vpop.xlane.xlu1 %1196 }
 0x5cb   : > { %6922 = vrcp.f32 %v920_v63 }
 0x5cc   : > { %6924 = vrcp.f32 %v1197_v19 }
 0x5cd   : > { %v6917_v15 = vpop.eup %6916 }
 0x5ce   : > { %v926_v21 = vpop.xlane.xlu0 %925  ;;  %v923_v40 = vpop.xlane.xlu1 %922  ;;  %v1202_v38 = vmul.f32 %v6917_v15, %v1182_v13 }
 0x5cf   : > { %6926 = vrcp.f32 %v923_v40 }
 0x5d0   : > { %v1303_v35 = vsel %vm445_vm0, %v1202_v38, 0.0  ;;  %6928 = vrcp.f32 %v926_v21 }
 0x5d1   : > { %v6919_v44 = vpop.eup %6918  ;;  %1304 = vadd.xlane.f32.xlu1 %v1303_v35 }
 0x5d2   : > { %v6921_v11 = vpop.eup %6920  ;;  %v6734_v41 = vpop.permute.xlu0 %6733  ;;  %v1204_v61 = vmul.f32 %v6919_v44, %v1184_v14 }
 0x5d3   : > { %v929_v12 = vpop.xlane.xlu1 %928  ;;  %v6736_v59 = vunpack.i.h.bf16 %v6734_v41  ;;  %v6735_v7 = vunpack.i.l.bf16 %v6734_v41  ;;  %v1203_v50 = vmul.f32 %v6921_v11, %v1183_v31 }
 0x5d4   : > { %6930 = vrcp.f32 %v929_v12  ;;  %v1309_v56 = vsel %vm445_vm0, %v1204_v61, 0.0 }
 0x5d5   : > { %v6923_v3 = vpop.eup %6922  ;;  %v1306_v53 = vsel %vm445_vm0, %v1203_v50, 0.0  ;;  %v6400_v55 = vpack.c.bf16 %v6736_v59, %v6735_v7 }
 0x5d6   : > { %v6925_v18 = vpop.eup %6924  ;;  %1307 = vadd.xlane.f32.xlu0 %v1306_v53  ;;  %v934_v45 = vmul.f32 %v6923_v3, %v6907_v47 }
 0x5d7   : > { %v6739_v27 = vpop.permute.xlu1 %6738  ;;  %6401 = vmatprep.subr.bf16.mxu0 %v6400_v55  ;;  %v1205_v13 = vmul.f32 %v6925_v18, %v1185_v32 }
 0x5d8   : > { %v6741_v63 = vunpack.i.h.bf16 %v6739_v27  ;;  %v6740_v19 = vunpack.i.l.bf16 %v6739_v27  ;;  %6403 = vmatpush3.bf16.msra.mxu0 %v6400_v55  ;;  %5982 = vmatprep.mubr.msk.f32.mxu0 %vm445_vm0, %v934_v45 }
 0x5d9   : > { %v1312_v15 = vsel %vm445_vm0, %v1205_v13, 0.0  ;;  %v6927_v40 = vpop.eup %6926 }
 0x5da   : > { %v6404_v21 = vpack.c.bf16 %v6741_v63, %v6740_v19  ;;  %1310 = vadd.xlane.f32.xlu0 %v1309_v56  ;;  %1313 = vadd.xlane.f32.xlu1 %v1312_v15  ;;  %v6929_v23 = vpop.eup %6928  ;;  %v935_v47 = vmul.f32 %v6927_v40, %v7959_v48 }
 0x5db   : > { %v936_v44 = vmul.f32 %v6929_v23, %v7963_v6 }
 0x5dc   : > { %6405 = vmatprep.subr.bf16.mxu0 %v6404_v21 }
 0x5dd   : > { %6407 = vmatpush3.bf16.msra.mxu0 %v6404_v21 }
 0x5de   : > { %6421 = vmatprep.subr.msk.bf16.mxu0 %vm7777_vm11, %v9135_v10  ;;  %v6931_v35 = vpop.eup %6930 }
 0x5df   : > { %v937_v31 = vmul.f32 %v6931_v35, %v7969_v49 }
 0x5e0   : > { %5983 = vmatmul.mubr.msk.f32.vlgmr.msra.gmra.mrb[4].mxu0 %vm445_vm0, %v935_v47 }
 0x5e1   : > { %5985 = vmatprep.mubr.msk.f32.mxu0 %vm445_vm0, %v936_v44  ;;  %6423 = vmatpush3.bf16.msk.msra.mxu0 %vm7777_vm11, %v9135_v10 }
 0x5e2   : > { %6425 = vmatprep.subr.msk.bf16.mxu0 %vm7781_vm12, %v9135_v10 }
 0x5e4   : > { %5986 = vmatmul.mubr.msk.f32.gmra.mrb[6].mxu0 %vm445_vm0, %v937_v31 }
 0x5e5   : > { %6427 = vmatpush3.bf16.msk.msra.mxu0 %vm7781_vm12, %v9135_v10  ;;  %6010 = vmatprep.mubr.msk.f32.mxu0 %vm445_vm0, %v1202_v38 }
 0x5e8   : > { %6011 = vmatmul.mubr.msk.f32.vlgmr.msra.gmra.mrb[8].mxu0 %vm445_vm0, %v1203_v50 }
 0x5e9   : > { %6013 = vmatprep.mubr.msk.f32.mxu0 %vm445_vm0, %v1204_v61 }
 0x5ec   : > { %6014 = vmatmul.mubr.msk.f32.gmra.mrb[10].mxu0 %vm445_vm0, %v1205_v13 }
 0x65e   : > { %v1305_v12 = vpop.xlane.xlu1 %1304 }
 0x663   : > { %v1308_v41 = vpop.xlane.xlu0 %1307 }
 0x667   : > { %v1314_v3 = vpop.xlane.xlu1 %1313  ;;  %v1311_v61 = vpop.xlane.xlu0 %1310 }
 0x6b3   : > { %v8016_v48 = vpop.f32.mrb[4].mxu0 }
 0x6b4   : > { %v8018_v6 = vpop.f32.mrb[5].mxu0 }
 0x6b7   : > { %v8020_v49 = vpop.f32.mrb[6].mxu0 }
 0x6b8   : > { %v8022_v11 = vpop.f32.mrb[7].mxu0 }
 0x6bb   : > { %v6012_v59 = vpop.f32.mrb[8].mxu0 }
 0x6bc   : > { %v1316_v7 = vsub.f32 %v1308_v41, %v6012_v59  ;;  %v1284_v14 = vpop.f32.mrb[9].mxu0 }
 0x6bd   : > { %v1315_v38 = vsub.f32 %v1305_v12, %v1284_v14 }
 0x6be   : > { %v1320_v50 = vmul.f32 %v1316_v7, %v7880_v36 }
 0x6bf   : > { %v1319_v53 = vmul.f32 %v1315_v38, %v7883_v2  ;;  %v6015_v55 = vpop.f32.mrb[10].mxu0 }
 0x6c0   : > { %v1324_v32 = vmax.f32 %v1320_v50, 0.0  ;;  %v1318_v18 = vsub.f32 %v1314_v3, %v6015_v55  ;;  %v1294_v27 = vpop.f32.mrb[11].mxu0 }
 0x6c1   : > { %v1323_v45 = vmax.f32 %v1319_v53, 0.0  ;;  %v1317_v63 = vsub.f32 %v1311_v61, %v1294_v27 }
 0x6c2   : > { %6932 = vrsqrt.f32 %v1324_v32  ;;  %v1322_v19 = vmul.f32 %v1318_v18, %v7888_v46  ;;  %vm1336_vm14 = vcmp.eq.f32.partialorder %v1324_v32, inf  ;;  %v1339_v40 = vand.u32 2147483648, %v1324_v32 }
 0x6c3   : > { %6934 = vrsqrt.f32 %v1323_v45  ;;  %v1321_v13 = vmul.f32 %v1317_v63, %v7891_v52  ;;  %vm1338_vm15 = vcmp.eq.f32.partialorder %v1324_v32, 0.0  ;;  %vm1329_vm7 = vcmp.eq.f32.partialorder %v1323_v45, inf }
 0x6c4   : > { %v1326_v56 = vmax.f32 %v1322_v19, 0.0  ;;  %v1332_v35 = vand.u32 2147483648, %v1323_v45  ;;  %vm1331_vm8 = vcmp.eq.f32.partialorder %v1323_v45, 0.0 }
 0x6c5   : > { %v1325_v15 = vmax.f32 %v1321_v13, 0.0 }
 0x6c6   : > { %6936 = vrsqrt.f32 %v1326_v56  ;;  %vm1350_vm9 = vcmp.eq.f32.partialorder %v1326_v56, inf  ;;  %vm1352_vm10 = vcmp.eq.f32.partialorder %v1326_v56, 0.0  ;;  %v1353_v14 = vand.u32 2147483648, %v1326_v56 }
 0x6c7   : > { %6938 = vrsqrt.f32 %v1325_v15  ;;  %vm1343_vm13 = vcmp.eq.f32.partialorder %v1325_v15, inf  ;;  %v1346_v53 = vand.u32 2147483648, %v1325_v15 }
 0x6cc   : > { %v6933_v36 = vpop.eup %6932 }
 0x6cd   : > { %v6935_v21 = vpop.eup %6934  ;;  %v1335_v2 = vmul.f32 %v6933_v36, %v1324_v32 }
 0x6ce   : > { %v1328_v23 = vmul.f32 %v6935_v21, %v1323_v45 }
 0x6cf   : > { %v1337_v47 = vsel %vm1336_vm14, %v1324_v32, %v1335_v2  ;;  %vm1345_vm14 = vcmp.eq.f32.partialorder %v1325_v15, 0.0 }
 0x6d0   : > { %v6937_v44 = vpop.eup %6936  ;;  %v1340_v31 = vsel %vm1338_vm15, %v1339_v40, %v1337_v47  ;;  %v1330_v46 = vsel %vm1329_vm7, %v1323_v45, %v1328_v23  ;;  %vm1977_vm15 = vcmask 523264  }
 0x6d1   : > { %v6939_v41 = vpop.eup %6938  ;;  %v1356_v52 = vmul.f32 %v1340_v31, %v7895_v4  ;;  %v1333_v12 = vsel %vm1331_vm8, %v1332_v35, %v1330_v46  ;;  %v1349_v59 = vmul.f32 %v6937_v44, %v1326_v56 }
 0x6d2   : > { %v1355_v7 = vmul.f32 %v1333_v12, %v7905_v22  ;;  %v1342_v38 = vmul.f32 %v6939_v41, %v1325_v15 }
 0x6d3   : > { %v1361_v50 = vmul.f32 1.442695, %v1356_v52  ;;  %v1351_v3 = vsel %vm1350_vm9, %v1326_v56, %v1349_v59 }
 0x6d4   : > { %v1359_v55 = vmul.f32 1.442695, %v1355_v7  ;;  %v1354_v61 = vsel %vm1352_vm10, %v1353_v14, %v1351_v3  ;;  %v1344_v32 = vsel %vm1343_vm13, %v1325_v15, %v1342_v38 }
 0x6d5   : > { %6940 = vpow2.f32 %v1361_v50  ;;  %v1358_v18 = vmul.f32 %v1354_v61, %v7909_v57  ;;  %v1347_v27 = vsel %vm1345_vm14, %v1346_v53, %v1344_v32 }
 0x6d6   : > { %6942 = vpow2.f32 %v1359_v55  ;;  %v1357_v45 = vmul.f32 %v1347_v27, %v7903_v62 }
 0x6d7   : > { %v1365_v63 = vmul.f32 1.442695, %v1358_v18 }
 0x6d8   : > { %v1363_v19 = vmul.f32 1.442695, %v1357_v45 }
 0x6d9   : > { %6944 = vpow2.f32 %v1365_v63 }
 0x6da   : > { %6946 = vpow2.f32 %v1363_v19 }
 0x6df   : > { %v6941_v13 = vpop.eup %6940 }
 0x6e0   : > { %v6943_v36 = vpop.eup %6942  ;;  %v1368_v56 = vmax.f32 %v6941_v13, 1e-05 }
 0x6e1   : > { %v1367_v21 = vmax.f32 %v6943_v36, 1e-05 }
 0x6e2   : > { %v1372_v2 = vmin.f32 %v1368_v56, 100000.0 }
 0x6e3   : > { %v6945_v40 = vpop.eup %6944  ;;  %v1371_v23 = vmin.f32 %v1367_v21, 100000.0 }
 0x6e4   : > { %v6947_v47 = vpop.eup %6946  ;;  %v1376_v15 = vmul.f32 %v1372_v2, %v7939_v37  ;;  %v1370_v35 = vmax.f32 %v6945_v40, 1e-05 }
 0x6e5   : > { %v1375_v44 = vmul.f32 %v1371_v23, %v7933_v28  ;;  %v1369_v31 = vmax.f32 %v6947_v47, 1e-05 }
 0x6e6   : > { %v1380_v46 = vsel %vm7714_vm4, %v1376_v15, -1e+32  ;;  %v1374_v41 = vmin.f32 %v1370_v35, 100000.0  ;;  %v8056_v35 = vld [vmem:[#allocation7 + $0x30] sm:$0xff] }
 0x6e7   : > { %v1386_v52 = vsel %vm445_vm0, %v1380_v46, -inf  ;;  %v1379_v12 = vsel %vm7701_vm3, %v1375_v44, -1e+32  ;;  %v1373_v59 = vmin.f32 %v1369_v31, 100000.0  ;;  %v8058_v44 = vld [vmem:[#allocation7 + $0x38] sm:$0xff] }
 0x6e8   : > { %1387 = vmax.xlane.f32.xlu1 %v1386_v52  ;;  %v1383_v7 = vsel %vm445_vm0, %v1379_v12, -inf  ;;  %v1378_v14 = vmul.f32 %v1374_v41, %v7946_v42  ;;  %v6436_v31 = vpack.c.bf16 %v8058_v44, %v8056_v35 }
 0x6e9   : > { %1384 = vmax.xlane.f32.xlu0 %v1383_v7  ;;  %v1377_v37 = vmul.f32 %v1373_v59, %v7913_v60 }
 0x6ea   : > { %v1382_v28 = vsel %vm7740_vm6, %v1378_v14, -1e+32  ;;  %6437 = vmatprep.subr.bf16.mxu1 %v6436_v31 }
 0x6eb   : > { %v1392_v38 = vsel %vm445_vm0, %v1382_v28, -inf  ;;  %v1381_v50 = vsel %vm7727_vm5, %v1377_v37, -1e+32  ;;  %6439 = vmatpush3.bf16.msra.mxu1 %v6436_v31  ;;  %v2150_v31 = vld [vmem:[%s8083_s28 + $0x10] sm:$0xff] }
 0x6ec   : > { %1393 = vmax.xlane.f32.xlu1 %v1392_v38  ;;  %v1389_v3 = vsel %vm445_vm0, %v1381_v50, -inf }
 0x6ed   : > { %1390 = vmax.xlane.f32.xlu0 %v1389_v3 }
 0x775   : > { %v1388_v53 = vpop.xlane.xlu1 %1387 }
 0x776   : > { %v1396_v55 = vsub.f32 %v1380_v46, %v1388_v53  ;;  %v1385_v61 = vpop.xlane.xlu0 %1384 }
 0x777   : > { %v1395_v32 = vsub.f32 %v1379_v12, %v1385_v61 }
 0x778   : > { %v1401_v42 = vmul.f32 1.442695, %v1396_v55 }
 0x779   : > { %v1399_v18 = vmul.f32 1.442695, %v1395_v32  ;;  %v1394_v27 = vpop.xlane.xlu1 %1393 }
 0x77a   : > { %6948 = vpow2.f32 %v1401_v42  ;;  %v1398_v60 = vsub.f32 %v1382_v28, %v1394_v27  ;;  %v1391_v45 = vpop.xlane.xlu0 %1390  ;;  %v8066_v27 = vld [vmem:[#allocation7 + $0x20] sm:$0xff] }
 0x77b   : > { %6950 = vpow2.f32 %v1399_v18  ;;  %v1397_v63 = vsub.f32 %v1381_v50, %v1391_v45 }
 0x77c   : > { %v1405_v19 = vmul.f32 1.442695, %v1398_v60  ;;  %v8068_v60 = vld [vmem:[#allocation7 + $0x28] sm:$0xff] }
 0x77d   : > { %v1403_v13 = vmul.f32 1.442695, %v1397_v63  ;;  %v6440_v45 = vpack.c.bf16 %v8068_v60, %v8066_v27  ;;  %v2153_v63 = vld [vmem:[#allocation7 + $0x68] sm:$0xff] }
 0x77e   : > { %6952 = vpow2.f32 %v1405_v19  ;;  %v2154_v19 = vld [vmem:[#allocation7 + $0x70] sm:$0xff] }
 0x77f   : > { %6954 = vpow2.f32 %v1403_v13  ;;  %6441 = vmatprep.subr.bf16.mxu1 %v6440_v45 }
 0x784   : > { %v6949_v36 = vpop.eup %6948 }
 0x785   : > { %v6951_v56 = vpop.eup %6950  ;;  %v1410_v21 = vsel %vm445_vm0, %v6949_v36, 0.0 }
 0x786   : > { %1411 = vadd.xlane.f32.xlu1 %v1410_v21  ;;  %v1407_v2 = vsel %vm445_vm0, %v6951_v56, 0.0 }
 0x787   : > { %1408 = vadd.xlane.f32.xlu0 %v1407_v2 }
 0x788   : > { %v6953_v40 = vpop.eup %6952 }
 0x789   : > { %v6955_v23 = vpop.eup %6954  ;;  %v1416_v47 = vsel %vm445_vm0, %v6953_v40, 0.0 }
 0x78a   : > { %1417 = vadd.xlane.f32.xlu1 %v1416_v47  ;;  %v1413_v15 = vsel %vm445_vm0, %v6955_v23, 0.0 }
 0x78b   : > { %1414 = vadd.xlane.f32.xlu0 %v1413_v15  ;;  %v2149_v15 = vld [vmem:[%s8083_s28 + $0x8] sm:$0xff] }
 0x79b   : > { %6748 = vrot.lane.b32.xlu1 %v7975_v54, %s7395_s10 }
 0x7a1   : > { %6743 = vrot.lane.b32.xlu0 %v7979_v17, %s7395_s10 }
 0x813   : > { %v1412_v46 = vpop.xlane.xlu1 %1411 }
 0x814   : > { %v1409_v41 = vpop.xlane.xlu0 %1408 }
 0x815   : > { %6956 = vrcp.f32 %v1409_v41 }
 0x816   : > { %6958 = vrcp.f32 %v1412_v46 }
 0x817   : > { %v1418_v52 = vpop.xlane.xlu1 %1417 }
 0x818   : > { %v1415_v12 = vpop.xlane.xlu0 %1414 }
 0x819   : > { %6960 = vrcp.f32 %v1415_v12  ;;  %v7196_v12 = vld [vmem:[%s7624_s15 + $0x8] sm:$0xff] }
 0x81a   : > { %6962 = vrcp.f32 %v1418_v52 }
 0x81b   : > { %v6749_v54 = vpop.permute.xlu1 %6748 }
 0x81c   : > { %v6744_v59 = vpop.permute.xlu0 %6743  ;;  %v6751_v7 = vunpack.i.h.bf16 %v6749_v54  ;;  %v6750_v17 = vunpack.i.l.bf16 %v6749_v54 }
 0x81d   : > { %v6746_v14 = vunpack.i.h.bf16 %v6744_v59  ;;  %v6745_v37 = vunpack.i.l.bf16 %v6744_v59 }
 0x81e   : > { %v6432_v3 = vpack.c.bf16 %v6751_v7, %v6750_v17  ;;  %v7197_v7 = vld [vmem:[%s7624_s15] sm:$0xff] }
 0x81f   : > { %v6957_v28 = vpop.eup %6956  ;;  %v6428_v38 = vpack.c.bf16 %v6746_v14, %v6745_v37 }
 0x820   : > { %v1423_v50 = vmul.f32 %v6957_v28, %v6951_v56  ;;  %v6959_v53 = vpop.eup %6958  ;;  %v6468_v56 = vpack.c.bf16 %v2154_v19, %v2153_v63 }
 0x821   : > { %6429 = vmatprep.subr.bf16.mxu0 %v6428_v38  ;;  %v1424_v61 = vmul.f32 %v6959_v53, %v6949_v36  ;;  %v7198_v53 = vld [vmem:[%s7624_s15 + $0x18] sm:$0xff] }
 0x822   : > { %6431 = vmatpush3.bf16.msra.mxu0 %v6428_v38  ;;  %6024 = vmatprep.mubr.msk.f32.mxu0 %vm445_vm0, %v1423_v50 }
 0x823   : > { %6433 = vmatprep.subr.bf16.mxu0 %v6432_v3  ;;  %v6961_v55 = vpop.eup %6960 }
 0x824   : > { %v6963_v32 = vpop.eup %6962  ;;  %v1425_v42 = vmul.f32 %v6961_v55, %v6955_v23  ;;  %v2156_v23 = vld [vmem:[#allocation7 + $0x80] sm:$0xff] }
 0x825   : > { %v1426_v18 = vmul.f32 %v6963_v32, %v6953_v40  ;;  %v2155_v40 = vld [vmem:[#allocation7 + $0x78] sm:$0xff]  ;;  %v7199_v32 = vld [vmem:[%s7624_s15 + $0x10] sm:$0xff]  ;;  %s5326_s15 = sshll.u32 %s326_s14, 4  ;;  %s9068_s15 = int_to_ptr.vmem [resolvable:$true] %s5326_s15 }
 0x826   : > { %6435 = vmatpush3.bf16.msra.mxu0 %v6432_v3  ;;  %v6472_v47 = vpack.c.bf16 %v2156_v23, %v2155_v40  ;;  %v5549_v3 = vld [vmem:[#allocation7 + $0xc8] ss:$0 sm:$0xff]  ;;  %s7309_s8 = scalar_lea.vmem %s9068_s15, 512  ;;  %p7316_p5 = scmp.lt.s32.totalorder %s9068_s15, %s7314_s23 }
 0x827   : > { %p7310_p7 = scmp.ne.s32.totalorder %s9068_s15, %s7309_s8  ;;  %p7317_p2 = scmp.lt.s32.totalorder %s7315_s13, %s7309_s8 }
 0x829   : > { %6025 = vmatmul.mubr.msk.f32.vlgmr.msra.gmra.mrb[12].mxu0 %vm445_vm0, %v1424_v61  ;;  %p7311_p9 = pnand %p7310_p7, %p7525_p12  ;;  %p7318_p6 = por %p7317_p2, %p7316_p5 }
 0x82a   : > { %6027 = vmatprep.mubr.msk.f32.mxu0 %vm445_vm0, %v1425_v42 }
 0x82b   : > { %p7312_p1 = pneg %p7311_p9 }
 0x82d   : > { %6028 = vmatmul.mubr.msk.f32.gmra.mrb[14].mxu0 %vm445_vm0, %v1426_v18  ;;  %p7319_p8 = pnand %p7318_p6, %p7312_p1 }
 0x8fc   : > { %v6026_v13 = vpop.f32.mrb[12].mxu0 }
 0x8fd   : > { %v1517_v36 = vpop.f32.mrb[13].mxu0 }
 0x8fe   : > { %6034 = vmatprep.mubr.msk.f32.mxu1 %vm543_vm1, %v1517_v36 }
 0x8ff   : > { %6035 = vmatmul.mubr.msk.f32.vlgmr.msra.gmra.mrb[12].mxu1 %vm543_vm1, %v6026_v13 }
 0x900   : > { %v6029_v21 = vpop.f32.mrb[14].mxu0  ;;  %6443 = vmatpush3.bf16.msra.mxu1 %v6440_v45 }
 0x901   : > { %v1527_v2 = vpop.f32.mrb[15].mxu0  ;;  %6469 = vmatprep.subr.bf16.mxu1 %v6468_v56 }
 0x902   : > { %6037 = vmatprep.mubr.msk.f32.mxu1 %vm543_vm1, %v1527_v2 }
 0x903   : > { %6038 = vmatmul.mubr.msk.f32.gmra.mrb[14].mxu1 %vm543_vm1, %v6029_v21 }
 0x904   : > { %6044 = vmatprep.mubr.msk.f32.mxu1 %vm543_vm1, %v8018_v6  ;;  %v2148_v6 = vld [vmem:[%s8083_s28] sm:$0xff] }
 0x907   : > { %6045 = vmatmul.mubr.msk.f32.vlgmr.msra.gmra.mrb[12].mxu1 %vm543_vm1, %v8016_v48  ;;  %v2151_v48 = vld [vmem:[%s8083_s28 + $0x18] sm:$0xff] }
 0x908   : > { %6047 = vmatprep.mubr.msk.f32.mxu1 %vm543_vm1, %v8022_v11  ;;  %6471 = vmatpush3.bf16.msra.mxu1 %v6468_v56  ;;  %v8099_v11 = vld [vmem:[#allocation7 + $0x61] ss:$0 sm:$0xff] }
 0x909   : > { %6473 = vmatprep.subr.bf16.mxu1 %v6472_v47 }
 0x90b   : > { %6048 = vmatmul.mubr.msk.f32.gmra.mrb[14].mxu1 %vm543_vm1, %v8020_v49 }
 0x90c   : > { %6475 = vmatpush3.bf16.msra.mxu1 %v6472_v47  ;;  %6094 = vmatprep.mubr.msk.f32.mxu1 %vm445_vm0, %v2148_v6  ;;  %v7200_v47 = vld [vmem:[#allocation7 + $0x10] sm:$0xff]  ;;  %v7201_v6 = vld [vmem:[#allocation7 + $0x18] sm:$0xff] }
 0x90f   : > { %6095 = vmatmul.mubr.msk.f32.vlgmr.msra.gmra.mrb[16].mxu1 %vm445_vm0, %v2149_v15  ;;  %v6757_v15 = vpack.i.bf16 %v7201_v6, %v7200_v47 }
 0x910   : > { %6097 = vmatprep.mubr.msk.f32.mxu1 %vm445_vm0, %v2150_v31  ;;  %v9185_v31 = vpack.i.bf16 %v7644_v1, %v7642_v0 }
 0x913   : > { %6098 = vmatmul.mubr.msk.f32.gmra.mrb[18].mxu1 %vm445_vm0, %v2151_v48 }
 0x9da   : > { %v6046_v46 = vpop.f32.mrb[12].mxu1 }
 0x9db   : > { %v1738_v41 = vadd.f32 %v6046_v46, %v8099_v11  ;;  %v1713_v49 = vpop.f32.mrb[13].mxu1 }
 0x9dc   : > { %v1737_v52 = vadd.f32 %v8099_v11, %v1713_v49 }
 0x9dd   : > { %v1742_v54 = vadd.f32 %v7196_v12, %v1738_v41 }
 0x9de   : > { %v6049_v59 = vpop.f32.mrb[14].mxu1  ;;  %v1741_v17 = vadd.f32 %v7197_v7, %v1737_v52 }
 0x9df   : > { %v1740_v14 = vadd.f32 %v6049_v59, %v8099_v11  ;;  %v1723_v37 = vpop.f32.mrb[15].mxu1  ;;  %v1748_v28 = vsel %vm445_vm0, %v1742_v54, 0.0 }
 0x9e0   : > { %v1739_v38 = vadd.f32 %v8099_v11, %v1723_v37  ;;  %1749 = vadd.xlane.f32.xlu0 %v1748_v28  ;;  %v1745_v50 = vsel %vm445_vm0, %v1741_v17, 0.0 }
 0x9e1   : > { %1746 = vadd.xlane.f32.xlu1 %v1745_v50  ;;  %v1744_v55 = vadd.f32 %v7198_v53, %v1740_v14 }
 0x9e2   : > { %v6096_v61 = vpop.f32.mrb[16].mxu1  ;;  %v1743_v42 = vadd.f32 %v7199_v32, %v1739_v38 }
 0x9e3   : > { %v8111_v18 = vadd.f32 %v6096_v61, %v5549_v3  ;;  %v2240_v45 = vpop.f32.mrb[17].mxu1  ;;  %v1754_v63 = vsel %vm445_vm0, %v1744_v55, 0.0 }
 0x9e4   : > { %v8114_v19 = vadd.f32 %v5549_v3, %v2240_v45  ;;  %v1751_v13 = vsel %vm445_vm0, %v1743_v42, 0.0 }
 0x9e5   : > { %1755 = vadd.xlane.f32.xlu1 %v1754_v63  ;;  %1752 = vadd.xlane.f32.xlu0 %v1751_v13 }
 0x9e6   : > { %6108 = vmatprep.mubr.msk.f32.mxu1 %vm543_vm1, %v8114_v19  ;;  %v6476_v36 = vpack.c.bf16 %v8111_v18, %v8114_v19  ;;  %v6099_v56 = vpop.f32.mrb[18].mxu1 }
 0x9e7   : > { %v8121_v21 = vadd.f32 %v6099_v56, %v5549_v3  ;;  %v2250_v2 = vpop.f32.mrb[19].mxu1 }
 0x9e8   : > { %6478 = vmatprep.subr.msk.bf16.mxu1 %vm7664_vm2, %v6476_v36  ;;  %v8125_v40 = vadd.f32 %v5549_v3, %v2250_v2 }
 0x9e9   : > { %6481 = vmatpush3.bf16.xpose.msk.msra.mxu1 %vm7664_vm2, %v6476_v36 }
 0x9ea   : > { %v6482_v23 = vpack.c.bf16 %v8121_v21, %v8125_v40 }
 0x9ec   : > { %6484 = vmatprep.subr.msk.bf16.mxu1 %vm7664_vm2, %v6482_v23 }
 0x9f1   : > { %6487 = vmatpush3.bf16.xpose.msk.msra.mxu1 %vm7664_vm2, %v6482_v23 }
 0x9f6   : > { %6758 = vrot.lane.b32.xlu1 %v6757_v15, %s7396_s7 }
 0x9f8   : > { %6109 = vmatmul.mubr.msk.f32.vlgmr.msra.gmra.mrb[20].mxu1 %vm543_vm1, %v8111_v18 }
 0x9f9   : > { %6111 = vmatprep.mubr.msk.f32.mxu1 %vm543_vm1, %v8125_v40 }
 0x9fb   : > { %6753 = vrot.lane.b32.xlu0 %v9185_v31, %s7396_s7 }
 0x9fc   : > { %6112 = vmatmul.mubr.msk.f32.gmra.mrb[22].mxu1 %vm543_vm1, %v8121_v21 }
 0xa6d   : > { %v1750_v48 = vpop.xlane.xlu0 %1749 }
 0xa6e   : > { %v1759_v46 = vmul.f32 0.03125, %v1750_v48  ;;  %v1747_v41 = vpop.xlane.xlu1 %1746 }
 0xa6f   : > { %v1758_v49 = vmul.f32 0.03125, %v1747_v41 }
 0xa70   : > { %v8146_v52 = vsub.f32 %v1742_v54, %v1759_v46 }
 0xa71   : > { %v8148_v12 = vsub.f32 %v1741_v17, %v1758_v49 }
 0xa72   : > { %v1756_v59 = vpop.xlane.xlu1 %1755  ;;  %v1753_v7 = vpop.xlane.xlu0 %1752  ;;  %v1767_v14 = vmul.f32 %v8146_v52, %v8146_v52 }
 0xa73   : > { %v1761_v37 = vmul.f32 0.03125, %v1756_v59  ;;  %v1760_v28 = vmul.f32 0.03125, %v1753_v7  ;;  %v1766_v0 = vmul.f32 %v8148_v12, %v8148_v12 }
 0xa74   : > { %v1773_v1 = vsel %vm445_vm0, %v1767_v14, 0.0 }
 0xa75   : > { %v8155_v38 = vsub.f32 %v1744_v55, %v1761_v37  ;;  %v8157_v50 = vsub.f32 %v1743_v42, %v1760_v28  ;;  %1774 = vadd.xlane.f32.xlu1 %v1773_v1  ;;  %v1770_v54 = vsel %vm445_vm0, %v1766_v0, 0.0  ;;  %v6767_v0 = vpack.i.bf16 %v8058_v44, %v8056_v35 }
 0xa76   : > { %1771 = vadd.xlane.f32.xlu0 %v1770_v54  ;;  %v6754_v17 = vpop.permute.xlu0 %6753  ;;  %v6759_v3 = vpop.permute.xlu1 %6758  ;;  %v6762_v1 = vpack.i.bf16 %v8068_v60, %v8066_v27  ;;  %v1938_v54 = vld [vmem:[#allocation7 + $0x40] sm:$0xff] }
 0xa77   : > { %v1769_v53 = vmul.f32 %v8155_v38, %v8155_v38  ;;  %v1768_v61 = vmul.f32 %v8157_v50, %v8157_v50  ;;  %v6756_v32 = vunpack.i.h.bf16 %v6754_v17  ;;  %v6755_v45 = vunpack.i.l.bf16 %v6754_v17  ;;  %v1939_v17 = vld [vmem:[#allocation7 + $0x48] sm:$0xff] }
 0xa78   : > { %v6761_v63 = vunpack.i.h.bf16 %v6759_v3  ;;  %v6760_v13 = vunpack.i.l.bf16 %v6759_v3  ;;  %v6772_v3 = vpack.i.bf16 %v1939_v17, %v1938_v54 }
 0xa79   : > { %v1779_v55 = vsel %vm445_vm0, %v1769_v53, 0.0  ;;  %v1776_v42 = vsel %vm445_vm0, %v1768_v61, 0.0  ;;  %v6444_v36 = vpack.c.bf16 %v6756_v32, %v6755_v45 }
 0xa7a   : > { %1780 = vadd.xlane.f32.xlu1 %v1779_v55  ;;  %1777 = vadd.xlane.f32.xlu0 %v1776_v42  ;;  %v6448_v56 = vpack.c.bf16 %v6761_v63, %v6760_v13 }
 0xa7b   : > { %6445 = vmatprep.subr.bf16.mxu0 %v6444_v36 }
 0xa7c   : > { %6447 = vmatpush3.bf16.msra.mxu0 %v6444_v36 }
 0xa7d   : > { %6449 = vmatprep.subr.bf16.mxu0 %v6448_v56 }
 0xa80   : > { %6451 = vmatpush3.bf16.msra.mxu0 %v6448_v56 }
 0xa8b   : > { %1799 = vrot.lane.b32.xlu1 %v8099_v11, %s7394_s16 }
 0xa90   : > { %1806 = vrot.lane.b32.xlu0 %v8099_v11, %s7396_s7 }
 0xacb   : > { %v6110_v2 = vpop.f32.mrb[20].mxu1 }
 0xacc   : > { %v8170_v23 = vmul.f32 0.25, %v6110_v2  ;;  %v2337_v47 = vpop.f32.mrb[21].mxu1 }
 0xacd   : > { %v8172_v6 = vmul.f32 0.25, %v2337_v47 }
 0xace   : > { %v8177_v15 = vsel %vm7714_vm4, %v8170_v23, -1e+32 }
 0xacf   : > { %v6113_v31 = vpop.f32.mrb[22].mxu1  ;;  %v2367_v48 = vsel %vm445_vm0, %v8177_v15, -inf  ;;  %v8184_v46 = vsel %vm7701_vm3, %v8172_v6, -1e+32 }
 0xad0   : > { %v8186_v11 = vmul.f32 0.25, %v6113_v31  ;;  %v2347_v41 = vpop.f32.mrb[23].mxu1  ;;  %2368 = vmax.xlane.f32.xlu0 %v2367_v48  ;;  %v2364_v49 = vsel %vm445_vm0, %v8184_v46, -inf }
 0xad1   : > { %v8190_v59 = vmul.f32 0.25, %v2347_v41  ;;  %2365 = vmax.xlane.f32.xlu1 %v2364_v49 }
 0xad2   : > { %v8195_v7 = vsel %vm7740_vm6, %v8186_v11, -1e+32 }
 0xad3   : > { %v2373_v14 = vsel %vm445_vm0, %v8195_v7, -inf  ;;  %v8202_v37 = vsel %vm7727_vm5, %v8190_v59, -1e+32 }
 0xad4   : > { %v2370_v28 = vsel %vm445_vm0, %v8202_v37, -inf }
 0xad5   : > { %2374 = vmax.xlane.f32.xlu1 %v2373_v14  ;;  %2371 = vmax.xlane.f32.xlu0 %v2370_v28 }
 0xae6   : > { %6768 = vrot.lane.b32.xlu1 %v6767_v0, %s7394_s16 }
 0xaeb   : > { %6763 = vrot.lane.b32.xlu0 %v6762_v1, %s7394_s16 }
 0xaef   : > { %6773 = vrot.lane.b32.xlu0 %v6772_v3, %s7394_s16 }
 0xb02   : > { %v1775_v53 = vpop.xlane.xlu1 %1774 }
 0xb03   : > { %v1783_v61 = vmul.f32 0.03125, %v1775_v53  ;;  %v1772_v32 = vpop.xlane.xlu0 %1771 }
 0xb04   : > { %v1782_v45 = vmul.f32 0.03125, %v1772_v32 }
 0xb05   : > { %v1787_v63 = vadd.f32 1e-05, %v1783_v61 }
 0xb06   : > { %v1786_v13 = vadd.f32 1e-05, %v1782_v45 }
 0xb07   : > { %6964 = vrsqrt.f32 %v1787_v63  ;;  %v1781_v35 = vpop.xlane.xlu1 %1780  ;;  %v1778_v44 = vpop.xlane.xlu0 %1777 }
 0xb08   : > { %6966 = vrsqrt.f32 %v1786_v13  ;;  %v1785_v55 = vmul.f32 0.03125, %v1781_v35  ;;  %v1784_v42 = vmul.f32 0.03125, %v1778_v44 }
 0xb0a   : > { %v1789_v27 = vadd.f32 1e-05, %v1785_v55  ;;  %v1788_v60 = vadd.f32 1e-05, %v1784_v42 }
 0xb0b   : > { %v1800_v56 = vpop.permute.xlu1 %1799  ;;  %v1807_v41 = vpop.permute.xlu0 %1806 }
 0xb0c   : > { %6968 = vrsqrt.f32 %v1789_v27 }
 0xb0d   : > { %6970 = vrsqrt.f32 %v1788_v60 }
 0xb11   : > { %v6965_v36 = vpop.eup %6964 }
 0xb12   : > { %v6967_v2 = vpop.eup %6966  ;;  %v1795_v47 = vmul.f32 %v6965_v36, %v8146_v52 }
 0xb13   : > { %v1794_v31 = vmul.f32 %v6967_v2, %v8148_v12 }
 0xb14   : > { %v1803_v48 = vmul.f32 %v1800_v56, %v1795_v47 }
 0xb15   : > { %v1802_v49 = vmul.f32 %v1800_v56, %v1794_v31 }
 0xb16   : > { %v6969_v14 = vpop.eup %6968  ;;  %v8219_v17 = vadd.f32 %v1807_v41, %v1803_v48 }
 0xb17   : > { %v6971_v28 = vpop.eup %6970  ;;  %v1797_v0 = vmul.f32 %v6969_v14, %v8155_v38  ;;  %v8216_v1 = vadd.f32 %v1807_v41, %v1802_v49 }
 0xb18   : > { %v1796_v54 = vmul.f32 %v6971_v28, %v8157_v50 }
 0xb19   : > { %v1805_v3 = vmul.f32 %v1800_v56, %v1797_v0  ;;  %6058 = vmatprep.mubr.msk.f32.mxu0 %vm445_vm0, %v8216_v1 }
 0xb1a   : > { %v1804_v52 = vmul.f32 %v1800_v56, %v1796_v54  ;;  %6059 = vmatmul.mubr.msk.f32.vlgmr.msra.gmra.mrb[16].mxu0 %vm445_vm0, %v8219_v17 }
 0xb1b   : > { %v8225_v12 = vadd.f32 %v1807_v41, %v1805_v3 }
 0xb1c   : > { %v8227_v53 = vadd.f32 %v1807_v41, %v1804_v52 }
 0xb1e   : > { %6061 = vmatprep.mubr.msk.f32.mxu0 %vm445_vm0, %v8227_v53 }
 0xb1f   : > { %6062 = vmatmul.mubr.msk.f32.gmra.mrb[18].mxu0 %vm445_vm0, %v8225_v12 }
 0xb5d   : > { %v2369_v38 = vpop.xlane.xlu0 %2368 }
 0xb5e   : > { %v2377_v50 = vsub.f32 %v8177_v15, %v2369_v38  ;;  %v2366_v61 = vpop.xlane.xlu1 %2365 }
 0xb5f   : > { %v2376_v32 = vsub.f32 %v8184_v46, %v2366_v61  ;;  %v1941_v61 = vld [vmem:[#allocation7 + $0x58] sm:$0xff] }
 0xb60   : > { %v2382_v45 = vmul.f32 1.442695, %v2377_v50  ;;  %v1940_v50 = vld [vmem:[#allocation7 + $0x50] sm:$0xff] }
 0xb61   : > { %v2380_v63 = vmul.f32 1.442695, %v2376_v32  ;;  %v6777_v32 = vpack.i.bf16 %v1941_v61, %v1940_v50 }
 0xb62   : > { %6972 = vpow2.f32 %v2382_v45  ;;  %v2375_v13 = vpop.xlane.xlu1 %2374  ;;  %v2372_v35 = vpop.xlane.xlu0 %2371  ;;  %v7202_v45 = vld [vmem:[#allocation7 + $0x60] ss:$0 sm:$0xff] }
 0xb63   : > { %6974 = vpow2.f32 %v2380_v63  ;;  %v2379_v44 = vsub.f32 %v8195_v7, %v2375_v13  ;;  %v2378_v55 = vsub.f32 %v8202_v37, %v2372_v35 }
 0xb65   : > { %v2386_v42 = vmul.f32 1.442695, %v2379_v44  ;;  %v2384_v27 = vmul.f32 1.442695, %v2378_v55 }
 0xb66   : > { %v6764_v60 = vpop.permute.xlu0 %6763  ;;  %v6769_v36 = vpop.permute.xlu1 %6768 }
 0xb67   : > { %6976 = vpow2.f32 %v2386_v42  ;;  %v6766_v56 = vunpack.i.h.bf16 %v6764_v60  ;;  %v6765_v15 = vunpack.i.l.bf16 %v6764_v60  ;;  %v6771_v2 = vunpack.i.h.bf16 %v6769_v36 }
 0xb68   : > { %v6770_v47 = vunpack.i.l.bf16 %v6769_v36  ;;  %6978 = vpow2.f32 %v2384_v27 }
 0xb69   : > { %v6452_v46 = vpack.c.bf16 %v6766_v56, %v6765_v15 }
 0xb6a   : > { %v6456_v31 = vpack.c.bf16 %v6771_v2, %v6770_v47  ;;  %v6774_v48 = vpop.permute.xlu0 %6773 }
 0xb6b   : > { %6453 = vmatprep.subr.bf16.mxu0 %v6452_v46  ;;  %v6776_v41 = vunpack.i.h.bf16 %v6774_v48  ;;  %v6775_v49 = vunpack.i.l.bf16 %v6774_v48 }
 0xb6c   : > { %v6973_v14 = vpop.eup %6972  ;;  %6455 = vmatpush3.bf16.msra.mxu0 %v6452_v46 }
 0xb6d   : > { %v6975_v7 = vpop.eup %6974  ;;  %v2395_v37 = vsel %vm445_vm0, %v6973_v14, 0.0  ;;  %6457 = vmatprep.subr.bf16.mxu0 %v6456_v31  ;;  %v6460_v28 = vpack.c.bf16 %v6776_v41, %v6775_v49  ;;  %v2389_v46 = vmul.f32 %v6973_v14, %v7838_v58 }
 0xb6e   : > { %2396 = vadd.xlane.f32.xlu1 %v2395_v37  ;;  %v2392_v0 = vsel %vm445_vm0, %v6975_v7, 0.0  ;;  %v2388_v48 = vmul.f32 %v6975_v7, %v7830_v51 }
 0xb6f   : > { %2393 = vadd.xlane.f32.xlu0 %v2392_v0 }
 0xb70   : > { %6459 = vmatpush3.bf16.msra.mxu0 %v6456_v31 }
 0xb71   : > { %v8239_v54 = vpop.eup %6976  ;;  %6461 = vmatprep.subr.bf16.mxu0 %v6460_v28 }
 0xb72   : > { %v2401_v3 = vsel %vm445_vm0, %v8239_v54, 0.0  ;;  %v6979_v52 = vpop.eup %6978 }
 0xb73   : > { %2402 = vadd.xlane.f32.xlu1 %v2401_v3  ;;  %v2398_v38 = vsel %vm445_vm0, %v6979_v52, 0.0 }
 0xb74   : > { %6463 = vmatpush3.bf16.msra.mxu0 %v6460_v28 }
 0xb77   : > { %2399 = vadd.xlane.f32.xlu1 %v2398_v38 }
 0xb85   : > { %6778 = vrot.lane.b32.xlu0 %v6777_v32, %s7394_s16 }
 0xb88   : > { %1830 = vrot.lane.b32.xlu1 %v7202_v45, %s7396_s7 }
 0xb89   : > { %2744 = vrot.lane.b32.xlu0 %v8114_v19, %s7391_s24 }
 0xb8c   : > { %2746 = vrot.lane.b32.xlu1 %v8111_v18, %s7391_s24 }
 0xb8d   : > { %2748 = vrot.lane.b32.xlu0 %v8125_v40, %s7391_s24 }
 0xb90   : > { %2750 = vrot.lane.b32.xlu1 %v8121_v21, %s7391_s24 }
 0xbed   : > { %v6060_v63 = vpop.f32.mrb[16].mxu0 }
 0xbee   : > { %v1911_v13 = vpop.f32.mrb[17].mxu0 }
 0xbf2   : > { %v6063_v35 = vpop.f32.mrb[18].mxu0 }
 0xbf3   : > { %v1921_v44 = vpop.f32.mrb[19].mxu0 }
 0xbfb   : > { %v2397_v55 = vpop.xlane.xlu1 %2396 }
 0xbfc   : > { %6980 = vrcp.f32 %v2397_v55  ;;  %v2394_v42 = vpop.xlane.xlu0 %2393 }
 0xbfd   : > { %6982 = vrcp.f32 %v2394_v42 }
 0xc00   : > { %v2403_v27 = vpop.xlane.xlu1 %2402  ;;  %v6779_v60 = vpop.permute.xlu0 %6778 }
 0xc01   : > { %v6781_v36 = vunpack.i.h.bf16 %v6779_v60  ;;  %v6780_v56 = vunpack.i.l.bf16 %v6779_v60  ;;  %6984 = vrcp.f32 %v2403_v27 }
 0xc03   : > { %v6464_v15 = vpack.c.bf16 %v6781_v36, %v6780_v56 }
 0xc04   : > { %v2400_v2 = vpop.xlane.xlu1 %2399  ;;  %v2745_v47 = vpop.permute.xlu0 %2744 }
 0xc05   : > { %6986 = vrcp.f32 %v2400_v2  ;;  %6150 = vmatprep.mubr.msk.f32.mxu1 %vm543_vm1, %v2745_v47  ;;  %6465 = vmatprep.subr.bf16.mxu0 %v6464_v15 }
 0xc06   : > { %v6981_v31 = vpop.eup %6980  ;;  %6467 = vmatpush3.bf16.msra.mxu0 %v6464_v15 }
 0xc07   : > { %v6983_v41 = vpop.eup %6982  ;;  %v2409_v49 = vmul.f32 %v6981_v31, %v2389_v46  ;;  %6489 = vmatprep.subr.msk.bf16.mxu0 %vm7777_vm11, %v9135_v10 }
 0xc08   : > { %v1831_v37 = vpop.permute.xlu1 %1830  ;;  %v2408_v28 = vmul.f32 %v6983_v41, %v2388_v48 }
 0xc09   : > { %v1917_v0 = vadd.f32 %v6060_v63, %v1831_v37  ;;  %v2512_v3 = vsel %vm445_vm0, %v2409_v49, 0.0  ;;  %v1912_v38 = vadd.f32 %v1911_v13, %v1831_v37  ;;  %v1922_v50 = vadd.f32 %v1921_v44, %v1831_v37  ;;  %v2749_v44 = vpop.permute.xlu0 %2748 }
 0xc0a   : > { %2513 = vadd.xlane.f32.xlu1 %v2512_v3  ;;  %v2509_v14 = vsel %vm445_vm0, %v2408_v28, 0.0  ;;  %v1927_v45 = vadd.f32 %v6063_v35, %v1831_v37  ;;  %v2390_v63 = vmul.f32 %v6979_v52, %v7843_v5  ;;  %v2391_v52 = vmul.f32 %v8239_v54, %v7856_v20 }
 0xc0b   : > { %v1931_v61 = vmax.f32 %v1917_v0, 0.0  ;;  %2510 = vadd.xlane.f32.xlu0 %v2509_v14  ;;  %v1930_v7 = vmax.f32 %v1912_v38, 0.0  ;;  %v1932_v42 = vmax.f32 %v1922_v50, 0.0  ;;  %v6985_v27 = vpop.eup %6984  ;;  %v8304_v50 = vld [vmem:[%s7632_s17 + $0x8] sm:$0xff] }
 0xc0c   : > { %v2747_v32 = vpop.permute.xlu1 %2746  ;;  %v1933_v60 = vmax.f32 %v1927_v45, 0.0  ;;  %v2411_v2 = vmul.f32 %v6985_v27, %v2391_v52 }
 0xc0d   : > { %v6504_v55 = vpack.c.bf16 %v2747_v32, %v2745_v47  ;;  %6080 = vmatprep.mubr.msk.f32.mxu0 %vm1977_vm15, %v1930_v7  ;;  %v8308_v7 = vld [vmem:[%s7632_s17] sm:$0xff] }
 0xc0e   : > { %6081 = vmatmul.mubr.msk.f32.vlgmr.msra.gmra.mrb[20].mxu0 %vm1977_vm15, %v1931_v61  ;;  %v2518_v54 = vsel %vm445_vm0, %v2411_v2, 0.0 }
 0xc0f   : > { %v6987_v13 = vpop.eup %6986  ;;  %6083 = vmatprep.mubr.msk.f32.mxu0 %vm1977_vm15, %v1932_v42  ;;  %6491 = vmatpush3.bf16.msk.msra.mxu0 %vm7777_vm11, %v9135_v10 }
 0xc10   : > { %6506 = vmatprep.subr.msk.bf16.mxu1 %vm7664_vm2, %v6504_v55  ;;  %v2751_v35 = vpop.permute.xlu1 %2750  ;;  %6493 = vmatprep.subr.msk.bf16.mxu0 %vm7781_vm12, %v9135_v10  ;;  %v2410_v36 = vmul.f32 %v6987_v13, %v2390_v63 }
 0xc11   : > { %v6510_v56 = vpack.c.bf16 %v2751_v35, %v2749_v44  ;;  %6509 = vmatpush3.bf16.xpose.msk.msra.mxu1 %vm7664_vm2, %v6504_v55 }
 0xc12   : > { %6084 = vmatmul.mubr.msk.f32.gmra.mrb[22].mxu0 %vm1977_vm15, %v1933_v60  ;;  %v2515_v15 = vsel %vm445_vm0, %v2410_v36, 0.0  ;;  %v8316_v60 = vld [vmem:[%s7632_s17 + $0x10] sm:$0xff] }
 0xc13   : > { %2516 = vadd.xlane.f32.xlu0 %v2515_v15  ;;  %6495 = vmatpush3.bf16.msk.msra.mxu0 %vm7781_vm12, %v9135_v10 }
 0xc14   : > { %6122 = vmatprep.mubr.msk.f32.mxu0 %vm445_vm0, %v2408_v28  ;;  %6512 = vmatprep.subr.msk.bf16.mxu1 %vm7664_vm2, %v6510_v56 }
 0xc16   : > { %6123 = vmatmul.mubr.msk.f32.vlgmr.msra.gmra.mrb[24].mxu0 %vm445_vm0, %v2409_v49 }
 0xc17   : > { %2519 = vadd.xlane.f32.xlu0 %v2518_v54  ;;  %6125 = vmatprep.mubr.msk.f32.mxu0 %vm445_vm0, %v2410_v36 }
 0xc19   : > { %6515 = vmatpush3.bf16.xpose.msk.msra.mxu1 %vm7664_vm2, %v6510_v56 }
 0xc1a   : > { %6126 = vmatmul.mubr.msk.f32.gmra.mrb[26].mxu0 %vm445_vm0, %v2411_v2 }
 0xc20   : > { %6151 = vmatmul.mubr.msk.f32.vlgmr.msra.gmra.mrb[24].mxu1 %vm543_vm1, %v2747_v32 }
 0xc21   : > { %6153 = vmatprep.mubr.msk.f32.mxu1 %vm543_vm1, %v2749_v44  ;;  %v8312_v44 = vld [vmem:[%s7632_s17 + $0x18] sm:$0xff] }
 0xc24   : > { %6154 = vmatmul.mubr.msk.f32.gmra.mrb[26].mxu1 %vm543_vm1, %v2751_v35 }
 0xc97   : > { %v2514_v37 = vpop.xlane.xlu1 %2513 }
 0xc98   : > { %v2511_v31 = vpop.xlane.xlu0 %2510 }
 0xca0   : > { %v2517_v49 = vpop.xlane.xlu0 %2516 }
 0xca4   : > { %v2520_v61 = vpop.xlane.xlu0 %2519 }
 0xce1   : > { %v8295_v47 = vpop.f32.mrb[20].mxu0 }
 0xce2   : > { %v8297_v46 = vpop.f32.mrb[21].mxu0 }
 0xce5   : > { %v8299_v48 = vpop.f32.mrb[22].mxu0 }
 0xce6   : > { %v8301_v41 = vpop.f32.mrb[23].mxu0 }
 0xce9   : > { %v6124_v28 = vpop.f32.mrb[24].mxu0 }
 0xcea   : > { %v2522_v0 = vsub.f32 %v2514_v37, %v6124_v28  ;;  %v2490_v3 = vpop.f32.mrb[25].mxu0 }
 0xceb   : > { %v2521_v38 = vsub.f32 %v2511_v31, %v2490_v3 }
 0xcec   : > { %v2526_v14 = vmul.f32 %v8304_v50, %v2522_v0 }
 0xced   : > { %v2525_v32 = vmul.f32 %v8308_v7, %v2521_v38  ;;  %v6127_v45 = vpop.f32.mrb[26].mxu0 }
 0xcee   : > { %v2530_v55 = vmax.f32 %v2526_v14, 0.0  ;;  %v2524_v42 = vsub.f32 %v2520_v61, %v6127_v45  ;;  %v2500_v27 = vpop.f32.mrb[27].mxu0 }
 0xcef   : > { %v2529_v63 = vmax.f32 %v2525_v32, 0.0  ;;  %v2523_v13 = vsub.f32 %v2517_v49, %v2500_v27 }
 0xcf0   : > { %6988 = vrsqrt.f32 %v2530_v55  ;;  %v2528_v35 = vmul.f32 %v8312_v44, %v2524_v42  ;;  %vm2542_vm7 = vcmp.eq.f32.partialorder %v2530_v55, inf  ;;  %v2545_v0 = vand.u32 2147483648, %v2530_v55 }
 0xcf1   : > { %6990 = vrsqrt.f32 %v2529_v63  ;;  %v2527_v36 = vmul.f32 %v8316_v60, %v2523_v13  ;;  %vm2544_vm8 = vcmp.eq.f32.partialorder %v2530_v55, 0.0  ;;  %vm2535_vm9 = vcmp.eq.f32.partialorder %v2529_v63, inf }
 0xcf2   : > { %v2532_v52 = vmax.f32 %v2528_v35, 0.0  ;;  %v2538_v14 = vand.u32 2147483648, %v2529_v63  ;;  %vm2537_vm10 = vcmp.eq.f32.partialorder %v2529_v63, 0.0 }
 0xcf3   : > { %v2531_v56 = vmax.f32 %v2527_v36, 0.0  ;;  %v6152_v15 = vpop.f32.mrb[24].mxu1 }
 0xcf4   : > { %6992 = vrsqrt.f32 %v2532_v52  ;;  %v8319_v2 = vpop.f32.mrb[25].mxu1  ;;  %vm2556_vm13 = vcmp.eq.f32.partialorder %v2532_v52, inf  ;;  %vm2558_vm14 = vcmp.eq.f32.partialorder %v2532_v52, 0.0 }
 0xcf5   : > { %6994 = vrsqrt.f32 %v2531_v56 }
 0xcf7   : > { %v8321_v54 = vpop.f32.mrb[26].mxu1 }
 0xcf8   : > { %v8323_v31 = vpop.f32.mrb[27].mxu1 }
 0xcfa   : > { %v6989_v49 = vpop.eup %6988 }
 0xcfb   : > { %v6991_v37 = vpop.eup %6990  ;;  %v2541_v28 = vmul.f32 %v6989_v49, %v2530_v55  ;;  %v2559_v49 = vand.u32 2147483648, %v2532_v52 }
 0xcfc   : > { %v2534_v3 = vmul.f32 %v6991_v37, %v2529_v63 }
 0xcfd   : > { %v2543_v38 = vsel %vm2542_vm7, %v2530_v55, %v2541_v28  ;;  %vm2549_vm7 = vcmp.eq.f32.partialorder %v2531_v56, inf  ;;  %v2552_v55 = vand.u32 2147483648, %v2531_v56 }
 0xcfe   : > { %v6993_v61 = vpop.eup %6992  ;;  %v2546_v32 = vsel %vm2544_vm8, %v2545_v0, %v2543_v38  ;;  %v2536_v45 = vsel %vm2535_vm9, %v2529_v63, %v2534_v3  ;;  %vm2551_vm8 = vcmp.eq.f32.partialorder %v2531_v56, 0.0 }
 0xcff   : > { %v6995_v42 = vpop.eup %6994  ;;  %v2562_v27 = vmul.f32 %v2546_v32, %v7895_v4  ;;  %v2539_v13 = vsel %vm2537_vm10, %v2538_v14, %v2536_v45  ;;  %v2555_v35 = vmul.f32 %v6993_v61, %v2532_v52 }
 0xd00   : > { %v2561_v36 = vmul.f32 %v2539_v13, %v7905_v22  ;;  %v2548_v10 = vmul.f32 %v6995_v42, %v2531_v56 }
 0xd01   : > { %v2567_v37 = vmul.f32 1.442695, %v2562_v27  ;;  %v2557_v28 = vsel %vm2556_vm13, %v2532_v52, %v2555_v35 }
 0xd02   : > { %v2565_v30 = vmul.f32 1.442695, %v2561_v36  ;;  %v2560_v34 = vsel %vm2558_vm14, %v2559_v49, %v2557_v28  ;;  %v2550_v0 = vsel %vm2549_vm7, %v2531_v56, %v2548_v10 }
 0xd03   : > { %6996 = vpow2.f32 %v2567_v37  ;;  %v2564_v63 = vmul.f32 %v2560_v34, %v7909_v57  ;;  %v2553_v3 = vsel %vm2551_vm8, %v2552_v55, %v2550_v0 }
 0xd04   : > { %6998 = vpow2.f32 %v2565_v30  ;;  %v2563_v38 = vmul.f32 %v2553_v3, %v7903_v62 }
 0xd05   : > { %v2571_v14 = vmul.f32 1.442695, %v2564_v63  ;;  %v8336_v63 = vmul.f32 0.25, %v6152_v15 }
 0xd06   : > { %v2569_v61 = vmul.f32 1.442695, %v2563_v38 }
 0xd07   : > { %7000 = vpow2.f32 %v2571_v14 }
 0xd08   : > { %7002 = vpow2.f32 %v2569_v61 }
 0xd0d   : > { %v6997_v32 = vpop.eup %6996 }
 0xd0e   : > { %v6999_v45 = vpop.eup %6998  ;;  %v2574_v52 = vmax.f32 %v6997_v32, 1e-05  ;;  %v8350_v32 = vmul.f32 0.25, %v8321_v54 }
 0xd0f   : > { %v2573_v42 = vmax.f32 %v6999_v45, 1e-05 }
 0xd10   : > { %v2578_v27 = vmin.f32 %v2574_v52, 100000.0 }
 0xd11   : > { %v7001_v13 = vpop.eup %7000  ;;  %v2577_v35 = vmin.f32 %v2573_v42, 100000.0  ;;  %v2852_v42 = vsel %vm7740_vm6, %v8350_v32, -1e+32 }
 0xd12   : > { %v7003_v10 = vpop.eup %7002  ;;  %v2582_v56 = vmul.f32 %v2578_v27, %v8170_v23  ;;  %v2576_v36 = vmax.f32 %v7001_v13, 1e-05  ;;  %v2862_v27 = vsel %vm445_vm0, %v2852_v42, -inf }
 0xd13   : > { %v2581_v34 = vmul.f32 %v2577_v35, %v8172_v6  ;;  %v2575_v30 = vmax.f32 %v7003_v10, 1e-05  ;;  %v8341_v6 = vmul.f32 0.25, %v8319_v2  ;;  %v2850_v2 = vsel %vm7714_vm4, %v8336_v63, -1e+32 }
 0xd14   : > { %v2586_v49 = vsel %vm7714_vm4, %v2582_v56, -1e+32  ;;  %v2580_v37 = vmin.f32 %v2576_v36, 100000.0  ;;  %v2856_v52 = vsel %vm445_vm0, %v2850_v2, -inf }
 0xd15   : > { %v2592_v28 = vsel %vm445_vm0, %v2586_v49, -inf  ;;  %v2585_v55 = vsel %vm7701_vm3, %v2581_v34, -1e+32  ;;  %v2579_v0 = vmin.f32 %v2575_v30, 100000.0  ;;  %v2849_v45 = vsel %vm7701_vm3, %v8341_v6, -1e+32 }
 0xd16   : > { %2593 = vmax.xlane.f32.xlu0 %v2592_v28  ;;  %v2589_v3 = vsel %vm445_vm0, %v2585_v55, -inf  ;;  %v2584_v23 = vmul.f32 %v2580_v37, %v8186_v11  ;;  %v2853_v54 = vsel %vm445_vm0, %v2849_v45, -inf }
 0xd17   : > { %2590 = vmax.xlane.f32.xlu1 %v2589_v3  ;;  %v2583_v38 = vmul.f32 %v2579_v0, %v8190_v59  ;;  %v8357_v59 = vmul.f32 0.25, %v8323_v31 }
 0xd18   : > { %v2588_v14 = vsel %vm7740_vm6, %v2584_v23, -1e+32 }
 0xd19   : > { %v2598_v61 = vsel %vm445_vm0, %v2588_v14, -inf  ;;  %v2587_v15 = vsel %vm7727_vm5, %v2583_v38, -1e+32  ;;  %v2851_v31 = vsel %vm7727_vm5, %v8357_v59, -1e+32 }
 0xd1a   : > { %2599 = vmax.xlane.f32.xlu0 %v2598_v61  ;;  %v2595_v11 = vsel %vm445_vm0, %v2587_v15, -inf  ;;  %v2859_v13 = vsel %vm445_vm0, %v2851_v31, -inf }
 0xd1b   : > { %2596 = vmax.xlane.f32.xlu1 %v2595_v11 }
 0xd1e   : > { %2857 = vmax.xlane.f32.xlu0 %v2856_v52 }
 0xd1f   : > { %2854 = vmax.xlane.f32.xlu1 %v2853_v54 }
 0xd22   : > { %2863 = vmax.xlane.f32.xlu0 %v2862_v27 }
 0xd23   : > { %2860 = vmax.xlane.f32.xlu1 %v2859_v13 }
 0xda3   : > { %v2594_v35 = vpop.xlane.xlu0 %2593 }
 0xda4   : > { %v2591_v10 = vpop.xlane.xlu1 %2590  ;;  %v2602_v0 = vsub.f32 %v2586_v49, %v2594_v35 }
 0xda5   : > { %v2601_v23 = vsub.f32 %v2585_v55, %v2591_v10 }
 0xda6   : > { %v2607_v27 = vmul.f32 1.442695, %v2602_v0 }
 0xda7   : > { %v2600_v56 = vpop.xlane.xlu0 %2599  ;;  %v2605_v25 = vmul.f32 1.442695, %v2601_v23 }
 0xda8   : > { %v2597_v36 = vpop.xlane.xlu1 %2596  ;;  %v2604_v13 = vsub.f32 %v2588_v14, %v2600_v56 }
 0xda9   : > { %v2603_v26 = vsub.f32 %v2587_v15, %v2597_v36 }
 0xdab   : > { %v2858_v34 = vpop.xlane.xlu0 %2857  ;;  %v2609_v49 = vmul.f32 1.442695, %v2603_v26 }
 0xdac   : > { %v2866_v30 = vsub.f32 %v2850_v2, %v2858_v34  ;;  %v2855_v37 = vpop.xlane.xlu1 %2854  ;;  %v2611_v2 = vmul.f32 1.442695, %v2604_v13 }
 0xdad   : > { %v2865_v28 = vsub.f32 %v2849_v45, %v2855_v37  ;;  %v8391_v37 = vpack.i.bf16 %v8111_v18, %v8114_v19 }
 0xdae   : > { %v2871_v3 = vmul.f32 1.442695, %v2866_v30 }
 0xdaf   : > { %v2869_v38 = vmul.f32 1.442695, %v2865_v28  ;;  %v2864_v61 = vpop.xlane.xlu0 %2863  ;;  %v8397_v28 = vpack.i.bf16 %v8121_v21, %v8125_v40 }
 0xdb0   : > { %7004 = vpow2.f32 %v2871_v3  ;;  %v2868_v11 = vsub.f32 %v2852_v42, %v2864_v61  ;;  %v2861_v52 = vpop.xlane.xlu1 %2860 }
 0xdb1   : > { %7006 = vpow2.f32 %v2869_v38  ;;  %v2867_v54 = vsub.f32 %v2851_v31, %v2861_v52 }
 0xdb2   : > { %v2875_v24 = vmul.f32 1.442695, %v2868_v11 }
 0xdb3   : > { %v2873_v16 = vmul.f32 1.442695, %v2867_v54 }
 0xdb4   : > { %7008 = vpow2.f32 %v2875_v24 }
 0xdb5   : > { %7010 = vpow2.f32 %v2873_v16 }
 0xdb6   : > { %7012 = vpow2.f32 %v2607_v27 }
 0xdb7   : > { %7014 = vpow2.f32 %v2605_v25 }
 0xdb8   : > { %7016 = vpow2.f32 %v2611_v2 }
 0xdb9   : > { %7018 = vpow2.f32 %v2609_v49 }
 0xdba   : > { %v7005_v55 = vpop.eup %7004 }
 0xdbb   : > { %v7007_v45 = vpop.eup %7006  ;;  %v2884_v42 = vsel %vm445_vm0, %v7005_v55, 0.0  ;;  %v2878_v61 = vmul.f32 %v7005_v55, %v7838_v58 }
 0xdbc   : > { %2885 = vadd.xlane.f32.xlu0 %v2884_v42  ;;  %v2881_v31 = vsel %vm445_vm0, %v7007_v45, 0.0  ;;  %v2877_v21 = vmul.f32 %v7007_v45, %v7830_v51 }
 0xdbd   : > { %2882 = vadd.xlane.f32.xlu1 %v2881_v31 }
 0xdbe   : > { %v7009_v14 = vpop.eup %7008 }
 0xdbf   : > { %v7011_v35 = vpop.eup %7010  ;;  %v2890_v15 = vsel %vm445_vm0, %v7009_v14, 0.0  ;;  %v2880_v49 = vmul.f32 %v7009_v14, %v7856_v20 }
 0xdc0   : > { %v8375_v24 = vpop.eup %7012  ;;  %2891 = vadd.xlane.f32.xlu0 %v2890_v15  ;;  %v2887_v16 = vsel %vm445_vm0, %v7011_v35, 0.0  ;;  %v2879_v15 = vmul.f32 %v7011_v35, %v7843_v5 }
 0xdc1   : > { %v7015_v25 = vpop.eup %7014  ;;  %2888 = vadd.xlane.f32.xlu1 %v2887_v16  ;;  %v2616_v26 = vsel %vm445_vm0, %v8375_v24, 0.0 }
 0xdc2   : > { %v8380_v10 = vpop.eup %7016  ;;  %v2613_v56 = vsel %vm445_vm0, %v7015_v25, 0.0 }
 0xdc3   : > { %v8383_v36 = vpop.eup %7018  ;;  %v2622_v34 = vsel %vm445_vm0, %v8380_v10, 0.0 }
 0xdc4   : > { %2617 = vadd.xlane.f32.xlu0 %v2616_v26  ;;  %v2619_v30 = vsel %vm445_vm0, %v8383_v36, 0.0 }
 0xdc5   : > { %2614 = vadd.xlane.f32.xlu1 %v2613_v56 }
 0xdc8   : > { %2623 = vadd.xlane.f32.xlu0 %v2622_v34 }
 0xdc9   : > { %2620 = vadd.xlane.f32.xlu1 %v2619_v30 }
 0xdda   : > { %6783 = vrot.lane.b32.xlu1 %v8391_v37, %s7394_s16 }
 0xdde   : > { %6788 = vrot.lane.b32.xlu0 %v8397_v28, %s7394_s16 }
 0xe49   : > { %v2886_v0 = vpop.xlane.xlu0 %2885 }
 0xe4a   : > { %7020 = vrcp.f32 %v2886_v0  ;;  %v2883_v3 = vpop.xlane.xlu1 %2882 }
 0xe4b   : > { %7022 = vrcp.f32 %v2883_v3 }
 0xe4d   : > { %v2892_v23 = vpop.xlane.xlu0 %2891 }
 0xe4e   : > { %7024 = vrcp.f32 %v2892_v23  ;;  %v2889_v38 = vpop.xlane.xlu1 %2888 }
 0xe4f   : > { %7026 = vrcp.f32 %v2889_v38 }
 0xe51   : > { %v2618_v18 = vpop.xlane.xlu0 %2617 }
 0xe52   : > { %v2615_v19 = vpop.xlane.xlu1 %2614 }
 0xe53   : > { %7028 = vrcp.f32 %v2615_v19  ;;  %v9186_v19 = vmov 1.0|1.0  }
 0xe54   : > { %v7021_v11 = vpop.eup %7020  ;;  %7030 = vrcp.f32 %v2618_v18 }
 0xe55   : > { %v7023_v40 = vpop.eup %7022  ;;  %v2624_v52 = vpop.xlane.xlu0 %2623  ;;  %v2898_v54 = vmul.f32 %v7021_v11, %v2878_v61 }
 0xe56   : > { %v2621_v27 = vpop.xlane.xlu1 %2620  ;;  %v2897_v13 = vmul.f32 %v7023_v40, %v2877_v21 }
 0xe57   : > { %v3001_v2 = vsel %vm445_vm0, %v2898_v54, 0.0  ;;  %7032 = vrcp.f32 %v2621_v27 }
 0xe58   : > { %v7025_v42 = vpop.eup %7024  ;;  %3002 = vadd.xlane.f32.xlu0 %v3001_v2  ;;  %v2998_v31 = vsel %vm445_vm0, %v2897_v13, 0.0  ;;  %7034 = vrcp.f32 %v2624_v52 }
 0xe59   : > { %v7027_v58 = vpop.eup %7026  ;;  %v6789_v55 = vpop.permute.xlu0 %6788  ;;  %2999 = vadd.xlane.f32.xlu1 %v2998_v31  ;;  %v2900_v51 = vmul.f32 %v7025_v42, %v2880_v49 }
 0xe5a   : > { %v6791_v45 = vunpack.i.h.bf16 %v6789_v55  ;;  %v6784_v16 = vpop.permute.xlu1 %6783  ;;  %v2899_v26 = vmul.f32 %v7027_v58, %v2879_v15  ;;  %v6790_v56 = vunpack.i.l.bf16 %v6789_v55 }
 0xe5b   : > { %v6786_v34 = vunpack.i.h.bf16 %v6784_v16  ;;  %v6785_v30 = vunpack.i.l.bf16 %v6784_v16  ;;  %v3007_v20 = vsel %vm445_vm0, %v2900_v51, 0.0 }
 0xe5c   : > { %3008 = vadd.xlane.f32.xlu0 %v3007_v20  ;;  %v3004_v14 = vsel %vm445_vm0, %v2899_v26, 0.0  ;;  %v6500_v3 = vpack.c.bf16 %v6791_v45, %v6790_v56 }
 0xe5d   : > { %v7029_v0 = vpop.eup %7028  ;;  %3005 = vadd.xlane.f32.xlu1 %v3004_v14  ;;  %v6496_v5 = vpack.c.bf16 %v6786_v34, %v6785_v30 }
 0xe5e   : > { %v2629_v35 = vmul.f32 %v7029_v0, %v7015_v25  ;;  %v7031_v23 = vpop.eup %7030 }
 0xe5f   : > { %6497 = vmatprep.subr.bf16.mxu0 %v6496_v5  ;;  %v2630_v18 = vmul.f32 %v7031_v23, %v8375_v24 }
 0xe60   : > { %6499 = vmatpush3.bf16.msra.mxu0 %v6496_v5  ;;  %6136 = vmatprep.mubr.msk.f32.mxu0 %vm445_vm0, %v2629_v35 }
 0xe61   : > { %6501 = vmatprep.subr.bf16.mxu0 %v6500_v3  ;;  %v7033_v38 = vpop.eup %7032 }
 0xe62   : > { %v7035_v61 = vpop.eup %7034  ;;  %v2631_v11 = vmul.f32 %v7033_v38, %v8383_v36 }
 0xe63   : > { %v2632_v25 = vmul.f32 %v7035_v61, %v8380_v10 }
 0xe64   : > { %6503 = vmatpush3.bf16.msra.mxu0 %v6500_v3 }
 0xe65   : > { %6517 = vmatprep.subr.msk.bf16.mxu0 %vm7777_vm11, %v9186_v19 }
 0xe67   : > { %6137 = vmatmul.mubr.msk.f32.vlgmr.msra.gmra.mrb[28].mxu0 %vm445_vm0, %v2630_v18 }
 0xe68   : > { %6139 = vmatprep.mubr.msk.f32.mxu0 %vm445_vm0, %v2631_v11  ;;  %6519 = vmatpush3.bf16.msk.msra.mxu0 %vm7777_vm11, %v9186_v19 }
 0xe69   : > { %6521 = vmatprep.subr.msk.bf16.mxu0 %vm7781_vm12, %v9186_v19 }
 0xe6b   : > { %6140 = vmatmul.mubr.msk.f32.gmra.mrb[30].mxu0 %vm445_vm0, %v2632_v25 }
 0xe6c   : > { %6523 = vmatpush3.bf16.msk.msra.mxu0 %vm7781_vm12, %v9186_v19  ;;  %6164 = vmatprep.mubr.msk.f32.mxu0 %vm445_vm0, %v2897_v13 }
 0xe6f   : > { %6165 = vmatmul.mubr.msk.f32.vlgmr.msra.gmra.mrb[32].mxu0 %vm445_vm0, %v2898_v54 }
 0xe70   : > { %6167 = vmatprep.mubr.msk.f32.mxu0 %vm445_vm0, %v2899_v26 }
 0xe73   : > { %6168 = vmatmul.mubr.msk.f32.gmra.mrb[34].mxu0 %vm445_vm0, %v2900_v51 }
 0xee5   : > { %v3003_v40 = vpop.xlane.xlu0 %3002 }
 0xee6   : > { %v3000_v52 = vpop.xlane.xlu1 %2999 }
 0xee9   : > { %v3009_v42 = vpop.xlane.xlu0 %3008 }
 0xeea   : > { %v3006_v58 = vpop.xlane.xlu1 %3005 }
 0xf3a   : > { %v8432_v24 = vpop.f32.mrb[28].mxu0 }
 0xf3b   : > { %v8434_v10 = vpop.f32.mrb[29].mxu0 }
 0xf3e   : > { %v8436_v36 = vpop.f32.mrb[30].mxu0 }
 0xf3f   : > { %v8438_v21 = vpop.f32.mrb[31].mxu0 }
 0xf42   : > { %v6166_v27 = vpop.f32.mrb[32].mxu0 }
 0xf43   : > { %v3011_v2 = vsub.f32 %v3003_v40, %v6166_v27  ;;  %v2979_v49 = vpop.f32.mrb[33].mxu0 }
 0xf44   : > { %v3010_v13 = vsub.f32 %v3000_v52, %v2979_v49 }
 0xf45   : > { %v3015_v54 = vmul.f32 %v8304_v50, %v3011_v2 }
 0xf46   : > { %v3014_v31 = vmul.f32 %v8308_v7, %v3010_v13  ;;  %v6169_v15 = vpop.f32.mrb[34].mxu0 }
 0xf47   : > { %v3019_v55 = vmax.f32 %v3015_v54, 0.0  ;;  %v3013_v51 = vsub.f32 %v3009_v42, %v6169_v15  ;;  %v2989_v45 = vpop.f32.mrb[35].mxu0 }
 0xf48   : > { %v3018_v16 = vmax.f32 %v3014_v31, 0.0  ;;  %v3012_v26 = vsub.f32 %v3006_v58, %v2989_v45 }
 0xf49   : > { %7036 = vrsqrt.f32 %v3019_v55  ;;  %v3017_v56 = vmul.f32 %v8312_v44, %v3013_v51  ;;  %vm3031_vm9 = vcmp.eq.f32.partialorder %v3019_v55, inf  ;;  %v3034_v0 = vand.u32 2147483648, %v3019_v55 }
 0xf4a   : > { %7038 = vrsqrt.f32 %v3018_v16  ;;  %v3016_v34 = vmul.f32 %v8316_v60, %v3012_v26  ;;  %vm3033_vm10 = vcmp.eq.f32.partialorder %v3019_v55, 0.0  ;;  %vm3024_vm13 = vcmp.eq.f32.partialorder %v3018_v16, inf }
 0xf4b   : > { %v3021_v30 = vmax.f32 %v3017_v56, 0.0  ;;  %v3027_v3 = vand.u32 2147483648, %v3018_v16  ;;  %vm3026_vm14 = vcmp.eq.f32.partialorder %v3018_v16, 0.0 }
 0xf4c   : > { %v3020_v20 = vmax.f32 %v3016_v34, 0.0 }
 0xf4d   : > { %7040 = vrsqrt.f32 %v3021_v30  ;;  %vm3045_vm7 = vcmp.eq.f32.partialorder %v3021_v30, inf  ;;  %vm3047_vm8 = vcmp.eq.f32.partialorder %v3021_v30, 0.0  ;;  %v3048_v40 = vand.u32 2147483648, %v3021_v30 }
 0xf4e   : > { %7042 = vrsqrt.f32 %v3020_v20  ;;  %v3041_v49 = vand.u32 2147483648, %v3020_v20 }
 0xf53   : > { %v7037_v50 = vpop.eup %7036 }
 0xf54   : > { %v7039_v14 = vpop.eup %7038  ;;  %v3030_v7 = vmul.f32 %v7037_v50, %v3019_v55 }
 0xf55   : > { %v3023_v5 = vmul.f32 %v7039_v14, %v3018_v16 }
 0xf56   : > { %v3032_v35 = vsel %vm3031_vm9, %v3019_v55, %v3030_v7  ;;  %vm3038_vm9 = vcmp.eq.f32.partialorder %v3020_v20, inf }
 0xf57   : > { %v7041_v23 = vpop.eup %7040  ;;  %v3035_v38 = vsel %vm3033_vm10, %v3034_v0, %v3032_v35  ;;  %v3025_v44 = vsel %vm3024_vm13, %v3018_v16, %v3023_v5  ;;  %vm3040_vm10 = vcmp.eq.f32.partialorder %v3020_v20, 0.0 }
 0xf58   : > { %v7043_v18 = vpop.eup %7042  ;;  %v3051_v60 = vmul.f32 %v3035_v38, %v7895_v4  ;;  %v3028_v61 = vsel %vm3026_vm14, %v3027_v3, %v3025_v44  ;;  %v3044_v11 = vmul.f32 %v7041_v23, %v3021_v30 }
 0xf59   : > { %v3050_v25 = vmul.f32 %v3028_v61, %v7905_v22  ;;  %v3037_v52 = vmul.f32 %v7043_v18, %v3020_v20 }
 0xf5a   : > { %v3056_v27 = vmul.f32 1.442695, %v3051_v60  ;;  %v3046_v2 = vsel %vm3045_vm7, %v3021_v30, %v3044_v11 }
 0xf5b   : > { %v3054_v13 = vmul.f32 1.442695, %v3050_v25  ;;  %v3049_v54 = vsel %vm3047_vm8, %v3048_v40, %v3046_v2  ;;  %v3039_v42 = vsel %vm3038_vm9, %v3020_v20, %v3037_v52 }
 0xf5c   : > { %7044 = vpow2.f32 %v3056_v27  ;;  %v3053_v31 = vmul.f32 %v3049_v54, %v7909_v57  ;;  %v3042_v15 = vsel %vm3040_vm10, %v3041_v49, %v3039_v42 }
 0xf5d   : > { %7046 = vpow2.f32 %v3054_v13  ;;  %v3052_v58 = vmul.f32 %v3042_v15, %v7903_v62 }
 0xf5e   : > { %v3060_v55 = vmul.f32 1.442695, %v3053_v31 }
 0xf5f   : > { %v3058_v51 = vmul.f32 1.442695, %v3052_v58 }
 0xf60   : > { %7048 = vpow2.f32 %v3060_v55 }
 0xf61   : > { %7050 = vpow2.f32 %v3058_v51 }
 0xf66   : > { %v7045_v45 = vpop.eup %7044 }
 0xf67   : > { %v7047_v16 = vpop.eup %7046  ;;  %v3063_v26 = vmax.f32 %v7045_v45, 1e-05 }
 0xf68   : > { %v3062_v56 = vmax.f32 %v7047_v16, 1e-05  ;;  %v3231_v16 = vld [vmem:[#allocation7 + $0x98] sm:$0xff] }
 0xf69   : > { %v3067_v34 = vmin.f32 %v3063_v26, 100000.0  ;;  %v3232_v26 = vld [vmem:[#allocation7 + $0xa0] sm:$0xff] }
 0xf6a   : > { %v7049_v30 = vpop.eup %7048  ;;  %v3066_v50 = vmin.f32 %v3062_v56, 100000.0  ;;  %v6532_v56 = vpack.c.bf16 %v3232_v26, %v3231_v16 }
 0xf6b   : > { %v7051_v14 = vpop.eup %7050  ;;  %v3071_v20 = vmul.f32 %v3067_v34, %v8336_v63  ;;  %v3065_v7 = vmax.f32 %v7049_v30, 1e-05 }
 0xf6c   : > { %v3070_v0 = vmul.f32 %v3066_v50, %v8341_v6  ;;  %v3064_v5 = vmax.f32 %v7051_v14, 1e-05  ;;  %6533 = vmatprep.subr.bf16.mxu1 %v6532_v56 }
 0xf6d   : > { %v3075_v35 = vsel %vm7714_vm4, %v3071_v20, -1e+32  ;;  %v3069_v3 = vmin.f32 %v3065_v7, 100000.0  ;;  %6535 = vmatpush3.bf16.msra.mxu1 %v6532_v56 }
 0xf6e   : > { %v3081_v23 = vsel %vm445_vm0, %v3075_v35, -inf  ;;  %v3074_v38 = vsel %vm7701_vm3, %v3070_v0, -1e+32  ;;  %v3068_v44 = vmin.f32 %v3064_v5, 100000.0 }
 0xf6f   : > { %3082 = vmax.xlane.f32.xlu0 %v3081_v23  ;;  %v3078_v18 = vsel %vm445_vm0, %v3074_v38, -inf  ;;  %v3073_v60 = vmul.f32 %v3069_v3, %v8350_v32 }
 0xf70   : > { %3079 = vmax.xlane.f32.xlu1 %v3078_v18  ;;  %v3072_v63 = vmul.f32 %v3068_v44, %v8357_v59 }
 0xf71   : > { %v3077_v6 = vsel %vm7740_vm6, %v3073_v60, -1e+32 }
 0xf72   : > { %v3087_v33 = vsel %vm445_vm0, %v3077_v6, -inf  ;;  %v3076_v61 = vsel %vm7727_vm5, %v3072_v63, -1e+32 }
 0xf73   : > { %3088 = vmax.xlane.f32.xlu0 %v3087_v33  ;;  %v3084_v29 = vsel %vm445_vm0, %v3076_v61, -inf }
 0xf74   : > { %3085 = vmax.xlane.f32.xlu1 %v3084_v29  ;;  %v2743_v29 = vld [vmem:[#allocation7 + $0x90] sm:$0xff] }
 0xffc   : > { %v3083_v11 = vpop.xlane.xlu0 %3082 }
 0xffd   : > { %v3091_v25 = vsub.f32 %v3075_v35, %v3083_v11  ;;  %v3080_v40 = vpop.xlane.xlu1 %3079 }
 0xffe   : > { %v3090_v52 = vsub.f32 %v3074_v38, %v3080_v40 }
 0xfff   : > { %v3096_v32 = vmul.f32 1.442695, %v3091_v25 }
0x1000   : > { %v3094_v27 = vmul.f32 1.442695, %v3090_v52  ;;  %v3089_v2 = vpop.xlane.xlu0 %3088 }
0x1001   : > { %7052 = vpow2.f32 %v3096_v32  ;;  %v3093_v59 = vsub.f32 %v3077_v6, %v3089_v2  ;;  %v3086_v43 = vpop.xlane.xlu1 %3085 }
0x1002   : > { %7054 = vpow2.f32 %v3094_v27  ;;  %v3092_v49 = vsub.f32 %v3076_v61, %v3086_v43  ;;  %v2742_v61 = vld [vmem:[#allocation7 + $0x88] sm:$0xff] }
0x1003   : > { %v3100_v13 = vmul.f32 1.442695, %v3093_v59  ;;  %v6536_v11 = vpack.c.bf16 %v2743_v29, %v2742_v61  ;;  %v5602_v27 = vld [vmem:[#allocation7 + $0xc9] ss:$0 sm:$0xff]  ;;  %v8511_v61 = vld [vmem:[#allocation7 + $0xd0] sm:$0xff]  ;;  %v8513_v29 = vld [vmem:[#allocation7 + $0xd8] sm:$0xff] }
0x1004   : > { %v3098_v54 = vmul.f32 1.442695, %v3092_v49 }
0x1005   : > { %7056 = vpow2.f32 %v3100_v13  ;;  %6537 = vmatprep.subr.bf16.mxu1 %v6536_v11  ;;  %v7207_v13 = vld [vmem:[%s8083_s28 + $0x8] sm:$0xff] }
0x1006   : > { %7058 = vpow2.f32 %v3098_v54 }
0x100b   : > { %v7053_v39 = vpop.eup %7052 }
0x100c   : > { %v7055_v42 = vpop.eup %7054  ;;  %v3105_v31 = vsel %vm445_vm0, %v7053_v39, 0.0 }
0x100d   : > { %3106 = vadd.xlane.f32.xlu0 %v3105_v31  ;;  %v3102_v15 = vsel %vm445_vm0, %v7055_v42, 0.0 }
0x100e   : > { %3103 = vadd.xlane.f32.xlu1 %v3102_v15 }
0x100f   : > { %v7057_v58 = vpop.eup %7056 }
0x1010   : > { %v7059_v55 = vpop.eup %7058  ;;  %v3111_v51 = vsel %vm445_vm0, %v7057_v58, 0.0 }
0x1011   : > { %3112 = vadd.xlane.f32.xlu0 %v3111_v51  ;;  %v3108_v45 = vsel %vm445_vm0, %v7059_v55, 0.0  ;;  %v7210_v51 = vld [vmem:[%s8083_s28 + $0x10] sm:$0xff] }
0x1012   : > { %3109 = vadd.xlane.f32.xlu1 %v3108_v45 }
0x1023   : > { %6793 = vrot.lane.b32.xlu1 %v8391_v37, %s7395_s10 }
0x1027   : > { %6798 = vrot.lane.b32.xlu0 %v8397_v28, %s7395_s10 }
0x109a   : > { %v3107_v34 = vpop.xlane.xlu0 %3106 }
0x109b   : > { %v3104_v30 = vpop.xlane.xlu1 %3103 }
0x109c   : > { %7060 = vrcp.f32 %v3104_v30 }
0x109d   : > { %7062 = vrcp.f32 %v3107_v34 }
0x109e   : > { %v3113_v50 = vpop.xlane.xlu0 %3112 }
0x109f   : > { %v3110_v14 = vpop.xlane.xlu1 %3109 }
0x10a0   : > { %7064 = vrcp.f32 %v3110_v14 }
0x10a1   : > { %7066 = vrcp.f32 %v3113_v50 }
0x10a2   : > { %v6799_v20 = vpop.permute.xlu0 %6798 }
0x10a3   : > { %v6794_v7 = vpop.permute.xlu1 %6793  ;;  %v6801_v0 = vunpack.i.h.bf16 %v6799_v20  ;;  %v6800_v5 = vunpack.i.l.bf16 %v6799_v20 }
0x10a4   : > { %v6796_v37 = vunpack.i.h.bf16 %v6794_v7  ;;  %v6795_v35 = vunpack.i.l.bf16 %v6794_v7 }
0x10a5   : > { %v6528_v38 = vpack.c.bf16 %v6801_v0, %v6800_v5 }
0x10a6   : > { %v7061_v28 = vpop.eup %7060  ;;  %v6524_v3 = vpack.c.bf16 %v6796_v37, %v6795_v35 }
0x10a7   : > { %v3118_v23 = vmul.f32 %v7061_v28, %v7055_v42  ;;  %v7063_v44 = vpop.eup %7062 }
0x10a8   : > { %6525 = vmatprep.subr.bf16.mxu0 %v6524_v3  ;;  %v3119_v60 = vmul.f32 %v7063_v44, %v7053_v39  ;;  %v7208_v39 = vld [vmem:[%s8083_s28] sm:$0xff] }
0x10a9   : > { %6527 = vmatpush3.bf16.msra.mxu0 %v6524_v3  ;;  %6178 = vmatprep.mubr.msk.f32.mxu0 %vm445_vm0, %v3118_v23 }
0x10aa   : > { %6529 = vmatprep.subr.bf16.mxu0 %v6528_v38  ;;  %v7065_v18 = vpop.eup %7064 }
0x10ab   : > { %v7067_v63 = vpop.eup %7066  ;;  %v3120_v6 = vmul.f32 %v7065_v18, %v7059_v55 }
0x10ac   : > { %v3121_v33 = vmul.f32 %v7067_v63, %v7057_v58  ;;  %v7209_v58 = vld [vmem:[%s8083_s28 + $0x18] sm:$0xff] }
0x10ad   : > { %6531 = vmatpush3.bf16.msra.mxu0 %v6528_v38 }
0x10b0   : > { %6179 = vmatmul.mubr.msk.f32.vlgmr.msra.gmra.mrb[36].mxu0 %vm445_vm0, %v3119_v60 }
0x10b1   : > { %6181 = vmatprep.mubr.msk.f32.mxu0 %vm445_vm0, %v3120_v6 }
0x10b4   : > { %6182 = vmatmul.mubr.msk.f32.gmra.mrb[38].mxu0 %vm445_vm0, %v3121_v33  ;;  %v7211_v33 = vld [vmem:[#allocation7 + $0x61] ss:$0 sm:$0xff] }
0x1183   : > { %v6180_v25 = vpop.f32.mrb[36].mxu0 }
0x1184   : > { %v3212_v40 = vpop.f32.mrb[37].mxu0 }
0x1185   : > { %6188 = vmatprep.mubr.msk.f32.mxu1 %vm543_vm1, %v3212_v40  ;;  %v8519_v40 = vld [vmem:[#allocation7 + $0xe8] sm:$0xff] }
0x1186   : > { %6189 = vmatmul.mubr.msk.f32.vlgmr.msra.gmra.mrb[28].mxu1 %vm543_vm1, %v6180_v25  ;;  %v8517_v25 = vld [vmem:[#allocation7 + $0xe0] sm:$0xff] }
0x1187   : > { %v6183_v52 = vpop.f32.mrb[38].mxu0  ;;  %6539 = vmatpush3.bf16.msra.mxu1 %v6536_v11  ;;  %v6540_v11 = vpack.c.bf16 %v8513_v29, %v8511_v61 }
0x1188   : > { %v3222_v32 = vpop.f32.mrb[39].mxu0 }
0x1189   : > { %6191 = vmatprep.mubr.msk.f32.mxu1 %vm543_vm1, %v3222_v32  ;;  %6541 = vmatprep.subr.bf16.mxu0 %v6540_v11 }
0x118a   : > { %6192 = vmatmul.mubr.msk.f32.gmra.mrb[30].mxu1 %vm543_vm1, %v6183_v52  ;;  %6543 = vmatpush3.bf16.msra.mxu0 %v6540_v11  ;;  %v6544_v52 = vpack.c.bf16 %v8519_v40, %v8517_v25 }
0x118b   : > { %6198 = vmatprep.mubr.msk.f32.mxu1 %vm543_vm1, %v8434_v10 }
0x118c   : > { %6545 = vmatprep.subr.bf16.mxu0 %v6544_v52 }
0x118e   : > { %6199 = vmatmul.mubr.msk.f32.vlgmr.msra.gmra.mrb[28].mxu1 %vm543_vm1, %v8432_v24  ;;  %6547 = vmatpush3.bf16.msra.mxu0 %v6544_v52 }
0x118f   : > { %6201 = vmatprep.mubr.msk.f32.mxu1 %vm543_vm1, %v8438_v21 }
0x1192   : > { %6202 = vmatmul.mubr.msk.f32.gmra.mrb[30].mxu1 %vm543_vm1, %v8436_v36 }
0x1261   : > { %v6200_v2 = vpop.f32.mrb[28].mxu1 }
0x1262   : > { %v3433_v59 = vadd.f32 %v6200_v2, %v5602_v27  ;;  %v3408_v43 = vpop.f32.mrb[29].mxu1 }
0x1263   : > { %v3432_v49 = vadd.f32 %v5602_v27, %v3408_v43 }
0x1264   : > { %v3437_v54 = vadd.f32 %v7207_v13, %v3433_v59 }
0x1265   : > { %v3436_v10 = vadd.f32 %v7208_v39, %v3432_v49  ;;  %v6203_v42 = vpop.f32.mrb[30].mxu1 }
0x1266   : > { %v3435_v31 = vadd.f32 %v6203_v42, %v5602_v27  ;;  %v3418_v24 = vpop.f32.mrb[31].mxu1  ;;  %v3443_v15 = vsel %vm445_vm0, %v3437_v54, 0.0 }
0x1267   : > { %v3434_v21 = vadd.f32 %v5602_v27, %v3418_v24  ;;  %3444 = vadd.xlane.f32.xlu0 %v3443_v15  ;;  %v3440_v36 = vsel %vm445_vm0, %v3436_v10, 0.0 }
0x1268   : > { %v3439_v55 = vadd.f32 %v7209_v58, %v3435_v31  ;;  %3441 = vadd.xlane.f32.xlu1 %v3440_v36 }
0x1269   : > { %v3438_v45 = vadd.f32 %v7210_v51, %v3434_v21 }
0x126a   : > { %v3449_v16 = vsel %vm445_vm0, %v3439_v55, 0.0 }
0x126b   : > { %3450 = vadd.xlane.f32.xlu0 %v3449_v16  ;;  %v3446_v26 = vsel %vm445_vm0, %v3438_v45, 0.0 }
0x126c   : > { %3447 = vadd.xlane.f32.xlu1 %v3446_v26 }
0x12f4   : > { %v3445_v56 = vpop.xlane.xlu0 %3444 }
0x12f5   : > { %v3453_v34 = vmul.f32 0.03125, %v3445_v56  ;;  %v3442_v30 = vpop.xlane.xlu1 %3441 }
0x12f6   : > { %v3452_v50 = vmul.f32 0.03125, %v3442_v30 }
0x12f7   : > { %v3457_v14 = vsub.f32 %v3437_v54, %v3453_v34 }
0x12f8   : > { %v3456_v20 = vsub.f32 %v3436_v10, %v3452_v50  ;;  %v3451_v7 = vpop.xlane.xlu0 %3450 }
0x12f9   : > { %v3455_v0 = vmul.f32 0.03125, %v3451_v7  ;;  %v3448_v5 = vpop.xlane.xlu1 %3447  ;;  %v3461_v37 = vmul.f32 %v3457_v14, %v3457_v14 }
0x12fa   : > { %v3454_v35 = vmul.f32 0.03125, %v3448_v5  ;;  %v3460_v28 = vmul.f32 %v3456_v20, %v3456_v20 }
0x12fb   : > { %v8496_v3 = vsub.f32 %v3439_v55, %v3455_v0  ;;  %v3467_v23 = vsel %vm445_vm0, %v3461_v37, 0.0 }
0x12fc   : > { %v8499_v38 = vsub.f32 %v3438_v45, %v3454_v35  ;;  %3468 = vadd.xlane.f32.xlu0 %v3467_v23  ;;  %v3464_v44 = vsel %vm445_vm0, %v3460_v28, 0.0  ;;  %v8559_v23 = vld [vmem:[#allocation7 + $0x130] ss:$0 sm:$0xff] }
0x12fd   : > { %3465 = vadd.xlane.f32.xlu1 %v3464_v44  ;;  %v3463_v18 = vmul.f32 %v8496_v3, %v8496_v3 }
0x12fe   : > { %v3462_v60 = vmul.f32 %v8499_v38, %v8499_v38 }
0x12ff   : > { %v3473_v63 = vsel %vm445_vm0, %v3463_v18, 0.0 }
0x1300   : > { %3474 = vadd.xlane.f32.xlu0 %v3473_v63  ;;  %v3470_v6 = vsel %vm445_vm0, %v3462_v60, 0.0 }
0x1301   : > { %3471 = vadd.xlane.f32.xlu1 %v3470_v6 }
0x1312   : > { %3493 = vrot.lane.b32.xlu1 %v5602_v27, %s7394_s16 }
0x1316   : > { %1974 = vrot.lane.b32.xlu1 %v7211_v33, %s7397_s1  ;;  %3500 = vrot.lane.b32.xlu0 %v5602_v27, %s7396_s7 }
0x1389   : > { %v3469_v32 = vpop.xlane.xlu0 %3468 }
0x138a   : > { %v3477_v27 = vmul.f32 0.03125, %v3469_v32  ;;  %v3466_v2 = vpop.xlane.xlu1 %3465 }
0x138b   : > { %v3476_v59 = vmul.f32 0.03125, %v3466_v2 }
0x138c   : > { %v3481_v43 = vadd.f32 1e-05, %v3477_v27 }
0x138d   : > { %v3480_v49 = vadd.f32 1e-05, %v3476_v59  ;;  %v3475_v13 = vpop.xlane.xlu0 %3474 }
0x138e   : > { %7068 = vrsqrt.f32 %v3481_v43  ;;  %v3479_v54 = vmul.f32 0.03125, %v3475_v13  ;;  %v3472_v39 = vpop.xlane.xlu1 %3471  ;;  %v9188_v13 = vld [vmem:[#allocation18_spill] sm:$0xff] }
0x138f   : > { %7070 = vrsqrt.f32 %v3480_v49  ;;  %v3478_v10 = vmul.f32 0.03125, %v3472_v39 }
0x1390   : > { %v3483_v42 = vadd.f32 1e-05, %v3479_v54  ;;  %v9189_v54 = vld [vmem:[#allocation17_spill] sm:$0xff] }
0x1391   : > { %v3482_v31 = vadd.f32 1e-05, %v3478_v10  ;;  %v3501_v50 = vpop.permute.xlu0 %3500  ;;  %vm8595_vm3 = vcmp.lt.s32.totalorder %v9189_v54, %v9188_v13 }
0x1392   : > { %7072 = vrsqrt.f32 %v3483_v42  ;;  %v3494_v24 = vpop.permute.xlu1 %3493 }
0x1393   : > { %7074 = vrsqrt.f32 %v3482_v31 }
0x1396   : > { %v1975_v15 = vpop.permute.xlu1 %1974 }
0x1397   : > { %v2062_v21 = vadd.f32 %v8295_v47, %v1975_v15  ;;  %v2057_v36 = vadd.f32 %v8297_v46, %v1975_v15  ;;  %v2067_v58 = vadd.f32 %v8301_v41, %v1975_v15  ;;  %v2072_v51 = vadd.f32 %v8299_v48, %v1975_v15 }
0x1398   : > { %v7069_v55 = vpop.eup %7068 }
0x1399   : > { %v7071_v45 = vpop.eup %7070  ;;  %v3489_v16 = vmul.f32 %v7069_v55, %v3457_v14  ;;  %v2076_v26 = vadd.f32 %v2062_v21, %v8219_v17  ;;  %v2075_v56 = vadd.f32 %v2057_v36, %v8216_v1  ;;  %v8532_v46 = vadd.f32 %v2067_v58, %v8227_v53 }
0x139a   : > { %v3488_v34 = vmul.f32 %v7071_v45, %v3456_v20  ;;  %v8535_v48 = vadd.f32 %v2072_v51, %v8225_v12 }
0x139b   : > { %v3497_v30 = vmul.f32 %v3494_v24, %v3489_v16  ;;  %v2083_v7 = vsel %vm445_vm0, %v2076_v26, 0.0  ;;  %v2080_v47 = vsel %vm445_vm0, %v2075_v56, 0.0  ;;  %v2086_v53 = vsel %vm445_vm0, %v8532_v46, 0.0 }
0x139c   : > { %v7073_v41 = vpop.eup %7072  ;;  %v3496_v0 = vmul.f32 %v3494_v24, %v3488_v34  ;;  %2084 = vadd.xlane.f32.xlu0 %v2083_v7  ;;  %2081 = vadd.xlane.f32.xlu1 %v2080_v47  ;;  %v2089_v12 = vsel %vm445_vm0, %v8535_v48, 0.0 }
0x139d   : > { %v7075_v17 = vpop.eup %7074  ;;  %v3491_v1 = vmul.f32 %v7073_v41, %v8496_v3  ;;  %v8541_v37 = vadd.f32 %v3501_v50, %v3497_v30  ;;  %v9195_v30 = vld [vmem:[#allocation20_spill] sm:$0xff]  ;;  %v9198_v41 = vld [vmem:[#allocation19_spill] sm:$0xff] }
0x139e   : > { %v3490_v14 = vmul.f32 %v7075_v17, %v8499_v38  ;;  %v8539_v20 = vadd.f32 %v3501_v50, %v3496_v0  ;;  %vm8621_vm5 = vcmp.lt.s32.totalorder %v9189_v54, %v9195_v30  ;;  %vm8630_vm6 = vcmp.lt.s32.totalorder %v9189_v54, %v9198_v41 }
0x139f   : > { %v3499_v5 = vmul.f32 %v3494_v24, %v3491_v1 }
0x13a0   : > { %v3498_v35 = vmul.f32 %v3494_v24, %v3490_v14  ;;  %6212 = vmatprep.mubr.msk.f32.mxu0 %vm445_vm0, %v8539_v20  ;;  %2087 = vadd.xlane.f32.xlu0 %v2086_v53  ;;  %v9192_v24 = vld [vmem:[#allocation16_spill] sm:$0xff] }
0x13a1   : > { %2090 = vadd.xlane.f32.xlu1 %v2089_v12  ;;  %6213 = vmatmul.mubr.msk.f32.vlgmr.msra.gmra.mrb[40].mxu0 %vm445_vm0, %v8541_v37  ;;  %v8553_v3 = vadd.f32 %v3501_v50, %v3499_v5  ;;  %vm8603_vm4 = vcmp.lt.s32.totalorder %v9189_v54, %v9192_v24 }
0x13a2   : > { %v8551_v28 = vadd.f32 %v3501_v50, %v3498_v35 }
0x13a4   : > { %6215 = vmatprep.mubr.msk.f32.mxu0 %vm445_vm0, %v8551_v28 }
0x13a5   : > { %6216 = vmatmul.mubr.msk.f32.gmra.mrb[42].mxu0 %vm445_vm0, %v8553_v3 }
0x1429   : > { %v2082_v2 = vpop.xlane.xlu1 %2081  ;;  %v2085_v59 = vpop.xlane.xlu0 %2084 }
0x142a   : > { %v2093_v43 = vmul.f32 0.03125, %v2085_v59  ;;  %v2092_v49 = vmul.f32 0.03125, %v2082_v2 }
0x142c   : > { %v8609_v55 = vsub.f32 %v2076_v26, %v2093_v43  ;;  %v8611_v51 = vsub.f32 %v2075_v56, %v2092_v49 }
0x142d   : > { %v2088_v36 = vpop.xlane.xlu0 %2087 }
0x142e   : > { %v2091_v42 = vpop.xlane.xlu1 %2090  ;;  %v2094_v56 = vmul.f32 0.03125, %v2088_v36 }
0x142f   : > { %v2095_v16 = vmul.f32 0.03125, %v2091_v42 }
0x1431   : > { %v8641_v53 = vsub.f32 %v8535_v48, %v2095_v16 }
0x1474   : > { %v6214_v38 = vpop.f32.mrb[40].mxu0 }
0x1475   : > { %v8562_v44 = vadd.f32 %v6214_v38, %v8559_v23  ;;  %v3595_v18 = vpop.f32.mrb[41].mxu0  ;;  %v2101_v38 = vmul.f32 %v8609_v55, %v8609_v55 }
0x1476   : > { %v8565_v60 = vadd.f32 %v8559_v23, %v3595_v18  ;;  %v8650_v18 = vsub.f32 %v8532_v46, %v2094_v56 }
0x1477   : > { %v2107_v48 = vsel %vm445_vm0, %v2101_v38, 0.0  ;;  %v6802_v38 = vpack.i.bf16 %v8513_v29, %v8511_v61 }
0x1478   : > { %v6556_v63 = vpack.c.bf16 %v8562_v44, %v8565_v60  ;;  %v6217_v6 = vpop.f32.mrb[42].mxu0  ;;  %6240 = vmatprep.mubr.msk.f32.mxu1 %vm543_vm1, %v8565_v60  ;;  %v2102_v2 = vmul.f32 %v8650_v18, %v8650_v18 }
0x1479   : > { %v8572_v33 = vadd.f32 %v6217_v6, %v8559_v23  ;;  %v3605_v11 = vpop.f32.mrb[43].mxu0  ;;  %v2100_v6 = vmul.f32 %v8611_v51, %v8611_v51 }
0x147a   : > { %v8575_v52 = vadd.f32 %v8559_v23, %v3605_v11  ;;  %6558 = vmatprep.subr.msk.bf16.mxu1 %vm7664_vm2, %v6556_v63  ;;  %v2103_v11 = vmul.f32 %v8641_v53, %v8641_v53  ;;  %v2110_v59 = vsel %vm445_vm0, %v2102_v2, 0.0 }
0x147b   : > { %6561 = vmatpush3.bf16.xpose.msk.msra.mxu1 %vm7664_vm2, %v6556_v63 }
0x147c   : > { %v6562_v27 = vpack.c.bf16 %v8572_v33, %v8575_v52  ;;  %v2113_v46 = vsel %vm445_vm0, %v2103_v11, 0.0 }
0x147e   : > { %6564 = vmatprep.subr.msk.bf16.mxu1 %vm7664_vm2, %v6562_v27 }
0x1483   : > { %6567 = vmatpush3.bf16.xpose.msk.msra.mxu1 %vm7664_vm2, %v6562_v27  ;;  %v2104_v27 = vsel %vm445_vm0, %v2100_v6, 0.0 }
0x148a   : > { %6241 = vmatmul.mubr.msk.f32.vlgmr.msra.gmra.mrb[32].mxu1 %vm543_vm1, %v8562_v44 }
0x148b   : > { %6243 = vmatprep.mubr.msk.f32.mxu1 %vm543_vm1, %v8575_v52 }
0x148e   : > { %6244 = vmatmul.mubr.msk.f32.gmra.mrb[34].mxu1 %vm543_vm1, %v8572_v33 }
0x155d   : > { %v6242_v10 = vpop.f32.mrb[32].mxu1 }
0x155e   : > { %v8599_v31 = vmul.f32 0.25, %v6242_v10  ;;  %v3809_v21 = vpop.f32.mrb[33].mxu1 }
0x155f   : > { %v8607_v58 = vmul.f32 0.25, %v3809_v21 }
0x1560   : > { %v3833_v45 = vsel %vm8595_vm3, %v8599_v31, -1e+32 }
0x1561   : > { %v3832_v34 = vsel %vm8603_vm4, %v8607_v58, -1e+32  ;;  %v6245_v7 = vpop.f32.mrb[34].mxu1  ;;  %v3839_v26 = vsel %vm445_vm0, %v3833_v45, -inf }
0x1562   : > { %v8626_v47 = vmul.f32 0.25, %v6245_v7  ;;  %v3819_v17 = vpop.f32.mrb[35].mxu1  ;;  %3840 = vmax.xlane.f32.xlu1 %v3839_v26  ;;  %v3836_v1 = vsel %vm445_vm0, %v3832_v34, -inf }
0x1563   : > { %v8635_v14 = vmul.f32 0.25, %v3819_v17  ;;  %3837 = vmax.xlane.f32.xlu0 %v3836_v1 }
0x1564   : > { %v3835_v5 = vsel %vm8621_vm5, %v8626_v47, -1e+32 }
0x1565   : > { %v3834_v35 = vsel %vm8630_vm6, %v8635_v14, -1e+32  ;;  %v3845_v12 = vsel %vm445_vm0, %v3835_v5, -inf }
0x1566   : > { %3846 = vmax.xlane.f32.xlu1 %v3845_v12  ;;  %v3842_v63 = vsel %vm445_vm0, %v3834_v35, -inf  ;;  %v6807_v12 = vpack.i.bf16 %v8519_v40, %v8517_v25 }
0x1567   : > { %3843 = vmax.xlane.f32.xlu0 %v3842_v63  ;;  %v8681_v63 = vld [vmem:[#allocation7 + $0x62] ss:$0 sm:$0xff] }
0x156a   : > { %2108 = vadd.xlane.f32.xlu1 %v2107_v48 }
0x156b   : > { %2105 = vadd.xlane.f32.xlu0 %v2104_v27 }
0x156e   : > { %2114 = vadd.xlane.f32.xlu1 %v2113_v46 }
0x156f   : > { %2111 = vadd.xlane.f32.xlu0 %v2110_v59 }
0x15ef   : > { %v3841_v43 = vpop.xlane.xlu1 %3840 }
0x15f0   : > { %v3849_v49 = vsub.f32 %v3833_v45, %v3841_v43  ;;  %v3838_v13 = vpop.xlane.xlu0 %3837 }
0x15f1   : > { %v3848_v54 = vsub.f32 %v3832_v34, %v3838_v13 }
0x15f2   : > { %v3854_v10 = vmul.f32 1.442695, %v3849_v49 }
0x15f3   : > { %v3852_v42 = vmul.f32 1.442695, %v3848_v54  ;;  %v3847_v21 = vpop.xlane.xlu1 %3846  ;;  %v9201_v54 = vmov 0.0  }
0x15f4   : > { %7076 = vpow2.f32 %v3854_v10  ;;  %v3851_v36 = vsub.f32 %v3835_v5, %v3847_v21  ;;  %v3844_v16 = vpop.xlane.xlu0 %3843  ;;  %v8698_v10 = vsel %vm8595_vm3, 1.0, %v9201_v54 }
0x15f5   : > { %7078 = vpow2.f32 %v3852_v42  ;;  %v3850_v30 = vsub.f32 %v3834_v35, %v3844_v16 }
0x15f6   : > { %v3858_v7 = vmul.f32 1.442695, %v3851_v36 }
0x15f7   : > { %v3856_v26 = vmul.f32 1.442695, %v3850_v30  ;;  %v2109_v25 = vpop.xlane.xlu1 %2108 }
0x15f8   : > { %7080 = vpow2.f32 %v3858_v7  ;;  %v2106_v61 = vpop.xlane.xlu0 %2105  ;;  %v2117_v48 = vmul.f32 0.03125, %v2109_v25  ;;  %v8703_v7 = vsel %vm8603_vm4, 1.0, %v9201_v54 }
0x15f9   : > { %7082 = vpow2.f32 %v3856_v26  ;;  %v2116_v29 = vmul.f32 0.03125, %v2106_v61 }
0x15fa   : > { %v2121_v2 = vadd.f32 1e-05, %v2117_v48 }
0x15fb   : > { %v2120_v6 = vadd.f32 1e-05, %v2116_v29  ;;  %v2115_v27 = vpop.xlane.xlu1 %2114 }
0x15fc   : > { %v2112_v40 = vpop.xlane.xlu0 %2111  ;;  %v2119_v46 = vmul.f32 0.03125, %v2115_v27 }
0x15fd   : > { %v2118_v11 = vmul.f32 0.03125, %v2112_v40  ;;  %7084 = vrsqrt.f32 %v2120_v6 }
0x15fe   : > { %v7077_v56 = vpop.eup %7076  ;;  %7086 = vrsqrt.f32 %v2121_v2  ;;  %v2123_v59 = vadd.f32 1e-05, %v2119_v46 }
0x15ff   : > { %v8663_v41 = vpop.eup %7078  ;;  %v3867_v17 = vsel %vm445_vm0, %v7077_v56, 0.0 }
0x1600   : > { %3868 = vadd.xlane.f32.xlu1 %v3867_v17  ;;  %v3864_v45 = vsel %vm445_vm0, %v8663_v41, 0.0  ;;  %v3860_v6 = vmul.f32 %v8663_v41, %v8703_v7  ;;  %v8723_v41 = vsel %vm8621_vm5, 1.0, %v9201_v54 }
0x1601   : > { %3865 = vadd.xlane.f32.xlu0 %v3864_v45 }
0x1602   : > { %v8668_v34 = vpop.eup %7080 }
0x1603   : > { %v8670_v1 = vpop.eup %7082  ;;  %v3873_v5 = vsel %vm445_vm0, %v8668_v34, 0.0 }
0x1604   : > { %3874 = vadd.xlane.f32.xlu1 %v3873_v5  ;;  %v3870_v35 = vsel %vm445_vm0, %v8670_v1, 0.0 }
0x1605   : > { %3871 = vadd.xlane.f32.xlu0 %v3870_v35 }
0x1615   : > { %6808 = vrot.lane.b32.xlu1 %v6807_v12, %s7394_s16  ;;  %v8710_v12 = vsel %vm8630_vm6, 1.0, %v9201_v54 }
0x1619   : > { %2141 = vrot.lane.b32.xlu1 %v8681_v63, %s7394_s16 }
0x161b   : > { %6803 = vrot.lane.b32.xlu0 %v6802_v38, %s7394_s16 }
0x161d   : > { %4210 = vrot.lane.b32.xlu1 %v8562_v44, %s7391_s24  ;;  %v2122_v44 = vadd.f32 1e-05, %v2118_v11 }
0x161f   : > { %4208 = vrot.lane.b32.xlu0 %v8565_v60, %s7391_s24  ;;  %7088 = vrsqrt.f32 %v2122_v44 }
0x1621   : > { %4214 = vrot.lane.b32.xlu1 %v8572_v33, %s7391_s24 }
0x1623   : > { %4212 = vrot.lane.b32.xlu0 %v8575_v52, %s7391_s24  ;;  %v7085_v52 = vpop.eup %7084 }
0x1624   : > { %v2128_v13 = vmul.f32 %v7085_v52, %v8611_v51  ;;  %v7087_v21 = vpop.eup %7086  ;;  %v3861_v51 = vmul.f32 %v7077_v56, %v8698_v10 }
0x1625   : > { %v2129_v56 = vmul.f32 %v7087_v21, %v8609_v55 }
0x1626   : > { %v2136_v35 = vmul.f32 %v8681_v63, %v2128_v13  ;;  %v3863_v13 = vmul.f32 %v8668_v34, %v8723_v41 }
0x1629   : > { %v7089_v26 = vpop.eup %7088 }
0x162a   : > { %v2130_v46 = vmul.f32 %v7089_v26, %v8650_v18 }
0x162c   : > { %v2138_v54 = vmul.f32 %v8681_v63, %v2130_v46 }
0x168d   : > { %v3869_v60 = vpop.xlane.xlu1 %3868 }
0x168e   : > { %7090 = vrcp.f32 %v3869_v60  ;;  %v3866_v33 = vpop.xlane.xlu0 %3865  ;;  %v3862_v60 = vmul.f32 %v8670_v1, %v8710_v12  ;;  %v2137_v1 = vmul.f32 %v8681_v63, %v2129_v56 }
0x168f   : > { %7092 = vrcp.f32 %v3866_v33 }
0x1690   : > { %7094 = vrsqrt.f32 %v2123_v59 }
0x1691   : > { %v3875_v43 = vpop.xlane.xlu1 %3874 }
0x1692   : > { %v3872_v49 = vpop.xlane.xlu0 %3871 }
0x1693   : > { %7096 = vrcp.f32 %v3872_v49 }
0x1694   : > { %7098 = vrcp.f32 %v3875_v43 }
0x1695   : > { %v6809_v42 = vpop.permute.xlu1 %6808 }
0x1696   : > { %v6811_v36 = vunpack.i.h.bf16 %v6809_v42  ;;  %v6810_v16 = vunpack.i.l.bf16 %v6809_v42  ;;  %v6804_v30 = vpop.permute.xlu0 %6803 }
0x1697   : > { %v6806_v17 = vunpack.i.h.bf16 %v6804_v30  ;;  %v6805_v45 = vunpack.i.l.bf16 %v6804_v30 }
0x1698   : > { %v7091_v5 = vpop.eup %7090  ;;  %v6552_v61 = vpack.c.bf16 %v6811_v36, %v6810_v16 }
0x1699   : > { %v7093_v38 = vpop.eup %7092  ;;  %v6548_v29 = vpack.c.bf16 %v6806_v17, %v6805_v45  ;;  %v2142_v25 = vpop.permute.xlu1 %2141  ;;  %v3881_v40 = vmul.f32 %v7091_v5, %v3861_v51 }
0x169a   : > { %v2144_v48 = vadd.f32 %v2142_v25, %v2136_v35  ;;  %v4209_v11 = vpop.permute.xlu0 %4208  ;;  %v3880_v2 = vmul.f32 %v7093_v38, %v3860_v6  ;;  %v7095_v44 = vpop.eup %7094  ;;  %v2145_v21 = vadd.f32 %v2142_v25, %v2137_v1  ;;  %v2146_v34 = vadd.f32 %v2142_v25, %v2138_v54  ;;  %v8790_v1 = vld [vmem:[%s7632_s17 + $0x10] sm:$0xff] }
0x169b   : > { %6549 = vmatprep.subr.bf16.mxu0 %v6548_v29  ;;  %6282 = vmatprep.mubr.msk.f32.mxu1 %vm543_vm1, %v4209_v11  ;;  %v3984_v27 = vsel %vm445_vm0, %v3881_v40, 0.0  ;;  %v2131_v49 = vmul.f32 %v7095_v44, %v8641_v53 }
0x169c   : > { %6551 = vmatpush3.bf16.msra.mxu0 %v6548_v29  ;;  %3985 = vadd.xlane.f32.xlu1 %v3984_v27  ;;  %v3981_v59 = vsel %vm445_vm0, %v3880_v2, 0.0  ;;  %v8778_v27 = vld [vmem:[%s7632_s17] sm:$0xff] }
0x169d   : > { %v7097_v55 = vpop.eup %7096  ;;  %6226 = vmatprep.mubr.msk.f32.mxu0 %vm445_vm0, %v2144_v48  ;;  %v4211_v33 = vpop.permute.xlu1 %4210  ;;  %6553 = vmatprep.subr.bf16.mxu0 %v6552_v61  ;;  %v2139_v26 = vmul.f32 %v8681_v63, %v2131_v49  ;;  %v8774_v48 = vld [vmem:[%s7632_s17 + $0x8] sm:$0xff] }
0x169e   : > { %v7099_v52 = vpop.eup %7098  ;;  %3982 = vadd.xlane.f32.xlu0 %v3981_v59  ;;  %v6584_v18 = vpack.c.bf16 %v4211_v33, %v4209_v11  ;;  %v3882_v43 = vmul.f32 %v7097_v55, %v3862_v60  ;;  %v4213_v36 = vpop.permute.xlu0 %4212 }
0x169f   : > { %v3883_v53 = vmul.f32 %v7099_v52, %v3863_v13  ;;  %v2147_v17 = vadd.f32 %v2142_v25, %v2139_v26 }
0x16a0   : > { %6555 = vmatpush3.bf16.msra.mxu0 %v6552_v61  ;;  %6586 = vmatprep.subr.msk.bf16.mxu1 %vm7664_vm2, %v6584_v18  ;;  %v3987_v42 = vsel %vm445_vm0, %v3882_v43, 0.0 }
0x16a1   : > { %6589 = vmatpush3.bf16.xpose.msk.msra.mxu1 %vm7664_vm2, %v6584_v18  ;;  %v4215_v16 = vpop.permute.xlu1 %4214  ;;  %6569 = vmatprep.subr.msk.bf16.mxu0 %vm7777_vm11, %v9186_v19  ;;  %v3990_v45 = vsel %vm445_vm0, %v3883_v53, 0.0 }
0x16a2   : > { %3988 = vadd.xlane.f32.xlu0 %v3987_v42  ;;  %v6590_v30 = vpack.c.bf16 %v4215_v16, %v4213_v36 }
0x16a3   : > { %6227 = vmatmul.mubr.msk.f32.vlgmr.msra.gmra.mrb[44].mxu0 %vm445_vm0, %v2145_v21 }
0x16a4   : > { %6229 = vmatprep.mubr.msk.f32.mxu0 %vm445_vm0, %v2146_v34  ;;  %6571 = vmatpush3.bf16.msk.msra.mxu0 %vm7777_vm11, %v9186_v19 }
0x16a5   : > { %6592 = vmatprep.subr.msk.bf16.mxu1 %vm7664_vm2, %v6590_v30  ;;  %6573 = vmatprep.subr.msk.bf16.mxu0 %vm7781_vm12, %v9186_v19 }
0x16a6   : > { %3991 = vadd.xlane.f32.xlu0 %v3990_v45 }
0x16a7   : > { %6230 = vmatmul.mubr.msk.f32.gmra.mrb[46].mxu0 %vm445_vm0, %v2147_v17 }
0x16a8   : > { %6575 = vmatpush3.bf16.msk.msra.mxu0 %vm7781_vm12, %v9186_v19  ;;  %6254 = vmatprep.mubr.msk.f32.mxu0 %vm445_vm0, %v3880_v2 }
0x16a9   : > { %6595 = vmatpush3.bf16.xpose.msk.msra.mxu1 %vm7664_vm2, %v6590_v30 }
0x16ab   : > { %6255 = vmatmul.mubr.msk.f32.vlgmr.msra.gmra.mrb[48].mxu0 %vm445_vm0, %v3881_v40 }
0x16ac   : > { %6257 = vmatprep.mubr.msk.f32.mxu0 %vm445_vm0, %v3882_v43  ;;  %v8786_v43 = vld [vmem:[%s7632_s17 + $0x18] sm:$0xff]  ;;  %s9074_s17 = scalar_lea.hbm %s9124_s5, %s5679_s26 }
0x16af   : > { %6258 = vmatmul.mubr.msk.f32.gmra.mrb[50].mxu0 %vm445_vm0, %v3883_v53 }
0x16b0   : > { %6283 = vmatmul.mubr.msk.f32.vlgmr.msra.gmra.mrb[36].mxu1 %vm543_vm1, %v4211_v33 }
0x16b1   : > { %6285 = vmatprep.mubr.msk.f32.mxu1 %vm543_vm1, %v4213_v36 }
0x16b4   : > { %6286 = vmatmul.mubr.msk.f32.gmra.mrb[38].mxu1 %vm543_vm1, %v4215_v16 }
0x1729   : > { %v3986_v61 = vpop.xlane.xlu1 %3985 }
0x172b   : > { %v3983_v63 = vpop.xlane.xlu0 %3982 }
0x172f   : > { %v3989_v38 = vpop.xlane.xlu0 %3988 }
0x1733   : > { %v3992_v56 = vpop.xlane.xlu0 %3991 }
0x1776   : > { %v8765_v51 = vpop.f32.mrb[44].mxu0 }
0x1777   : > { %v8767_v5 = vpop.f32.mrb[45].mxu0 }
0x177a   : > { %v8769_v32 = vpop.f32.mrb[46].mxu0 }
0x177b   : > { %v8771_v35 = vpop.f32.mrb[47].mxu0 }
0x177e   : > { %v6256_v29 = vpop.f32.mrb[48].mxu0 }
0x177f   : > { %v3994_v25 = vsub.f32 %v3986_v61, %v6256_v29  ;;  %v3962_v40 = vpop.f32.mrb[49].mxu0 }
0x1780   : > { %v3993_v6 = vsub.f32 %v3983_v63, %v3962_v40 }
0x1781   : > { %v3998_v11 = vmul.f32 %v8774_v48, %v3994_v25 }
0x1782   : > { %v3997_v2 = vmul.f32 %v8778_v27, %v3993_v6  ;;  %v6259_v44 = vpop.f32.mrb[50].mxu0 }
0x1783   : > { %v4002_v46 = vmax.f32 %v3998_v11, 0.0  ;;  %v3996_v60 = vsub.f32 %v3992_v56, %v6259_v44  ;;  %v3972_v55 = vpop.f32.mrb[51].mxu0  ;;  %v8781_v59 = vpop.f32.mrb[36].mxu1 }
0x1784   : > { %v4001_v33 = vmax.f32 %v3997_v2, 0.0  ;;  %v3995_v52 = vsub.f32 %v3989_v38, %v3972_v55  ;;  %v8783_v18 = vpop.f32.mrb[37].mxu1 }
0x1785   : > { %7100 = vrsqrt.f32 %v4002_v46  ;;  %v4000_v49 = vmul.f32 %v8786_v43, %v3996_v60  ;;  %vm4014_vm2 = vcmp.eq.f32.partialorder %v4002_v46, inf  ;;  %v4017_v30 = vand.u32 2147483648, %v4002_v46 }
0x1786   : > { %7102 = vrsqrt.f32 %v4001_v33  ;;  %v3999_v13 = vmul.f32 %v8790_v1, %v3995_v52  ;;  %vm4016_vm13 = vcmp.eq.f32.partialorder %v4002_v46, 0.0  ;;  %vm4007_vm14 = vcmp.eq.f32.partialorder %v4001_v33, inf }
0x1787   : > { %v4004_v54 = vmax.f32 %v4000_v49, 0.0  ;;  %v8793_v42 = vpop.f32.mrb[38].mxu1  ;;  %v4010_v45 = vand.u32 2147483648, %v4001_v33  ;;  %vm4009_vm7 = vcmp.eq.f32.partialorder %v4001_v33, 0.0 }
0x1788   : > { %v4003_v21 = vmax.f32 %v3999_v13, 0.0  ;;  %v8795_v36 = vpop.f32.mrb[39].mxu1 }
0x1789   : > { %7104 = vrsqrt.f32 %v4004_v54  ;;  %vm4028_vm8 = vcmp.eq.f32.partialorder %v4004_v54, inf  ;;  %vm4030_vm9 = vcmp.eq.f32.partialorder %v4004_v54, 0.0  ;;  %v4031_v56 = vand.u32 2147483648, %v4004_v54 }
0x178a   : > { %7106 = vrsqrt.f32 %v4003_v21  ;;  %vm4021_vm10 = vcmp.eq.f32.partialorder %v4003_v21, inf }
0x178f   : > { %v7101_v16 = vpop.eup %7100 }
0x1790   : > { %v7103_v53 = vpop.eup %7102  ;;  %v4013_v34 = vmul.f32 %v7101_v16, %v4002_v46 }
0x1791   : > { %v4006_v26 = vmul.f32 %v7103_v53, %v4001_v33 }
0x1792   : > { %v4015_v17 = vsel %vm4014_vm2, %v4002_v46, %v4013_v34  ;;  %v4024_v46 = vand.u32 2147483648, %v4003_v21  ;;  %vm4023_vm2 = vcmp.eq.f32.partialorder %v4003_v21, 0.0 }
0x1793   : > { %v7105_v63 = vpop.eup %7104  ;;  %v4018_v38 = vsel %vm4016_vm13, %v4017_v30, %v4015_v17  ;;  %v4008_v61 = vsel %vm4007_vm14, %v4001_v33, %v4006_v26  ;;  %vm380_vm13 = vcmp.eq.s32.totalorder %v9192_v24, 0 }
0x1794   : > { %v7107_v29 = vpop.eup %7106  ;;  %v4034_v25 = vmul.f32 %v4018_v38, %v7895_v4  ;;  %v4011_v40 = vsel %vm4009_vm7, %v4010_v45, %v4008_v61  ;;  %v4027_v6 = vmul.f32 %v7105_v63, %v4004_v54 }
0x1795   : > { %v4033_v11 = vmul.f32 %v4011_v40, %v7905_v22  ;;  %v4020_v2 = vmul.f32 %v7107_v29, %v4003_v21 }
0x1796   : > { %v4039_v44 = vmul.f32 1.442695, %v4034_v25  ;;  %v4029_v60 = vsel %vm4028_vm8, %v4004_v54, %v4027_v6 }
0x1797   : > { %v4037_v55 = vmul.f32 1.442695, %v4033_v11  ;;  %v4032_v52 = vsel %vm4030_vm9, %v4031_v56, %v4029_v60  ;;  %v4022_v49 = vsel %vm4021_vm10, %v4003_v21, %v4020_v2  ;;  %v8809_v60 = vmul.f32 0.25, %v8781_v59 }
0x1798   : > { %7108 = vpow2.f32 %v4039_v44  ;;  %v4036_v33 = vmul.f32 %v4032_v52, %v7909_v57  ;;  %v4025_v13 = vsel %vm4023_vm2, %v4024_v46, %v4022_v49 }
0x1799   : > { %7110 = vpow2.f32 %v4037_v55  ;;  %v4035_v16 = vmul.f32 %v4025_v13, %v7903_v62  ;;  %v8833_v13 = vmul.f32 0.25, %v8795_v36 }
0x179a   : > { %v4043_v53 = vmul.f32 1.442695, %v4036_v33  ;;  %v4314_v33 = vsel %vm8595_vm3, %v8809_v60, -1e+32 }
0x179b   : > { %v4041_v34 = vmul.f32 1.442695, %v4035_v16  ;;  %v4320_v16 = vsel %vm445_vm0, %v4314_v33, -inf }
0x179c   : > { %7112 = vpow2.f32 %v4043_v53 }
0x179d   : > { %7114 = vpow2.f32 %v4041_v34  ;;  %v4315_v34 = vsel %vm8630_vm6, %v8833_v13, -1e+32 }
0x179e   : > { %v4323_v36 = vsel %vm445_vm0, %v4315_v34, -inf }
0x17a2   : > { %v7109_v30 = vpop.eup %7108 }
0x17a3   : > { %v7111_v26 = vpop.eup %7110  ;;  %v4046_v54 = vmax.f32 %v7109_v30, 1e-05 }
0x17a4   : > { %v4045_v17 = vmax.f32 %v7111_v26, 1e-05 }
0x17a5   : > { %v4050_v45 = vmin.f32 %v4046_v54, 100000.0 }
0x17a6   : > { %v7113_v63 = vpop.eup %7112  ;;  %v4049_v38 = vmin.f32 %v4045_v17, 100000.0 }
0x17a7   : > { %v7115_v61 = vpop.eup %7114  ;;  %v4054_v21 = vmul.f32 %v4050_v45, %v8599_v31  ;;  %v4048_v29 = vmax.f32 %v7113_v63, 1e-05 }
0x17a8   : > { %v4053_v25 = vmul.f32 %v4049_v38, %v8607_v58  ;;  %v4047_v40 = vmax.f32 %v7115_v61, 1e-05  ;;  %v8814_v58 = vmul.f32 0.25, %v8783_v18 }
0x17a9   : > { %v4058_v6 = vsel %vm8595_vm3, %v4054_v21, -1e+32  ;;  %v4052_v11 = vmin.f32 %v4048_v29, 100000.0 }
0x17aa   : > { %v4064_v56 = vsel %vm445_vm0, %v4058_v6, -inf  ;;  %v4057_v2 = vsel %vm8603_vm4, %v4053_v25, -1e+32  ;;  %v4051_v44 = vmin.f32 %v4047_v40, 100000.0 }
0x17ab   : > { %4065 = vmax.xlane.f32.xlu0 %v4064_v56  ;;  %v4061_v31 = vsel %vm445_vm0, %v4057_v2, -inf  ;;  %v4056_v46 = vmul.f32 %v4052_v11, %v8626_v47  ;;  %v8826_v47 = vmul.f32 0.25, %v8793_v42 }
0x17ac   : > { %4062 = vmax.xlane.f32.xlu1 %v4061_v31  ;;  %v4055_v55 = vmul.f32 %v4051_v44, %v8635_v14  ;;  %v4313_v14 = vsel %vm8603_vm4, %v8814_v58, -1e+32 }
0x17ad   : > { %v4060_v52 = vsel %vm8621_vm5, %v4056_v46, -1e+32  ;;  %v4316_v53 = vsel %vm8621_vm5, %v8826_v47, -1e+32  ;;  %v4317_v42 = vsel %vm445_vm0, %v4313_v14, -inf }
0x17ae   : > { %v4070_v49 = vsel %vm445_vm0, %v4060_v52, -inf  ;;  %v4059_v59 = vsel %vm8630_vm6, %v4055_v55, -1e+32  ;;  %v4326_v30 = vsel %vm445_vm0, %v4316_v53, -inf }
0x17af   : > { %4071 = vmax.xlane.f32.xlu0 %v4070_v49  ;;  %v4067_v18 = vsel %vm445_vm0, %v4059_v59, -inf }
0x17b0   : > { %4068 = vmax.xlane.f32.xlu1 %v4067_v18 }
0x17b3   : > { %4321 = vmax.xlane.f32.xlu0 %v4320_v16 }
0x17b4   : > { %4318 = vmax.xlane.f32.xlu1 %v4317_v42 }
0x17b7   : > { %4327 = vmax.xlane.f32.xlu0 %v4326_v30 }
0x17b8   : > { %4324 = vmax.xlane.f32.xlu1 %v4323_v36 }
0x1838   : > { %v4066_v26 = vpop.xlane.xlu0 %4065 }
0x1839   : > { %v4074_v54 = vsub.f32 %v4058_v6, %v4066_v26  ;;  %v4063_v17 = vpop.xlane.xlu1 %4062 }
0x183a   : > { %v4073_v29 = vsub.f32 %v4057_v2, %v4063_v17 }
0x183b   : > { %v4079_v45 = vmul.f32 1.442695, %v4074_v54 }
0x183c   : > { %v4072_v63 = vpop.xlane.xlu0 %4071  ;;  %v4077_v31 = vmul.f32 1.442695, %v4073_v29 }
0x183d   : > { %7116 = vpow2.f32 %v4079_v45  ;;  %v4076_v38 = vsub.f32 %v4060_v52, %v4072_v63  ;;  %v4069_v61 = vpop.xlane.xlu1 %4068 }
0x183e   : > { %v4075_v42 = vsub.f32 %v4059_v59, %v4069_v61 }
0x183f   : > { %v4083_v21 = vmul.f32 1.442695, %v4076_v38 }
0x1840   : > { %v4322_v25 = vpop.xlane.xlu0 %4321  ;;  %v4081_v30 = vmul.f32 1.442695, %v4075_v42 }
0x1841   : > { %7118 = vpow2.f32 %v4083_v21  ;;  %v4330_v40 = vsub.f32 %v4314_v33, %v4322_v25  ;;  %v4319_v11 = vpop.xlane.xlu1 %4318 }
0x1842   : > { %v4329_v56 = vsub.f32 %v4313_v14, %v4319_v11 }
0x1843   : > { %v4335_v44 = vmul.f32 1.442695, %v4330_v40 }
0x1844   : > { %v4333_v46 = vmul.f32 1.442695, %v4329_v56  ;;  %v4328_v55 = vpop.xlane.xlu0 %4327 }
0x1845   : > { %7120 = vpow2.f32 %v4335_v44  ;;  %v4332_v49 = vsub.f32 %v4316_v53, %v4328_v55  ;;  %v4325_v6 = vpop.xlane.xlu1 %4324 }
0x1846   : > { %7122 = vpow2.f32 %v4333_v46  ;;  %v4331_v18 = vsub.f32 %v4315_v34, %v4325_v6 }
0x1847   : > { %v8845_v16 = vpop.eup %7116  ;;  %v4339_v52 = vmul.f32 1.442695, %v4332_v49  ;;  %7124 = vpow2.f32 %v4077_v31 }
0x1848   : > { %v4337_v2 = vmul.f32 1.442695, %v4331_v18  ;;  %v4088_v33 = vsel %vm445_vm0, %v8845_v16, 0.0 }
0x1849   : > { %7126 = vpow2.f32 %v4339_v52  ;;  %4089 = vadd.xlane.f32.xlu0 %v4088_v33 }
0x184a   : > { %7128 = vpow2.f32 %v4337_v2 }
0x184b   : > { %v8849_v14 = vpop.eup %7118  ;;  %7130 = vpow2.f32 %v4081_v30 }
0x184c   : > { %v4094_v53 = vsel %vm445_vm0, %v8849_v14, 0.0 }
0x184d   : > { %4095 = vadd.xlane.f32.xlu0 %v4094_v53 }
0x184f   : > { %v7121_v34 = vpop.eup %7120 }
0x1850   : > { %v7123_v36 = vpop.eup %7122  ;;  %v4348_v26 = vsel %vm445_vm0, %v7121_v34, 0.0 }
0x1851   : > { %4349 = vadd.xlane.f32.xlu0 %v4348_v26  ;;  %v4345_v59 = vsel %vm445_vm0, %v7123_v36, 0.0  ;;  %v7125_v54 = vpop.eup %7124  ;;  %v4341_v49 = vmul.f32 %v7123_v36, %v8703_v7 }
0x1852   : > { %4346 = vadd.xlane.f32.xlu1 %v4345_v59  ;;  %v4085_v63 = vsel %vm445_vm0, %v7125_v54, 0.0 }
0x1853   : > { %v7127_v17 = vpop.eup %7126 }
0x1854   : > { %v4354_v45 = vsel %vm445_vm0, %v7127_v17, 0.0  ;;  %v7129_v38 = vpop.eup %7128 }
0x1855   : > { %4355 = vadd.xlane.f32.xlu0 %v4354_v45  ;;  %v4351_v61 = vsel %vm445_vm0, %v7129_v38, 0.0  ;;  %v8858_v21 = vpop.eup %7130 }
0x1856   : > { %4086 = vadd.xlane.f32.xlu1 %v4085_v63  ;;  %v4091_v29 = vsel %vm445_vm0, %v8858_v21, 0.0 }
0x185a   : > { %4352 = vadd.xlane.f32.xlu1 %v4351_v61  ;;  %v4344_v61 = vmul.f32 %v7127_v17, %v8723_v41 }
0x185e   : > { %4092 = vadd.xlane.f32.xlu1 %v4091_v29 }
0x186f   : > { %3631 = vrot.lane.b32.xlu1 %v8559_v23, %s7394_s16  ;;  %v4342_v23 = vmul.f32 %v7121_v34, %v8698_v10 }
0x18d6   : > { %v4090_v25 = vpop.xlane.xlu0 %4089 }
0x18da   : > { %v4096_v40 = vpop.xlane.xlu0 %4095 }
0x18de   : > { %v4350_v11 = vpop.xlane.xlu0 %4349 }
0x18df   : > { %7132 = vrcp.f32 %v4350_v11  ;;  %v4347_v56 = vpop.xlane.xlu1 %4346 }
0x18e0   : > { %7134 = vrcp.f32 %v4347_v56 }
0x18e2   : > { %v4356_v31 = vpop.xlane.xlu0 %4355 }
0x18e3   : > { %v4087_v44 = vpop.xlane.xlu1 %4086 }
0x18e4   : > { %7136 = vrcp.f32 %v4087_v44 }
0x18e5   : > { %7138 = vrcp.f32 %v4356_v31 }
0x18e7   : > { %v4353_v46 = vpop.xlane.xlu1 %4352 }
0x18e8   : > { %7140 = vrcp.f32 %v4353_v46 }
0x18e9   : > { %v7133_v55 = vpop.eup %7132  ;;  %7142 = vrcp.f32 %v4090_v25 }
0x18ea   : > { %v7135_v6 = vpop.eup %7134  ;;  %v4362_v2 = vmul.f32 %v7133_v55, %v4342_v23 }
0x18eb   : > { %v4093_v18 = vpop.xlane.xlu1 %4092  ;;  %v4361_v52 = vmul.f32 %v7135_v6, %v4341_v49 }
0x18ec   : > { %7144 = vrcp.f32 %v4093_v18  ;;  %v4465_v59 = vsel %vm445_vm0, %v4362_v2, 0.0 }
0x18ed   : > { %v4462_v42 = vsel %vm445_vm0, %v4361_v52, 0.0  ;;  %7146 = vrcp.f32 %v4096_v40 }
0x18ee   : > { %v7137_v33 = vpop.eup %7136  ;;  %4463 = vadd.xlane.f32.xlu0 %v4462_v42 }
0x18ef   : > { %v3632_v30 = vpop.permute.xlu1 %3631  ;;  %v4101_v53 = vmul.f32 %v7137_v33, %v7125_v54  ;;  %v7139_v34 = vpop.eup %7138  ;;  %v4343_v54 = vmul.f32 %v7129_v38, %v8710_v12 }
0x18f0   : > { %v8869_v26 = vadd.f32 %v8767_v5, %v3632_v30  ;;  %v8872_v7 = vadd.f32 %v8765_v51, %v3632_v30  ;;  %v8875_v36 = vadd.f32 %v8771_v35, %v3632_v30  ;;  %v8878_v10 = vadd.f32 %v8769_v32, %v3632_v30 }
0x18f1   : > { %v4105_v45 = vsel %vm380_vm13, 0.0, %v4101_v53  ;;  %v4364_v38 = vmul.f32 %v7139_v34, %v4344_v61 }
0x18f2   : > { %v7141_v5 = vpop.eup %7140  ;;  %4466 = vadd.xlane.f32.xlu0 %v4465_v59  ;;  %6268 = vmatprep.mubr.msk.f32.mxu0 %vm445_vm0, %v4105_v45  ;;  %v6576_v51 = vpack.c.bf16 %v8872_v7, %v8869_v26  ;;  %v6580_v32 = vpack.c.bf16 %v8878_v10, %v8875_v36  ;;  %v6817_v35 = vpack.i.bf16 %v8878_v10, %v8875_v36 }
0x18f3   : > { %v4363_v63 = vmul.f32 %v7141_v5, %v4343_v54  ;;  %v6812_v29 = vpack.i.bf16 %v8872_v7, %v8869_v26  ;;  %v7143_v25 = vpop.eup %7142  ;;  %v4471_v11 = vsel %vm445_vm0, %v4364_v38, 0.0 }
0x18f4   : > { %6577 = vmatprep.subr.bf16.mxu0 %v6576_v51  ;;  %v4102_v56 = vmul.f32 %v7143_v25, %v8845_v16 }
0x18f5   : > { %6579 = vmatpush3.bf16.msra.mxu0 %v6576_v51  ;;  %v4468_v12 = vsel %vm445_vm0, %v4363_v63, 0.0 }
0x18f6   : > { %4469 = vadd.xlane.f32.xlu0 %v4468_v12  ;;  %6581 = vmatprep.subr.bf16.mxu0 %v6580_v32  ;;  %v7145_v40 = vpop.eup %7144 }
0x18f7   : > { %v7147_v41 = vpop.eup %7146  ;;  %v4103_v17 = vmul.f32 %v7145_v40, %v8858_v21 }
0x18f8   : > { %v4104_v44 = vmul.f32 %v7147_v41, %v8849_v14 }
0x18f9   : > { %6583 = vmatpush3.bf16.msra.mxu0 %v6580_v32 }
0x18fa   : > { %4472 = vadd.xlane.f32.xlu0 %v4471_v11  ;;  %6597 = vmatprep.subr.msk.bf16.mxu0 %vm7777_vm11, %v9186_v19 }
0x18fc   : > { %6269 = vmatmul.mubr.msk.f32.vlgmr.msra.gmra.mrb[52].mxu0 %vm445_vm0, %v4102_v56 }
0x18fd   : > { %6271 = vmatprep.mubr.msk.f32.mxu0 %vm445_vm0, %v4103_v17  ;;  %6599 = vmatpush3.bf16.msk.msra.mxu0 %vm7777_vm11, %v9186_v19 }
0x18fe   : > { %6601 = vmatprep.subr.msk.bf16.mxu0 %vm7781_vm12, %v9186_v19 }
0x1900   : > { %6272 = vmatmul.mubr.msk.f32.gmra.mrb[54].mxu0 %vm445_vm0, %v4104_v44 }
0x1901   : > { %6603 = vmatpush3.bf16.msk.msra.mxu0 %vm7781_vm12, %v9186_v19  ;;  %6296 = vmatprep.mubr.msk.f32.mxu0 %vm445_vm0, %v4361_v52 }
0x1904   : > { %6297 = vmatmul.mubr.msk.f32.vlgmr.msra.gmra.mrb[56].mxu0 %vm445_vm0, %v4362_v2 }
0x1905   : > { %6299 = vmatprep.mubr.msk.f32.mxu0 %vm445_vm0, %v4363_v63 }
0x1908   : > { %6300 = vmatmul.mubr.msk.f32.gmra.mrb[58].mxu0 %vm445_vm0, %v4364_v38 }
0x197b   : > { %v4464_v8 = vpop.xlane.xlu0 %4463 }
0x197f   : > { %v4467_v16 = vpop.xlane.xlu0 %4466 }
0x1983   : > { %v4470_v9 = vpop.xlane.xlu0 %4469 }
0x1987   : > { %v4473_v52 = vpop.xlane.xlu0 %4472 }
0x19cf   : > { %v8918_v14 = vpop.f32.mrb[52].mxu0 }
0x19d0   : > { %v8920_v21 = vpop.f32.mrb[53].mxu0 }
0x19d3   : > { %v8922_v31 = vpop.f32.mrb[54].mxu0 }
0x19d4   : > { %v8924_v46 = vpop.f32.mrb[55].mxu0 }
0x19d7   : > { %v6298_v19 = vpop.f32.mrb[56].mxu0 }
0x19d8   : > { %v4475_v55 = vsub.f32 %v4467_v16, %v6298_v19  ;;  %v4443_v49 = vpop.f32.mrb[57].mxu0 }
0x19d9   : > { %v4474_v6 = vsub.f32 %v4464_v8, %v4443_v49 }
0x19da   : > { %v4479_v18 = vmul.f32 %v8774_v48, %v4475_v55 }
0x19db   : > { %v4478_v23 = vmul.f32 %v8778_v27, %v4474_v6  ;;  %v6301_v42 = vpop.f32.mrb[58].mxu0 }
0x19dc   : > { %v4483_v2 = vmax.f32 %v4479_v18, 0.0  ;;  %v4477_v33 = vsub.f32 %v4473_v52, %v6301_v42  ;;  %v4453_v30 = vpop.f32.mrb[59].mxu0 }
0x19dd   : > { %v4482_v53 = vmax.f32 %v4478_v23, 0.0  ;;  %v4476_v34 = vsub.f32 %v4470_v9, %v4453_v30 }
0x19de   : > { %7148 = vrsqrt.f32 %v4483_v2  ;;  %v4481_v59 = vmul.f32 %v8786_v43, %v4477_v33  ;;  %vm4495_vm11 = vcmp.eq.f32.partialorder %v4483_v2, inf  ;;  %v4498_v27 = vand.u32 2147483648, %v4483_v2 }
0x19df   : > { %7150 = vrsqrt.f32 %v4482_v53  ;;  %v4480_v45 = vmul.f32 %v8790_v1, %v4476_v34  ;;  %vm4497_vm12 = vcmp.eq.f32.partialorder %v4483_v2, 0.0  ;;  %vm4488_vm14 = vcmp.eq.f32.partialorder %v4482_v53, inf }
0x19e0   : > { %v4485_v54 = vmax.f32 %v4481_v59, 0.0  ;;  %v4491_v12 = vand.u32 2147483648, %v4482_v53  ;;  %vm4490_vm7 = vcmp.eq.f32.partialorder %v4482_v53, 0.0 }
0x19e1   : > { %v4484_v5 = vmax.f32 %v4480_v45, 0.0 }
0x19e2   : > { %7152 = vrsqrt.f32 %v4485_v54  ;;  %vm4509_vm8 = vcmp.eq.f32.partialorder %v4485_v54, inf  ;;  %vm4511_vm9 = vcmp.eq.f32.partialorder %v4485_v54, 0.0  ;;  %v4512_v44 = vand.u32 2147483648, %v4485_v54 }
0x19e3   : > { %7154 = vrsqrt.f32 %v4484_v5  ;;  %vm4502_vm10 = vcmp.eq.f32.partialorder %v4484_v5, inf  ;;  %v4505_v16 = vand.u32 2147483648, %v4484_v5  ;;  %vm4504_vm2 = vcmp.eq.f32.partialorder %v4484_v5, 0.0 }
0x19e8   : > { %v7149_v48 = vpop.eup %7148 }
0x19e9   : > { %v7151_v51 = vpop.eup %7150  ;;  %v4494_v32 = vmul.f32 %v7149_v48, %v4483_v2 }
0x19ea   : > { %v4487_v63 = vmul.f32 %v7151_v51, %v4482_v53 }
0x19eb   : > { %v4496_v61 = vsel %vm4495_vm11, %v4483_v2, %v4494_v32 }
0x19ec   : > { %v7153_v38 = vpop.eup %7152  ;;  %v4499_v25 = vsel %vm4497_vm12, %v4498_v27, %v4496_v61  ;;  %v4489_v43 = vsel %vm4488_vm14, %v4482_v53, %v4487_v63 }
0x19ed   : > { %v7155_v40 = vpop.eup %7154  ;;  %v4515_v1 = vmul.f32 %v4499_v25, %v7895_v4  ;;  %v4492_v11 = vsel %vm4490_vm7, %v4491_v12, %v4489_v43  ;;  %v4508_v56 = vmul.f32 %v7153_v38, %v4485_v54 }
0x19ee   : > { %v4514_v41 = vmul.f32 %v4492_v11, %v7905_v22  ;;  %v4501_v17 = vmul.f32 %v7155_v40, %v4484_v5 }
0x19ef   : > { %v4520_v8 = vmul.f32 1.442695, %v4515_v1  ;;  %v4510_v9 = vsel %vm4509_vm8, %v4485_v54, %v4508_v56 }
0x19f0   : > { %v4518_v19 = vmul.f32 1.442695, %v4514_v41  ;;  %v4503_v55 = vsel %vm4502_vm10, %v4484_v5, %v4501_v17  ;;  %v4513_v49 = vsel %vm4511_vm9, %v4512_v44, %v4510_v9 }
0x19f1   : > { %7156 = vpow2.f32 %v4520_v8  ;;  %v4506_v6 = vsel %vm4504_vm2, %v4505_v16, %v4503_v55  ;;  %v4517_v4 = vmul.f32 %v4513_v49, %v7909_v57  ;;  %v8964_v55 = vld [vmem:[#allocation7 + $0x108] sm:$0xff] }
0x19f2   : > { %7158 = vpow2.f32 %v4518_v19  ;;  %v4516_v18 = vmul.f32 %v4506_v6, %v7903_v62  ;;  %v8962_v19 = vld [vmem:[#allocation7 + $0x100] sm:$0xff] }
0x19f3   : > { %v4524_v52 = vmul.f32 1.442695, %v4517_v4  ;;  %v6612_v49 = vpack.c.bf16 %v8964_v55, %v8962_v19 }
0x19f4   : > { %v4522_v22 = vmul.f32 1.442695, %v4516_v18 }
0x19f5   : > { %7160 = vpow2.f32 %v4524_v52  ;;  %6613 = vmatprep.subr.bf16.mxu1 %v6612_v49 }
0x19f6   : > { %7162 = vpow2.f32 %v4522_v22  ;;  %6615 = vmatpush3.bf16.msra.mxu1 %v6612_v49 }
0x19fb   : > { %v7157_v23 = vpop.eup %7156 }
0x19fc   : > { %v7159_v42 = vpop.eup %7158  ;;  %v4527_v2 = vmax.f32 %v7157_v23, 1e-05 }
0x19fd   : > { %v4526_v33 = vmax.f32 %v7159_v42, 1e-05 }
0x19fe   : > { %v4531_v30 = vmin.f32 %v4527_v2, 100000.0 }
0x19ff   : > { %v7161_v53 = vpop.eup %7160  ;;  %v4530_v34 = vmin.f32 %v4526_v33, 100000.0 }
0x1a00   : > { %v7163_v59 = vpop.eup %7162  ;;  %v4535_v45 = vmul.f32 %v4531_v30, %v8809_v60  ;;  %v4529_v54 = vmax.f32 %v7161_v53, 1e-05 }
0x1a01   : > { %v4534_v57 = vmul.f32 %v4530_v34, %v8814_v58  ;;  %v4528_v5 = vmax.f32 %v7163_v59, 1e-05 }
0x1a02   : > { %v4539_v62 = vsel %vm8595_vm3, %v4535_v45, -1e+32  ;;  %v4533_v48 = vmin.f32 %v4529_v54, 100000.0 }
0x1a03   : > { %v4545_v51 = vsel %vm445_vm0, %v4539_v62, -inf  ;;  %v4538_v32 = vsel %vm8603_vm4, %v4534_v57, -1e+32  ;;  %v4532_v27 = vmin.f32 %v4528_v5, 100000.0 }
0x1a04   : > { %4546 = vmax.xlane.f32.xlu0 %v4545_v51  ;;  %v4542_v63 = vsel %vm445_vm0, %v4538_v32, -inf  ;;  %v4537_v61 = vmul.f32 %v4533_v48, %v8826_v47  ;;  %v8976_v48 = vld [vmem:[#allocation7 + $0xf8] sm:$0xff] }
0x1a05   : > { %4543 = vmax.xlane.f32.xlu1 %v4542_v63  ;;  %v4536_v60 = vmul.f32 %v4532_v27, %v8833_v13 }
0x1a06   : > { %v4541_v12 = vsel %vm8621_vm5, %v4537_v61, -1e+32  ;;  %v8992_v61 = vld [vmem:[#allocation7 + $0x131] ss:$0 sm:$0xff] }
0x1a07   : > { %v4540_v58 = vsel %vm8630_vm6, %v4536_v60, -1e+32  ;;  %v4551_v15 = vsel %vm445_vm0, %v4541_v12, -inf }
0x1a08   : > { %v4548_v39 = vsel %vm445_vm0, %v4540_v58, -inf }
0x1a09   : > { %4549 = vmax.xlane.f32.xlu0 %v4548_v39 }
0x1a0d   : > { %4552 = vmax.xlane.f32.xlu0 %v4551_v15 }
0x1a16   : > { %6818 = vrot.lane.b32.xlu1 %v6817_v35, %s7391_s24 }
0x1a91   : > { %v4547_v13 = vpop.xlane.xlu0 %4546 }
0x1a92   : > { %v4555_v38 = vsub.f32 %v4539_v62, %v4547_v13  ;;  %v4544_v47 = vpop.xlane.xlu1 %4543  ;;  %v8974_v62 = vld [vmem:[#allocation7 + $0xf0] sm:$0xff] }
0x1a93   : > { %v4554_v25 = vsub.f32 %v4538_v32, %v4544_v47  ;;  %v6616_v51 = vpack.c.bf16 %v8976_v48, %v8974_v62 }
0x1a94   : > { %v4560_v0 = vmul.f32 1.442695, %v4555_v38 }
0x1a95   : > { %v4558_v43 = vmul.f32 1.442695, %v4554_v25  ;;  %6617 = vmatprep.subr.bf16.mxu1 %v6616_v51 }
0x1a96   : > { %7164 = vpow2.f32 %v4560_v0  ;;  %v4550_v40 = vpop.xlane.xlu0 %4549  ;;  %v6819_v22 = vpop.permute.xlu1 %6818 }
0x1a97   : > { %7166 = vpow2.f32 %v4558_v43  ;;  %v4556_v1 = vsub.f32 %v4540_v58, %v4550_v40  ;;  %v6821_v7 = vunpack.i.h.bf16 %v6819_v22  ;;  %v6820_v42 = vunpack.i.l.bf16 %v6819_v22  ;;  %v7216_v40 = vld [vmem:[#allocation7 + $0xd0] sm:$0xff] }
0x1a99   : > { %v4562_v56 = vmul.f32 1.442695, %v4556_v1  ;;  %v6608_v34 = vpack.c.bf16 %v6821_v7, %v6820_v42  ;;  %v7217_v1 = vld [vmem:[#allocation7 + $0xd8] sm:$0xff]  ;;  %v7219_v7 = vld [vmem:[#allocation7 + $0xe8] sm:$0xff] }
0x1a9a   : > { %v4553_v50 = vpop.xlane.xlu0 %4552 }
0x1a9b   : > { %v4557_v11 = vsub.f32 %v4541_v12, %v4553_v50  ;;  %v6822_v50 = vpack.i.bf16 %v7217_v1, %v7216_v40 }
0x1a9d   : > { %v4564_v41 = vmul.f32 1.442695, %v4557_v11 }
0x1a9f   : > { %7168 = vpow2.f32 %v4564_v41 }
0x1aa0   : > { %v7165_v17 = vpop.eup %7164  ;;  %7170 = vpow2.f32 %v4562_v56 }
0x1aa1   : > { %v4569_v36 = vsel %vm445_vm0, %v7165_v17, 0.0  ;;  %v7167_v10 = vpop.eup %7166 }
0x1aa2   : > { %4570 = vadd.xlane.f32.xlu0 %v4569_v36  ;;  %v4566_v35 = vsel %vm445_vm0, %v7167_v10, 0.0 }
0x1aa6   : > { %4567 = vadd.xlane.f32.xlu0 %v4566_v35 }
0x1aa9   : > { %v7169_v44 = vpop.eup %7168 }
0x1aaa   : > { %v4575_v8 = vsel %vm445_vm0, %v7169_v44, 0.0  ;;  %v7171_v16 = vpop.eup %7170 }
0x1aab   : > { %4576 = vadd.xlane.f32.xlu0 %v4575_v8  ;;  %v4572_v9 = vsel %vm445_vm0, %v7171_v16, 0.0 }
0x1aaf   : > { %4573 = vadd.xlane.f32.xlu0 %v4572_v9 }
0x1ac5   : > { %6813 = vrot.lane.b32.xlu0 %v6812_v29, %s7391_s24  ;;  %s5313_s24 = scalar_lea.sflag [#allocation4], %s7617_s20 }
0x1b2f   : > { %v4571_v6 = vpop.xlane.xlu0 %4570 }
0x1b33   : > { %v4568_v4 = vpop.xlane.xlu0 %4567 }
0x1b34   : > { %7172 = vrcp.f32 %v4568_v4 }
0x1b35   : > { %7174 = vrcp.f32 %v4571_v6 }
0x1b38   : > { %v4577_v18 = vpop.xlane.xlu0 %4576 }
0x1b3c   : > { %v4574_v52 = vpop.xlane.xlu0 %4573 }
0x1b3d   : > { %7176 = vrcp.f32 %v4574_v52 }
0x1b3e   : > { %v7173_v23 = vpop.eup %7172  ;;  %7178 = vrcp.f32 %v4577_v18 }
0x1b3f   : > { %v4582_v26 = vmul.f32 %v7173_v23, %v7167_v10  ;;  %v7175_v59 = vpop.eup %7174 }
0x1b40   : > { %v6814_v29 = vpop.permute.xlu0 %6813  ;;  %v4583_v54 = vmul.f32 %v7175_v59, %v7165_v17  ;;  %v5099_v59 = vld [vmem:[#allocation7 + $0x110] sm:$0xff] }
0x1b41   : > { %v6816_v2 = vunpack.i.h.bf16 %v6814_v29  ;;  %v6815_v33 = vunpack.i.l.bf16 %v6814_v29  ;;  %v4586_v30 = vsel %vm380_vm13, 0.0, %v4582_v26  ;;  %v7218_v26 = vld [vmem:[#allocation7 + $0xe0] sm:$0xff] }
0x1b42   : > { %6310 = vmatprep.mubr.msk.f32.mxu0 %vm445_vm0, %v4586_v30  ;;  %v6827_v29 = vpack.i.bf16 %v7219_v7, %v7218_v26 }
0x1b43   : > { %v6604_v53 = vpack.c.bf16 %v6816_v2, %v6815_v33 }
0x1b45   : > { %6605 = vmatprep.subr.bf16.mxu0 %v6604_v53 }
0x1b46   : > { %6607 = vmatpush3.bf16.msra.mxu0 %v6604_v53  ;;  %v6832_v53 = vpack.i.bf16 %v8976_v48, %v8974_v62 }
0x1b47   : > { %6609 = vmatprep.subr.bf16.mxu0 %v6608_v34  ;;  %v7177_v45 = vpop.eup %7176 }
0x1b48   : > { %v7179_v57 = vpop.eup %7178  ;;  %v4584_v5 = vmul.f32 %v7177_v45, %v7171_v16  ;;  %v5100_v45 = vld [vmem:[#allocation7 + $0x118] sm:$0xff] }
0x1b49   : > { %v4585_v24 = vmul.f32 %v7179_v57, %v7169_v44  ;;  %v5102_v57 = vld [vmem:[#allocation7 + $0x128] sm:$0xff] }
0x1b4a   : > { %6611 = vmatpush3.bf16.msra.mxu0 %v6608_v34  ;;  %v6837_v34 = vpack.i.bf16 %v8964_v55, %v8962_v19 }
0x1b4d   : > { %6311 = vmatmul.mubr.msk.f32.vlgmr.msra.gmra.mrb[60].mxu0 %vm445_vm0, %v4583_v54  ;;  %v5101_v54 = vld [vmem:[#allocation7 + $0x120] sm:$0xff] }
0x1b4e   : > { %6313 = vmatprep.mubr.msk.f32.mxu0 %vm445_vm0, %v4584_v5  ;;  %v6842_v5 = vpack.i.bf16 %v5100_v45, %v5099_v59 }
0x1b51   : > { %6314 = vmatmul.mubr.msk.f32.gmra.mrb[62].mxu0 %vm445_vm0, %v4585_v24  ;;  %v6847_v24 = vpack.i.bf16 %v5102_v57, %v5101_v54 }
0x1c20   : > { %v6312_v32 = vpop.f32.mrb[60].mxu0 }
0x1c21   : > { %v4684_v27 = vpop.f32.mrb[61].mxu0 }
0x1c22   : > { %6320 = vmatprep.mubr.msk.f32.mxu1 %vm543_vm1, %v4684_v27 }
0x1c23   : > { %6321 = vmatmul.mubr.msk.f32.vlgmr.msra.gmra.mrb[40].mxu1 %vm543_vm1, %v6312_v32 }
0x1c24   : > { %v6315_v63 = vpop.f32.mrb[62].mxu0  ;;  %6619 = vmatpush3.bf16.msra.mxu1 %v6616_v51  ;;  %v7220_v51 = vld [vmem:[#allocation7 + $0x130] ss:$0 sm:$0xff] }
0x1c25   : > { %v4694_v60 = vpop.f32.mrb[63].mxu0 }
0x1c26   : > { %6323 = vmatprep.mubr.msk.f32.mxu1 %vm543_vm1, %v4694_v60 }
0x1c27   : > { %6324 = vmatmul.mubr.msk.f32.gmra.mrb[42].mxu1 %vm543_vm1, %v6315_v63 }
0x1c28   : > { %6330 = vmatprep.mubr.msk.f32.mxu1 %vm543_vm1, %v8920_v21 }
0x1c2b   : > { %6331 = vmatmul.mubr.msk.f32.vlgmr.msra.gmra.mrb[40].mxu1 %vm543_vm1, %v8918_v14 }
0x1c2c   : > { %6333 = vmatprep.mubr.msk.f32.mxu1 %vm543_vm1, %v8924_v46 }
0x1c2f   : > { %6334 = vmatmul.mubr.msk.f32.gmra.mrb[42].mxu1 %vm543_vm1, %v8922_v31 }
0x1cfe   : > { %v6332_v58 = vpop.f32.mrb[40].mxu1 }
0x1cff   : > { %v4905_v39 = vadd.f32 %v6332_v58, %v8992_v61  ;;  %v4880_v12 = vpop.f32.mrb[41].mxu1 }
0x1d00   : > { %v4904_v15 = vadd.f32 %v8992_v61, %v4880_v12 }
0x1d01   : > { %v4909_v13 = vadd.f32 %v4905_v39, %v8541_v37 }
0x1d02   : > { %v4908_v21 = vadd.f32 %v4904_v15, %v8539_v20  ;;  %v6335_v38 = vpop.f32.mrb[42].mxu1 }
0x1d03   : > { %v4890_v14 = vpop.f32.mrb[43].mxu1  ;;  %v4915_v47 = vsel %vm445_vm0, %v4909_v13, 0.0  ;;  %v4907_v46 = vadd.f32 %v6335_v38, %v8992_v61 }
0x1d04   : > { %v4906_v31 = vadd.f32 %v8992_v61, %v4890_v14  ;;  %4916 = vadd.xlane.f32.xlu1 %v4915_v47  ;;  %v4912_v25 = vsel %vm445_vm0, %v4908_v21, 0.0 }
0x1d05   : > { %4913 = vadd.xlane.f32.xlu0 %v4912_v25  ;;  %v4911_v43 = vadd.f32 %v4907_v46, %v8553_v3 }
0x1d06   : > { %v4910_v0 = vadd.f32 %v4906_v31, %v8551_v28 }
0x1d07   : > { %v4921_v20 = vsel %vm445_vm0, %v4911_v43, 0.0 }
0x1d08   : > { %v4918_v37 = vsel %vm445_vm0, %v4910_v0, 0.0 }
0x1d09   : > { %4919 = vadd.xlane.f32.xlu0 %v4918_v37 }
0x1d0d   : > { %4922 = vadd.xlane.f32.xlu0 %v4921_v20 }
0x1d15   : > { %6823 = vrot.lane.b32.xlu1 %v6822_v50, %s7396_s7 }
0x1d91   : > { %v4917_v11 = vpop.xlane.xlu1 %4916 }
0x1d92   : > { %v4925_v56 = vmul.f32 0.03125, %v4917_v11  ;;  %v4914_v41 = vpop.xlane.xlu0 %4913 }
0x1d93   : > { %v4924_v17 = vmul.f32 0.03125, %v4914_v41 }
0x1d94   : > { %v9007_v36 = vsub.f32 %v4909_v13, %v4925_v56 }
0x1d95   : > { %v9009_v28 = vsub.f32 %v4908_v21, %v4924_v17  ;;  %v6824_v3 = vpop.permute.xlu1 %6823 }
0x1d96   : > { %v4920_v10 = vpop.xlane.xlu0 %4919  ;;  %v4933_v35 = vmul.f32 %v9007_v36, %v9007_v36  ;;  %v6826_v44 = vunpack.i.h.bf16 %v6824_v3  ;;  %v6825_v8 = vunpack.i.l.bf16 %v6824_v3 }
0x1d97   : > { %v4932_v16 = vmul.f32 %v9009_v28, %v9009_v28  ;;  %v4926_v42 = vmul.f32 0.03125, %v4920_v10 }
0x1d98   : > { %v4939_v9 = vsel %vm445_vm0, %v4933_v35, 0.0  ;;  %v6620_v49 = vpack.c.bf16 %v6826_v44, %v6825_v8 }
0x1d99   : > { %4940 = vadd.xlane.f32.xlu0 %v4939_v9  ;;  %v4936_v6 = vsel %vm445_vm0, %v4932_v16, 0.0  ;;  %v9025_v2 = vsub.f32 %v4910_v0, %v4926_v42 }
0x1d9a   : > { %4937 = vadd.xlane.f32.xlu1 %v4936_v6  ;;  %v4923_v4 = vpop.xlane.xlu0 %4922  ;;  %6621 = vmatprep.subr.bf16.mxu0 %v6620_v49 }
0x1d9b   : > { %v4927_v18 = vmul.f32 0.03125, %v4923_v4  ;;  %6623 = vmatpush3.bf16.msra.mxu0 %v6620_v49  ;;  %v4934_v33 = vmul.f32 %v9025_v2, %v9025_v2 }
0x1d9d   : > { %v9017_v52 = vsub.f32 %v4911_v43, %v4927_v18  ;;  %v4942_v30 = vsel %vm445_vm0, %v4934_v33, 0.0 }
0x1d9f   : > { %v4935_v22 = vmul.f32 %v9017_v52, %v9017_v52 }
0x1da1   : > { %v4945_v23 = vsel %vm445_vm0, %v4935_v22, 0.0 }
0x1da2   : > { %4946 = vadd.xlane.f32.xlu0 %v4945_v23 }
0x1dab   : > { %4965 = vrot.lane.b32.xlu1 %v8992_v61, %s7394_s16 }
0x1db8   : > { %6828 = vrot.lane.b32.xlu0 %v6827_v29, %s7396_s7 }
0x1dbc   : > { %6833 = vrot.lane.b32.xlu0 %v6832_v53, %s7394_s16 }
0x1dc0   : > { %6843 = vrot.lane.b32.xlu0 %v6842_v5, %s7394_s16 }
0x1dc4   : > { %4991 = vrot.lane.b32.xlu0 %v7220_v51, %s7396_s7 }
0x1dcf   : > { %4943 = vadd.xlane.f32.xlu1 %v4942_v30 }
0x1de0   : > { %4972 = vrot.lane.b32.xlu1 %v8992_v61, %s7396_s7 }
0x1de4   : > { %6838 = vrot.lane.b32.xlu1 %v6837_v34, %s7394_s16 }
0x1de8   : > { %6848 = vrot.lane.b32.xlu1 %v6847_v24, %s7394_s16 }
0x1dec   : > { %5135 = vrot.lane.b32.xlu1 %v8992_v61, %s7397_s1 }
0x1e26   : > { %v4941_v19 = vpop.xlane.xlu0 %4940 }
0x1e27   : > { %v4938_v63 = vpop.xlane.xlu1 %4937  ;;  %v4949_v60 = vmul.f32 0.03125, %v4941_v19 }
0x1e28   : > { %v4948_v58 = vmul.f32 0.03125, %v4938_v63 }
0x1e29   : > { %v4953_v39 = vadd.f32 1e-05, %v4949_v60 }
0x1e2a   : > { %v4952_v12 = vadd.f32 1e-05, %v4948_v58 }
0x1e2b   : > { %7180 = vrsqrt.f32 %v4953_v39  ;;  %v4966_v38 = vpop.permute.xlu1 %4965 }
0x1e2c   : > { %7182 = vrsqrt.f32 %v4952_v12 }
0x1e2f   : > { %v4947_v55 = vpop.xlane.xlu0 %4946 }
0x1e30   : > { %v4951_v15 = vmul.f32 0.03125, %v4947_v55 }
0x1e32   : > { %v4955_v61 = vadd.f32 1e-05, %v4951_v15 }
0x1e33   : > { %v6829_v62 = vpop.permute.xlu0 %6828 }
0x1e34   : > { %v6831_v48 = vunpack.i.h.bf16 %v6829_v62  ;;  %v6830_v32 = vunpack.i.l.bf16 %v6829_v62  ;;  %7184 = vrsqrt.f32 %v4955_v61 }
0x1e35   : > { %v7181_v13 = vpop.eup %7180 }
0x1e36   : > { %v6624_v27 = vpack.c.bf16 %v6831_v48, %v6830_v32  ;;  %v7183_v21 = vpop.eup %7182  ;;  %v4961_v47 = vmul.f32 %v7181_v13, %v9007_v36 }
0x1e37   : > { %v4960_v14 = vmul.f32 %v7183_v21, %v9009_v28  ;;  %v6834_v1 = vpop.permute.xlu0 %6833 }
0x1e38   : > { %6625 = vmatprep.subr.bf16.mxu0 %v6624_v27  ;;  %v4969_v0 = vmul.f32 %v4966_v38, %v4961_v47  ;;  %v6836_v56 = vunpack.i.h.bf16 %v6834_v1  ;;  %v6835_v41 = vunpack.i.l.bf16 %v6834_v1 }
0x1e39   : > { %6627 = vmatpush3.bf16.msra.mxu0 %v6624_v27  ;;  %v4968_v25 = vmul.f32 %v4966_v38, %v4960_v14 }
0x1e3a   : > { %v6628_v28 = vpack.c.bf16 %v6836_v56, %v6835_v41 }
0x1e3b   : > { %v6844_v44 = vpop.permute.xlu0 %6843 }
0x1e3c   : > { %6629 = vmatprep.subr.bf16.mxu0 %v6628_v28  ;;  %v6846_v9 = vunpack.i.h.bf16 %v6844_v44  ;;  %v6845_v49 = vunpack.i.l.bf16 %v6844_v44 }
0x1e3e   : > { %v7185_v11 = vpop.eup %7184  ;;  %v6636_v4 = vpack.c.bf16 %v6846_v9, %v6845_v49 }
0x1e3f   : > { %v4963_v35 = vmul.f32 %v7185_v11, %v9017_v52  ;;  %v4992_v29 = vpop.permute.xlu0 %4991 }
0x1e41   : > { %v4971_v23 = vmul.f32 %v4966_v38, %v4963_v35  ;;  %v5669_v35 = vld [vmem:[#allocation7 + $0x132] ss:$0 sm:$0xff] }
0x1e5c   : > { %v4944_v46 = vpop.xlane.xlu1 %4943 }
0x1e5d   : > { %v4950_v31 = vmul.f32 0.03125, %v4944_v46 }
0x1e5f   : > { %v4954_v43 = vadd.f32 1e-05, %v4950_v31 }
0x1e60   : > { %v4973_v37 = vpop.permute.xlu1 %4972 }
0x1e61   : > { %7186 = vrsqrt.f32 %v4954_v43  ;;  %v4975_v20 = vadd.f32 %v4973_v37, %v4968_v25  ;;  %v4976_v40 = vadd.f32 %v4973_v37, %v4969_v0  ;;  %v4978_v7 = vadd.f32 %v4973_v37, %v4971_v23 }
0x1e63   : > { %6344 = vmatprep.mubr.msk.f32.mxu0 %vm445_vm0, %v4975_v20 }
0x1e64   : > { %6345 = vmatmul.mubr.msk.f32.vlgmr.msra.gmra.mrb[64].mxu0 %vm445_vm0, %v4976_v40  ;;  %v6839_v50 = vpop.permute.xlu1 %6838 }
0x1e65   : > { %v6841_v17 = vunpack.i.h.bf16 %v6839_v50  ;;  %v6840_v36 = vunpack.i.l.bf16 %v6839_v50  ;;  %6631 = vmatpush3.bf16.msra.mxu0 %v6628_v28 }
0x1e67   : > { %v6632_v3 = vpack.c.bf16 %v6841_v17, %v6840_v36 }
0x1e68   : > { %v6849_v8 = vpop.permute.xlu1 %6848 }
0x1e69   : > { %6633 = vmatprep.subr.bf16.mxu0 %v6632_v3  ;;  %v6851_v18 = vunpack.i.h.bf16 %v6849_v8  ;;  %v6850_v22 = vunpack.i.l.bf16 %v6849_v8 }
0x1e6a   : > { %6635 = vmatpush3.bf16.msra.mxu0 %v6632_v3 }
0x1e6b   : > { %v7187_v10 = vpop.eup %7186  ;;  %v6640_v52 = vpack.c.bf16 %v6851_v18, %v6850_v22  ;;  %6637 = vmatprep.subr.bf16.mxu0 %v6636_v4 }
0x1e6c   : > { %v4962_v16 = vmul.f32 %v7187_v10, %v9025_v2  ;;  %v5136_v51 = vpop.permute.xlu1 %5135 }
0x1e6e   : > { %v4970_v6 = vmul.f32 %v4966_v38, %v4962_v16  ;;  %6639 = vmatpush3.bf16.msra.mxu0 %v6636_v4 }
0x1e6f   : > { %6641 = vmatprep.subr.bf16.mxu0 %v6640_v52 }
0x1e70   : > { %v4977_v26 = vadd.f32 %v4973_v37, %v4970_v6 }
0x1e72   : > { %6347 = vmatprep.mubr.msk.f32.mxu0 %vm445_vm0, %v4977_v26  ;;  %6643 = vmatpush3.bf16.msra.mxu0 %v6640_v52 }
0x1e73   : > { %6348 = vmatmul.mubr.msk.f32.gmra.mrb[66].mxu0 %vm445_vm0, %v4978_v7 }
0x1f37   : > { %v6346_v42 = vpop.f32.mrb[64].mxu0 }
0x1f38   : > { %v5078_v2 = vadd.f32 %v6346_v42, %v4992_v29  ;;  %v5072_v33 = vpop.f32.mrb[65].mxu0 }
0x1f39   : > { %v5073_v30 = vadd.f32 %v5072_v33, %v4992_v29 }
0x1f3a   : > { %v5092_v34 = vmax.f32 %v5078_v2, 0.0 }
0x1f3b   : > { %v5091_v53 = vmax.f32 %v5073_v30, 0.0 }
0x1f3d   : > { %6366 = vmatprep.mubr.msk.f32.mxu0 %vm1977_vm15, %v5091_v53 }
0x1f3e   : > { %6367 = vmatmul.mubr.msk.f32.vlgmr.msra.gmra.mrb[68].mxu0 %vm1977_vm15, %v5092_v34 }
0x1f46   : > { %v6349_v59 = vpop.f32.mrb[66].mxu0 }
0x1f47   : > { %v5088_v45 = vadd.f32 %v6349_v59, %v4992_v29  ;;  %v5082_v54 = vpop.f32.mrb[67].mxu0 }
0x1f48   : > { %v5083_v57 = vadd.f32 %v5082_v54, %v4992_v29 }
0x1f49   : > { %v5094_v24 = vmax.f32 %v5088_v45, 0.0 }
0x1f4a   : > { %v5093_v5 = vmax.f32 %v5083_v57, 0.0 }
0x1f4c   : > { %6369 = vmatprep.mubr.msk.f32.mxu0 %vm1977_vm15, %v5093_v5 }
0x1f4d   : > { %6370 = vmatmul.mubr.msk.f32.gmra.mrb[70].mxu0 %vm1977_vm15, %v5094_v24 }
0x2011   : > { %v6368_v19 = vpop.f32.mrb[68].mxu0 }
0x2012   : > { %v5222_v55 = vadd.f32 %v6368_v19, %v5136_v51  ;;  %v5216_v62 = vpop.f32.mrb[69].mxu0 }
0x2013   : > { %v5217_v48 = vadd.f32 %v5216_v62, %v5136_v51 }
0x2014   : > { %v5236_v32 = vadd.f32 %v5222_v55, %v4976_v40 }
0x2015   : > { %v5235_v27 = vadd.f32 %v5217_v48, %v4975_v20 }
0x2016   : > { %v5243_v63 = vsel %vm445_vm0, %v5236_v32, 0.0 }
0x2017   : > { %5244 = vadd.xlane.f32.xlu1 %v5243_v63  ;;  %v5240_v60 = vsel %vm445_vm0, %v5235_v27, 0.0 }
0x2018   : > { %5241 = vadd.xlane.f32.xlu0 %v5240_v60 }
0x2020   : > { %v6371_v58 = vpop.f32.mrb[70].mxu0 }
0x2021   : > { %v5226_v39 = vpop.f32.mrb[71].mxu0  ;;  %v5232_v12 = vadd.f32 %v6371_v58, %v5136_v51 }
0x2022   : > { %v5227_v15 = vadd.f32 %v5226_v39, %v5136_v51 }
0x2023   : > { %v5238_v21 = vadd.f32 %v5232_v12, %v4978_v7 }
0x2024   : > { %v5237_v13 = vadd.f32 %v5227_v15, %v4977_v26 }
0x2025   : > { %v5249_v61 = vsel %vm445_vm0, %v5238_v21, 0.0 }
0x2026   : > { %v5246_v38 = vsel %vm445_vm0, %v5237_v13, 0.0 }
0x2027   : > { %5247 = vadd.xlane.f32.xlu0 %v5246_v38 }
0x202b   : > { %5250 = vadd.xlane.f32.xlu0 %v5249_v61 }
0x20a4   : > { %v5245_v14 = vpop.xlane.xlu1 %5244 }
0x20a5   : > { %v5253_v47 = vmul.f32 0.03125, %v5245_v14  ;;  %v5242_v46 = vpop.xlane.xlu0 %5241 }
0x20a6   : > { %v5252_v31 = vmul.f32 0.03125, %v5242_v46 }
0x20a7   : > { %v5257_v25 = vsub.f32 %v5236_v32, %v5253_v47 }
0x20a8   : > { %v5256_v0 = vsub.f32 %v5235_v27, %v5252_v31 }
0x20a9   : > { %v5261_v43 = vmul.f32 %v5257_v25, %v5257_v25 }
0x20aa   : > { %v5260_v37 = vmul.f32 %v5256_v0, %v5256_v0 }
0x20ab   : > { %v5267_v20 = vsel %vm445_vm0, %v5261_v43, 0.0 }
0x20ac   : > { %5268 = vadd.xlane.f32.xlu0 %v5267_v20  ;;  %v5264_v40 = vsel %vm445_vm0, %v5260_v37, 0.0 }
0x20ad   : > { %5265 = vadd.xlane.f32.xlu1 %v5264_v40 }
0x20b4   : > { %v5248_v1 = vpop.xlane.xlu0 %5247 }
0x20b5   : > { %v5254_v50 = vmul.f32 0.03125, %v5248_v1 }
0x20b7   : > { %v5258_v11 = vsub.f32 %v5237_v13, %v5254_v50 }
0x20b8   : > { %v5251_v56 = vpop.xlane.xlu0 %5250 }
0x20b9   : > { %v5255_v41 = vmul.f32 0.03125, %v5251_v56  ;;  %v5262_v17 = vmul.f32 %v5258_v11, %v5258_v11 }
0x20bb   : > { %v5259_v36 = vsub.f32 %v5238_v21, %v5255_v41  ;;  %v5270_v28 = vsel %vm445_vm0, %v5262_v17, 0.0 }
0x20bc   : > { %5271 = vadd.xlane.f32.xlu1 %v5270_v28 }
0x20bd   : > { %v5263_v3 = vmul.f32 %v5259_v36, %v5259_v36 }
0x20bf   : > { %v5273_v10 = vsel %vm445_vm0, %v5263_v3, 0.0 }
0x20c0   : > { %5274 = vadd.xlane.f32.xlu0 %v5273_v10 }
0x20cd   : > { %5301 = vrot.lane.b32.xlu1 %v5669_v35, %s7394_s16 }
0x2139   : > { %v5269_v44 = vpop.xlane.xlu0 %5268 }
0x213a   : > { %v5277_v8 = vmul.f32 0.03125, %v5269_v44  ;;  %v5266_v16 = vpop.xlane.xlu1 %5265 }
0x213b   : > { %v5276_v9 = vmul.f32 0.03125, %v5266_v16 }
0x213c   : > { %v5281_v49 = vadd.f32 1e-05, %v5277_v8 }
0x213d   : > { %v5280_v6 = vadd.f32 1e-05, %v5276_v9 }
0x213e   : > { %7188 = vrsqrt.f32 %v5281_v49 }
0x213f   : > { %7190 = vrsqrt.f32 %v5280_v6 }
0x2148   : > { %v7189_v4 = vpop.eup %7188 }
0x2149   : > { %v7191_v18 = vpop.eup %7190  ;;  %v5272_v22 = vpop.xlane.xlu1 %5271  ;;  %v5289_v23 = vmul.f32 %v7189_v4, %v5257_v25 }
0x214a   : > { %v5278_v26 = vmul.f32 0.03125, %v5272_v22  ;;  %v5288_v7 = vmul.f32 %v7191_v18, %v5256_v0 }
0x214b   : > { %v5297_v52 = vmul.f32 %v5669_v35, %v5289_v23 }
0x214c   : > { %v5282_v29 = vadd.f32 1e-05, %v5278_v26  ;;  %v5296_v42 = vmul.f32 %v5669_v35, %v5288_v7 }
0x214d   : > { %v5302_v2 = vpop.permute.xlu1 %5301  ;;  %v5275_v33 = vpop.xlane.xlu0 %5274 }
0x214e   : > { %7192 = vrsqrt.f32 %v5282_v29  ;;  %v5304_v30 = vadd.f32 %v5302_v2, %v5296_v42  ;;  %v5305_v53 = vadd.f32 %v5302_v2, %v5297_v52  ;;  %v5279_v34 = vmul.f32 0.03125, %v5275_v33 }
0x2150   : > { %5308 = vst.msk [vmem:[%s326_s14] sm:$0xff] %vm445_vm0, %v5304_v30  ;;  %5309 = vst.msk [vmem:[%s326_s14 + $0x8] sm:$0xff] %vm445_vm0, %v5305_v53  ;;  %v5283_v59 = vadd.f32 1e-05, %v5279_v34 }
0x2152   : > { %7194 = vrsqrt.f32 %v5283_v59 }
0x2158   : > { %v7193_v45 = vpop.eup %7192 }
0x2159   : > { %v5290_v54 = vmul.f32 %v7193_v45, %v5258_v11 }
0x215b   : > { %v5298_v57 = vmul.f32 %v5669_v35, %v5290_v54 }
0x215c   : > { %v7195_v5 = vpop.eup %7194 }
0x215d   : > { %v5306_v24 = vadd.f32 %v5302_v2, %v5298_v57  ;;  %v5291_v51 = vmul.f32 %v7195_v5, %v5259_v36 }
0x215f   : > { %5310 = vst.msk [vmem:[%s326_s14 + $0x10] sm:$0xff] %vm445_vm0, %v5306_v24  ;;  %v5299_v19 = vmul.f32 %v5669_v35, %v5291_v51 }
0x2161   : > { %v5307_v55 = vadd.f32 %v5302_v2, %v5299_v19 }
0x2163   : > { %5311 = vst.msk [vmem:[%s326_s14 + $0x18] sm:$0xff] %vm445_vm0, %v5307_v55 }
0x2164   : > { %7322 = shalt.err (!%p7319_p8)
}
0x2165   : > { %s7323_s6 = scalar_lea.hbm %s9074_s17, 512  ;;  %s7327_s10 = scalar_lea.hbm %s9124_s5, 1024 }
0x2166   : > { %p7324_p10 = scmp.ne.s32.totalorder %s9074_s17, %s7323_s6  ;;  %p7328_p11 = scmp.lt.u32.totalorder %s9074_s17, %s9124_s5 }
0x2167   : > { %p7329_p13 = scmp.lt.u32.totalorder %s7327_s10, %s7323_s6  ;;  %p7331_p7 = scmp.lt.u32.totalorder %s7323_s6, %s9074_s17 }
0x2168   : > { %p7325_p0 = pnand %p7324_p10, %p7525_p12 }
0x2169   : > { %p7330_p3 = por %p7329_p13, %p7328_p11 }
0x216a   : > { %p7326_p4 = pneg %p7325_p0 }
0x216b   : > { %p7332_p9 = por %p7331_p7, %p7330_p3 }
0x216d   : > { %p7333_p1 = pnand %p7332_p9, %p7326_p4 }
0x216f   : > { %7336 = shalt.err (!%p7333_p1)
}
0x2170   : > { %s7399_s28 = smov 128   ;;  %s7400_s7 = smov 8  }
0x2171   : > { %6664 = dma.vmem_to_hbm [thread:$0]  (%p7525_p12), %s9068_s15, 512, %s9074_s17, %s5313_s24, %s7399_s28, %s7399_s28, %s7400_s7  }
0x2172 PF: > { %s5341_s1 = sand.u32 1, %s7371_s18   ;;  %p9202_p5 = scmp.ne.s32.totalorder %s9150_s25, 0 }
0x2173   : > { %p9203_p2 = scmp.ge.s32.totalorder %s7383_s21, 2  ;;  %s5342_s14 = scalar_lea.sflag [#allocation4], %s5341_s1 }
0x2175   : > { %p6678_p6 = pnand %p9203_p2, %p9202_p5 }
0x2177   : > { %7366 = dma.done.wait (!%p6678_p6), %s5342_s14, 512  }
0x2178   : > { %7368 = vsyncadd (!%p6678_p6), %s5342_s14, 4294966784  ;;  %s9204_s26 = sld [smem:[#allocation13_spill]]  ;;  %s9205_s20 = sld [smem:[#allocation14_spill]] }
0x2179   : > { %p21_p8 = scmp.ge.s32.totalorder %s7487_s30, 4   ;;  %s9206_s18 = smov %s7375_s19 }
0x217a   : > { %s9208_s21 = smov %s7487_s30 }
0x217b   :  { %23 = sbr.rel (!%p21_p8) target bundleno = 10 (0xa), region = 110 }
0x217e   : > { %s9207_s19 = smov %s9204_s26 }
0x2182   :  { %5347 = vsyncpa [#allocation3], 1 }
0x2183   :  { %5349 = vsyncpa [#allocation3 + $0x1], 1 }
0x2184   :  { %5350 = vsyncpa [#allocation6], 1 }
0x2185   :  { %5352 = vsyncpa [#allocation6 + $0x1], 1 }
0x2186   :  { %5353 = vsyncpa [#allocation4], 1 }
0x2187   :  { %5355 = vsyncpa [#allocation4 + $0x1], 1 }

</bundles_post_ra>
